<compile_context>
chip_gen: v6e
topology: v6e:2x2x1
jax: 0.10.0
libtpu: 0.0.40
codegen_flags: <defaults>
</compile_context>

<pallas_src>
import math

import jax
import jax.numpy as jnp
from jax.experimental import pallas as pl
from jax.experimental.pallas import tpu as pltpu


def _round_up(x, m):
    return ((x + m - 1) // m) * m


# ---------------------------------------------------------------------------
# Kernel 1: weighted pooling over the query + pooled half of the 1x1 conv,
# all batches in ONE grid step.
#   pooled[b, d] = sum_l softmax_l(mask_logits(q[b] @ pw))[l] * q[b, l, d]
#   add[b, n]    = sum_j pooled[b, j] * Wq[n, j] + bias[n]
# Query/softmax math stays f32 on the VPU/EUP; every reduction is over the
# minor (lane) axis; the degenerate matmuls never touch the MXU.
# ---------------------------------------------------------------------------
def _pooled_add_kernel(q_ref, qt_ref, mask_ref, pw_ref, wq_ref, bias_ref,
                       add_ref):
    # q_ref:    (B, Lq, D)  query
    # qt_ref:   (B, D, Lq)  query transposed (so both contractions are lane reduces)
    # mask_ref: (B, Lq)     f32 0/1
    # pw_ref:   (1, D)      WeightedPool weight
    # wq_ref:   (D, D)      pooled-query half of conv weight (out x in)
    # bias_ref: (1, D)
    # add_ref:  (B, D)      f32
    q = q_ref[...].astype(jnp.float32)
    qt = qt_ref[...].astype(jnp.float32)
    mask = mask_ref[...]

    # logits over query positions (lane reduction over D)
    alpha = jnp.sum(q * pw_ref[...][None, :, :], axis=-1)            # (B, Lq)
    alpha = alpha + (1.0 - mask) * (-1e30)                           # mask_logits
    alpha = alpha - jnp.max(alpha, axis=-1, keepdims=True)
    p = jnp.exp(alpha)                                               # EUP
    denom = jnp.sum(p, axis=-1, keepdims=True)                       # (B, 1)
    r = pl.reciprocal(denom, approx=True)                            # EUP recip
    r = r * (2.0 - denom * r)                                        # + 1 Newton step
    p = p * r                                                        # softmax weights

    # pooled[b, d] = sum_l q[b, l, d] * p[b, l]   (lane reduction over Lq)
    pooled = jnp.sum(qt * p[:, None, :], axis=-1)                    # (B, D)
    # add[b, n] = sum_j pooled[b, j] * Wq[n, j]   (lane reduction over D)
    add = jnp.sum(pooled[:, None, :] * wq_ref[...][None, :, :], axis=-1)
    add_ref[...] = add + bias_ref[...]


# ---------------------------------------------------------------------------
# Kernel 2: main GEMM   out = packed_context_rows @ kron(I_G, Wc^T) + add[b]
# ---------------------------------------------------------------------------
def _cq_main_kernel(ctx_ref, add_ref, w_ref, out_ref):
    # ctx_ref: (1, TILE_L, W)  packed context rows (W = G*D lanes)
    # add_ref: (1, 1, W)       per-batch pooled-query term, lane-packed
    # w_ref:   (W, W)          block-diagonal kron(I_G, Wc^T)
    # out_ref: (1, TILE_L, W)  f32 or reduced-precision output
    acc = jnp.dot(ctx_ref[0], w_ref[...], preferred_element_type=jnp.float32)
    out_ref[0] = (acc + add_ref[0]).astype(out_ref.dtype)


def _lane_packing(D):
    """How the feature dim is presented to the 128 lanes without padding.

    Returns (G, W, pad_d): G consecutive context rows share one W-lane group
    (W = G*D).  pad_d > 0 only in the rare fallback where D has a large odd
    factor and zero-padding the features is the only clean option.
    """
    if D % 128 == 0:
        return 1, D, 0
    lcm = D * 128 // math.gcd(D, 128)
    if lcm <= 512:
        return lcm // D, lcm, 0
    Dp = _round_up(D, 128)
    return 1, Dp, Dp - D


def cq_concatenate(context, query, q_mask, pool_w, conv_w, conv_b,
                   *, tile_l=2048, out_dtype=None):
    """
    context: (B, Lc, D), query: (B, Lq, D), q_mask: (B, Lq) 0/1
    pool_w:  (D, 1)   WeightedPool weight
    conv_w:  (D, 2D)  Conv1d(2*dim, dim, 1) weight with the k=1 dim squeezed
    conv_b:  (D,)
    returns: (B, Lc, D) in out_dtype (default: context.dtype)
    """
    B, Lc, D = context.shape
    _, Lq, _ = query.shape
    f32 = jnp.float32
    out_dtype = context.dtype if out_dtype is None else jnp.dtype(out_dtype)

    wc = conv_w[:, :D]                  # context half  (out x in)
    wq = conv_w[:, D:]                  # pooled half   (out x in)

    # ---- pass 1: pooled-query additive term, one grid step over all B -----
    q_bytes = B * Lq * D * 4
    add = pl.pallas_call(
        _pooled_add_kernel,
        out_shape=jax.ShapeDtypeStruct((B, D), f32),
        grid_spec=pltpu.PrefetchScalarGridSpec(
            num_scalar_prefetch=0,
            grid=(1,),
            in_specs=[
                pl.BlockSpec((B, Lq, D), lambda i: (0, 0, 0)),   # query
                pl.BlockSpec((B, D, Lq), lambda i: (0, 0, 0)),   # query^T
                pl.BlockSpec((B, Lq), lambda i: (0, 0)),         # mask
                pl.BlockSpec((1, D), lambda i: (0, 0)),          # pool weight
                pl.BlockSpec((D, D), lambda i: (0, 0)),          # Wq (out x in)
                pl.BlockSpec((1, D), lambda i: (0, 0)),          # bias
            ],
            out_specs=pl.BlockSpec((B, D), lambda i: (0, 0)),
        ),
        compiler_params=pltpu.CompilerParams(
            dimension_semantics=("arbitrary",),
            vmem_limit_bytes=int(min(100 << 20, max(8 << 20, 8 * q_bytes))),
        ),
    )(query, jnp.swapaxes(query, 1, 2), q_mask.astype(f32),
      jnp.reshape(pool_w, (1, D)).astype(f32), wq.astype(f32),
      jnp.reshape(conv_b, (1, D)).astype(f32))

    # ---- lane packing of the feature dim (no zero padding when 128 % D == 0)
    G, W, pad_d = _lane_packing(D)
    if pad_d:
        # Rare fallback (D with a large odd factor): pad features to a lane
        # multiple.  This is the only path that pays an extra HBM pass.
        ctx_packed = jnp.zeros((B, Lc, W), context.dtype).at[:, :, :D].set(context)
        add_packed = jnp.zeros((B, 1, W), f32).at[:, 0, :D].set(add)
        w_packed = jnp.zeros((W, W), f32).at[:D, :D].set(wc.T.astype(f32))
        Lp, Lc_eff = Lc, Lc
    else:
        Lc_eff = _round_up(Lc, G)
        if Lc_eff != Lc:                # tiny trailing pad only when Lc % G != 0
            context = jnp.pad(context, ((0, 0), (0, Lc_eff - Lc), (0, 0)))
        Lp = Lc_eff // G
        ctx_packed = jnp.reshape(context, (B, Lp, W))          # free, contiguous
        add_packed = jnp.reshape(jnp.tile(add, (1, G)), (B, 1, W))
        w_packed = jnp.kron(jnp.eye(G, dtype=f32), wc.T.astype(f32))   # (W, W)

    # ---- row-tile size + VMEM budget (fits v7x's 64 MiB physical VMEM) ----
    out_bytes = out_dtype.itemsize
    ctx_bytes = ctx_packed.dtype.itemsize

    def _vmem_usage(tl):
        return (2 * tl * W * (ctx_bytes + out_bytes)    # double-buffered ctx/out tiles
                + 2 * W * W * 4 + 2 * W * 4)            # weight (+2nd buf) and add term

    tile_L = min(int(tile_l), Lp)
    if tile_L < Lp:                     # tiled path: must be a multiple of 8
        tile_L = max(8, (tile_L // 8) * 8)
    budget = 40 << 20
    while tile_L > 8 and _vmem_usage(tile_L) > budget:
        tile_L = max(8, ((tile_L // 2) // 8) * 8)
    n_lt = pl.cdiv(Lp, tile_L)          # trailing partial tile: OOB writes dropped
    vmem_limit = int(min(48 << 20, max(16 << 20, _vmem_usage(tile_L) + (4 << 20))))

    # Constant-index weight: a second VMEM buffer is pure waste once it is big.
    if W * W * 4 >= (1 << 20):
        w_spec = pl.BlockSpec((W, W), lambda j, b: (0, 0),
                              pipeline_mode=pl.Buffered(1))
    else:
        w_spec = pl.BlockSpec((W, W), lambda j, b: (0, 0))

    # ---- pass 2: out = packed_context @ kron(I_G, Wc^T) + add[b] ----------
    out_packed = pl.pallas_call(
        _cq_main_kernel,
        out_shape=jax.ShapeDtypeStruct((B, Lp, W), out_dtype),
        grid_spec=pltpu.PrefetchScalarGridSpec(
            num_scalar_prefetch=0,
            grid=(n_lt, B),             # row tiles lead so both v7x TCs get work
            in_specs=[
                pl.BlockSpec((1, tile_L, W), lambda j, b: (b, j, 0)),  # context rows
                pl.BlockSpec((1, 1, W), lambda j, b: (b, 0, 0)),       # per-batch add
                w_spec,                                                # kron(I_G, Wc^T)
            ],
            out_specs=pl.BlockSpec((1, tile_L, W), lambda j, b: (b, j, 0)),
        ),
        compiler_params=pltpu.CompilerParams(
            dimension_semantics=("parallel", "parallel"),
            vmem_limit_bytes=vmem_limit,
        ),
    )(ctx_packed, add_packed, w_packed)

    # ---- unpack (free reshape; slices only fire on the rare padded paths) --
    if pad_d:
        return out_packed[:, :, :D]
    out = jnp.reshape(out_packed, (B, Lc_eff, D))
    return out if Lc_eff == Lc else out[:, :Lc, :]


def reference(context, query, q_mask, pool_w, conv_w, conv_b):
    # pure-JAX reference mirroring the PyTorch module
    alpha = jnp.einsum("bld,do->blo", query, pool_w)                  # (B, Lq, 1)
    alpha = alpha + (1.0 - q_mask[:, :, None].astype(jnp.float32)) * (-1e30)
    alphas = jax.nn.softmax(alpha, axis=1)
    pooled = jnp.einsum("bld,blo->bdo", query, alphas)[..., 0]        # (B, D)
    pooled_rep = jnp.broadcast_to(pooled[:, None, :], context.shape)
    cat = jnp.concatenate([context, pooled_rep], axis=2)              # (B, Lc, 2D)
    return jnp.einsum("blk,dk->bld", cat, conv_w) + conv_b[None, None, :]


if __name__ == "__main__":
    root = jax.random.PRNGKey(0)
    case_keys = jax.random.split(root, 3)
    run = jax.jit(cq_concatenate, static_argnames=("tile_l", "out_dtype"))

    def make_inputs(key, B, Lc, Lq, D):
        k1, k2, k3, k4, k5 = jax.random.split(key, 5)
        context = jax.random.normal(k1, (B, Lc, D), dtype=jnp.float32)
        query = jax.random.normal(k2, (B, Lq, D), dtype=jnp.float32)
        lens = jnp.clip(Lq - (jnp.arange(B) % 4), 1, Lq)       # deterministic lengths
        q_mask = (jnp.arange(Lq)[None, :] < lens[:, None]).astype(jnp.float32)
        bound = math.sqrt(6.0 / (D + 1))                       # xavier_uniform (D, 1)
        pool_w = jax.random.uniform(k3, (D, 1), minval=-bound, maxval=bound,
                                    dtype=jnp.float32)
        wb = math.sqrt(1.0 / (2 * D))                          # Conv1d default init
        conv_w = jax.random.uniform(k4, (D, 2 * D), minval=-wb, maxval=wb,
                                    dtype=jnp.float32)
        conv_b = jax.random.uniform(k5, (D,), minval=-wb, maxval=wb,
                                    dtype=jnp.float32)
        return context, query, q_mask, pool_w, conv_w, conv_b

    def check(key, B, Lc, Lq, D, tile_l, test_bf16_out=False):
        args = make_inputs(key, B, Lc, Lq, D)
        ref = reference(*args)

        out = jax.block_until_ready(run(*args, tile_l=tile_l))
        assert out.shape == (B, Lc, D) and out.dtype == jnp.float32
        # Query/softmax math is exact f32; the tolerance only reflects the MXU's
        # default-precision f32 contraction passes (also present in the reference).
        assert jnp.allclose(out, ref, atol=2e-2, rtol=2e-2), "f32 mismatch vs reference"

        if test_bf16_out:
            out_bf = jax.block_until_ready(
                run(*args, tile_l=tile_l, out_dtype=jnp.bfloat16))
            assert out_bf.shape == (B, Lc, D) and out_bf.dtype == jnp.bfloat16
            # extra slack only for the bf16 quantization of the OUTPUT stream
            assert jnp.allclose(out_bf.astype(jnp.float32), ref,
                                atol=4e-2, rtol=4e-2), "bf16-out mismatch vs reference"

    # module-consistent small shapes: batch=2, c_seq=16, q_seq=8, dim=32
    check(case_keys[0], B=2, Lc=16, Lq=8, D=32, tile_l=2048, test_bf16_out=True)
    # multiple row tiles with a partial trailing tile (Lp = 50 = 3*16 + 2)
    check(case_keys[1], B=2, Lc=200, Lq=8, D=32, tile_l=16)
    # c_seq not a multiple of the 128/D row-packing factor (tiny Lc pad path)
    check(case_keys[2], B=2, Lc=18, Lq=8, D=32, tile_l=2048)

    print("KERNEL_OK")
</pallas_src>

<mosaic_0001>
module attributes {stable_mosaic.version = 11 : i64} {
  func.func @_cq_main_kernel(%arg0: i32, %arg1: i32, %arg2: memref<1x4x128xf32, #tpu.memory_space<vmem>>, %arg3: memref<1x1x128xf32, #tpu.memory_space<vmem>>, %arg4: memref<128x128xf32, #tpu.memory_space<vmem>>, %arg5: memref<1x4x128xf32, #tpu.memory_space<vmem>>) attributes {dimension_semantics = [#tpu.dimension_semantics<parallel>, #tpu.dimension_semantics<parallel>], iteration_bounds = array<i64: 1, 2>, scalar_prefetch = 0 : i64, scratch_operands = 0 : i64, tpu.core_type = #tpu.core_type<tc>, window_params = [{transform_indices = @transform_0, window_bounds = array<i64: 1, 4, 128>}, {transform_indices = @transform_1, window_bounds = array<i64: 1, 1, 128>}, {pipeline_mode = #tpu.pipeline_mode<synchronous>, transform_indices = @transform_2, window_bounds = array<i64: 128, 128>}, {transform_indices = @transform_3, window_bounds = array<i64: 1, 4, 128>}]} {
    %c0 = arith.constant 0 : index
    %c0_0 = arith.constant 0 : index
    %c0_1 = arith.constant 0 : index
    %0 = vector.load %arg2[%c0, %c0_0, %c0_1] : memref<1x4x128xf32, #tpu.memory_space<vmem>>, vector<1x4x128xf32>
    %1 = vector.shape_cast %0 : vector<1x4x128xf32> to vector<4x128xf32>
    %c0_2 = arith.constant 0 : index
    %c0_3 = arith.constant 0 : index
    %2 = vector.load %arg4[%c0_2, %c0_3] : memref<128x128xf32, #tpu.memory_space<vmem>>, vector<128x128xf32>
    %cst = arith.constant dense<0.000000e+00> : vector<4x128xf32>
    %3 = tpu.matmul %1, %2, %cst {dimension_numbers = #tpu.dot_dimension_numbers<[1], [0], [0], [1], [0, 0, 1, 1], [], []>} : vector<4x128xf32>, vector<128x128xf32>, vector<4x128xf32> -> vector<4x128xf32>
    %c0_4 = arith.constant 0 : index
    %c0_5 = arith.constant 0 : index
    %c0_6 = arith.constant 0 : index
    %4 = vector.load %arg3[%c0_4, %c0_5, %c0_6] : memref<1x1x128xf32, #tpu.memory_space<vmem>>, vector<1x1x128xf32>
    %5 = vector.shape_cast %4 : vector<1x1x128xf32> to vector<1x128xf32>
    %6 = vector.broadcast %5 : vector<1x128xf32> to vector<4x128xf32>
    %7 = arith.addf %3, %6 : vector<4x128xf32>
    %c0_7 = arith.constant 0 : index
    %c0_8 = arith.constant 0 : index
    %c0_9 = arith.constant 0 : index
    %8 = vector.load %arg5[%c0_7, %c0_8, %c0_9] : memref<1x4x128xf32, #tpu.memory_space<vmem>>, vector<1x4x128xf32>
    %9 = vector.shape_cast %8 : vector<1x4x128xf32> to vector<4x128xf32>
    %10 = vector.shape_cast %7 : vector<4x128xf32> to vector<1x4x128xf32>
    tpu.vector_store %arg5[%c0_7, %c0_8, %c0_9], %10 {strides = array<i32>} : memref<1x4x128xf32, #tpu.memory_space<vmem>>, vector<1x4x128xf32>,
    return
  }
  func.func @transform_0(%arg0: i32, %arg1: i32) -> (i32, i32, i32) {
    %c0_i32 = arith.constant 0 : i32
    %c0_i32_0 = arith.constant 0 : i32
    return %arg1, %arg0, %c0_i32 : i32, i32, i32
  }
  func.func @transform_1(%arg0: i32, %arg1: i32) -> (i32, i32, i32) {
    %c0_i32 = arith.constant 0 : i32
    %c0_i32_0 = arith.constant 0 : i32
    %c0_i32_1 = arith.constant 0 : i32
    return %arg1, %c0_i32, %c0_i32_0 : i32, i32, i32
  }
  func.func @transform_2(%arg0: i32, %arg1: i32) -> (i32, i32) {
    %c0_i32 = arith.constant 0 : i32
    %c0_i32_0 = arith.constant 0 : i32
    %c0_i32_1 = arith.constant 0 : i32
    return %c0_i32, %c0_i32_0 : i32, i32
  }
  func.func @transform_3(%arg0: i32, %arg1: i32) -> (i32, i32, i32) {
    %c0_i32 = arith.constant 0 : i32
    %c0_i32_0 = arith.constant 0 : i32
    return %arg1, %arg0, %c0_i32 : i32, i32, i32
  }
}

module attributes {stable_mosaic.version = 11 : i64} {
  func.func @_pooled_add_kernel(%arg0: i32, %arg1: memref<2x8x32xf32, #tpu.memory_space<vmem>>, %arg2: memref<2x32x8xf32, #tpu.memory_space<vmem>>, %arg3: memref<2x8xf32, #tpu.memory_space<vmem>>, %arg4: memref<1x32xf32, #tpu.memory_space<vmem>>, %arg5: memref<32x32xf32, #tpu.memory_space<vmem>>, %arg6: memref<1x32xf32, #tpu.memory_space<vmem>>, %arg7: memref<2x32xf32, #tpu.memory_space<vmem>>) attributes {dimension_semantics = [#tpu.dimension_semantics<arbitrary>], iteration_bounds = array<i64: 1>, scalar_prefetch = 0 : i64, scratch_operands = 0 : i64, tpu.core_type = #tpu.core_type<tc>, window_params = [{pipeline_mode = #tpu.pipeline_mode<synchronous>, transform_indices = @transform_0, window_bounds = array<i64: 2, 8, 32>}, {pipeline_mode = #tpu.pipeline_mode<synchronous>, transform_indices = @transform_1, window_bounds = array<i64: 2, 32, 8>}, {pipeline_mode = #tpu.pipeline_mode<synchronous>, transform_indices = @transform_2, window_bounds = array<i64: 2, 8>}, {pipeline_mode = #tpu.pipeline_mode<synchronous>, transform_indices = @transform_3, window_bounds = array<i64: 1, 32>}, {pipeline_mode = #tpu.pipeline_mode<synchronous>, transform_indices = @transform_4, window_bounds = array<i64: 32, 32>}, {pipeline_mode = #tpu.pipeline_mode<synchronous>, transform_indices = @transform_5, window_bounds = array<i64: 1, 32>}, {pipeline_mode = #tpu.pipeline_mode<synchronous>, transform_indices = @transform_6, window_bounds = array<i64: 2, 32>}]} {
    %c0 = arith.constant 0 : index
    %c0_0 = arith.constant 0 : index
    %c0_1 = arith.constant 0 : index
    %0 = vector.load %arg1[%c0, %c0_0, %c0_1] : memref<2x8x32xf32, #tpu.memory_space<vmem>>, vector<2x8x32xf32>
    %c0_2 = arith.constant 0 : index
    %c0_3 = arith.constant 0 : index
    %c0_4 = arith.constant 0 : index
    %1 = vector.load %arg2[%c0_2, %c0_3, %c0_4] : memref<2x32x8xf32, #tpu.memory_space<vmem>>, vector<2x32x8xf32>
    %c0_5 = arith.constant 0 : index
    %c0_6 = arith.constant 0 : index
    %2 = vector.load %arg3[%c0_5, %c0_6] : memref<2x8xf32, #tpu.memory_space<vmem>>, vector<2x8xf32>
    %c0_7 = arith.constant 0 : index
    %c0_8 = arith.constant 0 : index
    %3 = vector.load %arg4[%c0_7, %c0_8] : memref<1x32xf32, #tpu.memory_space<vmem>>, vector<1x32xf32>
    %4 = vector.shape_cast %3 : vector<1x32xf32> to vector<1x1x32xf32>
    %5 = vector.broadcast %4 : vector<1x1x32xf32> to vector<2x8x32xf32>
    %6 = arith.mulf %0, %5 : vector<2x8x32xf32>
    %cst = arith.constant dense<0.000000e+00> : vector<2x8xf32>
    %7 = vector.multi_reduction <add>, %6, %cst [2] : vector<2x8x32xf32> to vector<2x8xf32>
    %cst_9 = arith.constant 1.000000e+00 : f32
    %8 = vector.broadcast %cst_9 : f32 to vector<2x8xf32>
    %9 = arith.subf %8, %2 : vector<2x8xf32>
    %cst_10 = arith.constant -1.000000e+30 : f32
    %10 = vector.broadcast %cst_10 : f32 to vector<2x8xf32>
    %11 = arith.mulf %9, %10 : vector<2x8xf32>
    %12 = arith.addf %7, %11 : vector<2x8xf32>
    %cst_11 = arith.constant dense<0xFF800000> : vector<2xf32>
    %13 = vector.multi_reduction <maximumf>, %12, %cst_11 [1] : vector<2x8xf32> to vector<2xf32>
    %14 = vector.shape_cast %13 : vector<2xf32> to vector<2x1xf32>
    %15 = vector.broadcast %14 : vector<2x1xf32> to vector<2x8xf32>
    %16 = arith.subf %12, %15 : vector<2x8xf32>
    %17 = math.exp %16 : vector<2x8xf32>
    %cst_12 = arith.constant dense<0.000000e+00> : vector<2xf32>
    %18 = vector.multi_reduction <add>, %17, %cst_12 [1] : vector<2x8xf32> to vector<2xf32>
    %19 = vector.shape_cast %18 : vector<2xf32> to vector<2x1xf32>
    %20 = tpu.reciprocal %19 {approx = true} : vector<2x1xf32> -> vector<2x1xf32>
    %21 = arith.mulf %19, %20 : vector<2x1xf32>
    %cst_13 = arith.constant 2.000000e+00 : f32
    %22 = vector.broadcast %cst_13 : f32 to vector<2x1xf32>
    %23 = arith.subf %22, %21 : vector<2x1xf32>
    %24 = arith.mulf %20, %23 : vector<2x1xf32>
    %25 = vector.broadcast %24 : vector<2x1xf32> to vector<2x8xf32>
    %26 = arith.mulf %17, %25 : vector<2x8xf32>
    %27 = vector.shape_cast %26 : vector<2x8xf32> to vector<2x1x8xf32>
    %28 = vector.broadcast %27 : vector<2x1x8xf32> to vector<2x32x8xf32>
    %29 = arith.mulf %1, %28 : vector<2x32x8xf32>
    %cst_14 = arith.constant dense<0.000000e+00> : vector<2x32xf32>
    %30 = vector.multi_reduction <add>, %29, %cst_14 [2] : vector<2x32x8xf32> to vector<2x32xf32>
    %31 = vector.shape_cast %30 : vector<2x32xf32> to vector<2x1x32xf32>
    %c0_15 = arith.constant 0 : index
    %c0_16 = arith.constant 0 : index
    %32 = vector.load %arg5[%c0_15, %c0_16] : memref<32x32xf32, #tpu.memory_space<vmem>>, vector<32x32xf32>
    %33 = vector.shape_cast %32 : vector<32x32xf32> to vector<1x32x32xf32>
    %34 = vector.broadcast %31 : vector<2x1x32xf32> to vector<2x32x32xf32>
    %35 = vector.broadcast %33 : vector<1x32x32xf32> to vector<2x32x32xf32>
    %36 = arith.mulf %34, %35 : vector<2x32x32xf32>
    %cst_17 = arith.constant dense<0.000000e+00> : vector<2x32xf32>
    %37 = vector.multi_reduction <add>, %36, %cst_17 [2] : vector<2x32x32xf32> to vector<2x32xf32>
    %c0_18 = arith.constant 0 : index
    %c0_19 = arith.constant 0 : index
    %38 = vector.load %arg6[%c0_18, %c0_19] : memref<1x32xf32, #tpu.memory_space<vmem>>, vector<1x32xf32>
    %39 = vector.broadcast %38 : vector<1x32xf32> to vector<2x32xf32>
    %40 = arith.addf %37, %39 : vector<2x32xf32>
    %c0_20 = arith.constant 0 : index
    %c0_21 = arith.constant 0 : index
    %41 = vector.load %arg7[%c0_20, %c0_21] : memref<2x32xf32, #tpu.memory_space<vmem>>, vector<2x32xf32>
    tpu.vector_store %arg7[%c0_20, %c0_21], %40 {strides = array<i32>} : memref<2x32xf32, #tpu.memory_space<vmem>>, vector<2x32xf32>,
    return
  }
  func.func @transform_0(%arg0: i32) -> (i32, i32, i32) {
    %c0_i32 = arith.constant 0 : i32
    %c0_i32_0 = arith.constant 0 : i32
    %c0_i32_1 = arith.constant 0 : i32
    %c0_i32_2 = arith.constant 0 : i32
    return %c0_i32, %c0_i32_0, %c0_i32_1 : i32, i32, i32
  }
  func.func @transform_1(%arg0: i32) -> (i32, i32, i32) {
    %c0_i32 = arith.constant 0 : i32
    %c0_i32_0 = arith.constant 0 : i32
    %c0_i32_1 = arith.constant 0 : i32
    %c0_i32_2 = arith.constant 0 : i32
    return %c0_i32, %c0_i32_0, %c0_i32_1 : i32, i32, i32
  }
  func.func @transform_2(%arg0: i32) -> (i32, i32) {
    %c0_i32 = arith.constant 0 : i32
    %c0_i32_0 = arith.constant 0 : i32
    %c0_i32_1 = arith.constant 0 : i32
    return %c0_i32, %c0_i32_0 : i32, i32
  }
  func.func @transform_3(%arg0: i32) -> (i32, i32) {
    %c0_i32 = arith.constant 0 : i32
    %c0_i32_0 = arith.constant 0 : i32
    %c0_i32_1 = arith.constant 0 : i32
    return %c0_i32, %c0_i32_0 : i32, i32
  }
  func.func @transform_4(%arg0: i32) -> (i32, i32) {
    %c0_i32 = arith.constant 0 : i32
    %c0_i32_0 = arith.constant 0 : i32
    %c0_i32_1 = arith.constant 0 : i32
    return %c0_i32, %c0_i32_0 : i32, i32
  }
  func.func @transform_5(%arg0: i32) -> (i32, i32) {
    %c0_i32 = arith.constant 0 : i32
    %c0_i32_0 = arith.constant 0 : i32
    %c0_i32_1 = arith.constant 0 : i32
    return %c0_i32, %c0_i32_0 : i32, i32
  }
  func.func @transform_6(%arg0: i32) -> (i32, i32) {
    %c0_i32 = arith.constant 0 : i32
    %c0_i32_0 = arith.constant 0 : i32
    %c0_i32_1 = arith.constant 0 : i32
    return %c0_i32, %c0_i32_0 : i32, i32
  }
}

</mosaic_0001>

<bundles_post_ra>
// kernel: cq_concatenate.3
= control target key start
LH: loop header
LB: loop body
LE: loop exit
PB: predicated region body
PF: predicated region fallthrough
CT: control target
= control target key end

     0   :  { %s523_s12 = smov 0   ;;  %s525_s13 = smov 0   ;;  %s611_s0 = inlined_call_operand.vmem [shape: f32[2,4,128], index: 0, kind: input, shape index: {}]   ;;  %s612_s1 = inlined_call_operand.vmem [shape: f32[2,1,128], index: 1, kind: input, shape index: {}]   ;;  %s613_s2 = inlined_call_operand.vmem [shape: f32[128,128], index: 2, kind: input, shape index: {}]   ;;  %s614_s3 = inlined_call_operand.vmem [shape: f32[2,4,128], index: 3, kind: output, shape index: {}]  }
   0x1   :  { %s527_s14 = smov 0  }
   0x2 LB: > { %s22_s15 = sadd.s32 1, %s495_s13  ;;  %p393_p0 = scmp.ge.s32.totalorder %s499_s14, 1  ;;  %s499_s14 = sphi %s527_s14, %s13_s14   ;;  %s495_s13 = sphi %s525_s13, %s616_s13   ;;  %s491_s12 = sphi %s523_s12, %s615_s12  }
   0x3   : > { %p23_p1 = scmp.ge.s32.totalorder %s22_s15, 2  ;;  %p163_p2 = scmp.lt.s32.totalorder %s499_s14, 3 }
   0x5   : > { %s618_s15 = smov (%p23_p1, %s22_s15), 0  ;;  %p164_p3 = pnand %p393_p0, %p163_p2 }
   0x6   : > { %p194_p4 = scmp.lt.s32.totalorder (!%p164_p3), %s491_s12, 1 }
   0x7   : > { %167 = sbr.rel (%p164_p3) target bundleno = 241 (0xf1), region = 32 }
   0xc   : > { %v227_v0 = vld [vmem:[%s613_s2 + $0x78] sm:$0xff]  ;;  %v501_v1 = vmov 0.0   ;;  %v226_v2 = vld [vmem:[%s613_s2 + $0x70] sm:$0xff]  ;;  %vm502_vm0 = vmmov 0   ;;  %v225_v3 = vld [vmem:[%s613_s2 + $0x68] sm:$0xff]  ;;  %s620_s12 = smov (!%p194_p4, %s491_s12), 1 }
   0xd   : > { %416 = vmatprep.subr.mxu0 %v501_v1  ;;  %448 = vmatprep.mubr.msk.f32.mxu0 %vm502_vm0, %v501_v1  ;;  %v224_v4 = vld [vmem:[%s613_s2 + $0x60] sm:$0xff]  ;;  %v223_v5 = vld [vmem:[%s613_s2 + $0x58] sm:$0xff]  ;;  %v222_v6 = vld [vmem:[%s613_s2 + $0x50] sm:$0xff]  ;;  %s394_s19 = sshll.u32 %s620_s12, 2  ;;  %s203_s4 = scalar_lea.vmem %s612_s1, %s620_s12 }
   0xe   : > { %417 = vmatpush3.msra.mxu0 %v227_v0  ;;  %v221_v7 = vld [vmem:[%s613_s2 + $0x48] sm:$0xff]  ;;  %v220_v8 = vld [vmem:[%s613_s2 + $0x40] sm:$0xff]  ;;  %v219_v9 = vld [vmem:[%s613_s2 + $0x38] sm:$0xff]  ;;  %s200_s26 = scalar_lea.vmem %s611_s0, %s394_s19  ;;  %s210_s7 = scalar_lea.vmem %s614_s3, %s394_s19 }
   0xf   : > { %418 = vmatprep.subr.mxu0 %v501_v1  ;;  %v218_v10 = vld [vmem:[%s613_s2 + $0x30] sm:$0xff]  ;;  %v217_v11 = vld [vmem:[%s613_s2 + $0x28] sm:$0xff]  ;;  %v216_v12 = vld [vmem:[%s613_s2 + $0x20] sm:$0xff] }
  0x10   : > { %419 = vmatpush3.msra.mxu0 %v226_v2  ;;  %v215_v13 = vld [vmem:[%s613_s2 + $0x18] sm:$0xff]  ;;  %v214_v14 = vld [vmem:[%s613_s2 + $0x10] sm:$0xff]  ;;  %v213_v15 = vld [vmem:[%s613_s2 + $0x8] sm:$0xff] }
  0x11   : > { %420 = vmatprep.subr.mxu0 %v501_v1  ;;  %v212_v16 = vld [vmem:[%s613_s2] sm:$0xff] }
  0x12   : > { %421 = vmatpush3.msra.mxu0 %v225_v3  ;;  %v211_v17 = vld [vmem:[%s200_s26] sm:$0xf] }
  0x13   : > { %422 = vmatprep.subr.mxu0 %v501_v1  ;;  %v396_v18 = vld [vmem:[%s203_s4] ss:$0 sm:$0xff] }
  0x14   : > { %423 = vmatpush3.msra.mxu0 %v224_v4 }
  0x15   : > { %424 = vmatprep.subr.mxu0 %v501_v1 }
  0x16   : > { %425 = vmatpush3.msra.mxu0 %v223_v5 }
  0x17   : > { %426 = vmatprep.subr.mxu0 %v501_v1 }
  0x18   : > { %427 = vmatpush3.msra.mxu0 %v222_v6 }
  0x19   : > { %428 = vmatprep.subr.mxu0 %v501_v1 }
  0x1a   : > { %429 = vmatpush3.msra.mxu0 %v221_v7 }
  0x1b   : > { %430 = vmatprep.subr.mxu0 %v501_v1 }
  0x1c   : > { %431 = vmatpush3.msra.mxu0 %v220_v8 }
  0x1d   : > { %432 = vmatprep.subr.mxu0 %v501_v1 }
  0x1e   : > { %433 = vmatpush3.msra.mxu0 %v219_v9 }
  0x1f   : > { %434 = vmatprep.subr.mxu0 %v501_v1 }
  0x20   : > { %435 = vmatpush3.msra.mxu0 %v218_v10 }
  0x21   : > { %436 = vmatprep.subr.mxu0 %v501_v1 }
  0x22   : > { %437 = vmatpush3.msra.mxu0 %v217_v11 }
  0x23   : > { %438 = vmatprep.subr.mxu0 %v501_v1 }
  0x24   : > { %439 = vmatpush3.msra.mxu0 %v216_v12 }
  0x25   : > { %440 = vmatprep.subr.mxu0 %v501_v1 }
  0x26   : > { %441 = vmatpush3.msra.mxu0 %v215_v13 }
  0x27   : > { %442 = vmatprep.subr.mxu0 %v501_v1 }
  0x28   : > { %443 = vmatpush3.msra.mxu0 %v214_v14 }
  0x29   : > { %444 = vmatprep.subr.mxu0 %v501_v1 }
  0x2a   : > { %445 = vmatpush3.msra.mxu0 %v213_v15 }
  0x2b   : > { %446 = vmatprep.subr.mxu0 %v501_v1 }
  0x2c   : > { %447 = vmatpush3.msra.mxu0 %v212_v16 }
  0x2d   : > { %449 = vmatmul.mubr.f32.vlgmr.msra.gmra.mxu0 %v211_v17 }
  0xed   : > { %v301_v19 = vpop.f32.mrf.mxu0 }
  0xee   : > { %v302_v20 = vadd.f32 %v396_v18, %v301_v19 }
  0xef   : > { %v450_v21 = vpop.f32.mrf.mxu0 }
  0xf0   : > { %305 = vst [vmem:[%s210_s7] sm:$0xf] %v302_v20 }
  0xf1 PF: > { %s13_s14 = sadd.s32 1, %s499_s14   ;;  %s615_s12 = smov %s495_s13 }
  0xf2   : > { %p10_p5 = scmp.ge.s32.totalorder %s13_s14, 4   ;;  %s616_s13 = smov %s618_s15 }
  0xf4   :  { %12 = sbr.rel (!%p10_p5) target bundleno = 2 (0x2), region = 65 }

// kernel: cq_concatenate.2
= control target key start
LH: loop header
LB: loop body
LE: loop exit
PB: predicated region body
PF: predicated region fallthrough
CT: control target
= control target key end

     0   :  { %v53_v0 = vlaneseq  ;;  %vm43_vm0 = vcmask 261120   ;;  %v3676_v26 = vmov 0   ;;  %vm89_vm1 = vcmask 1041409   ;;  %s5966_s0 = inlined_call_operand.vmem [shape: f32[2,8,32], index: 0, kind: input, shape index: {}]   ;;  %s5967_s3 = inlined_call_operand.vmem [shape: f32[1,32], index: 3, kind: input, shape index: {}]   ;;  %s5968_s2 = inlined_call_operand.vmem [shape: f32[2,8], index: 2, kind: input, shape index: {}]   ;;  %s5969_s4 = inlined_call_operand.vmem [shape: f32[32,32], index: 4, kind: input, shape index: {}]   ;;  %s5970_s1 = inlined_call_operand.vmem [shape: f32[2,32,8], index: 1, kind: input, shape index: {}]   ;;  %s5971_s5 = inlined_call_operand.vmem [shape: f32[1,32], index: 5, kind: input, shape index: {}]   ;;  %s5972_s6 = inlined_call_operand.vmem [shape: f32[2,32], index: 6, kind: output, shape index: {}]  }
   0x1   :  { %v23_v1 = vld [vmem:[%s5966_s0] sm:$0xff]  ;;  %v24_v3 = vld [vmem:[%s5966_s0 + $0x8] sm:$0xff]  ;;  %3668 = vset.pattern.permute.xlu0 %v3676_v26  ;;  %3669 = vset.pattern.permute.xlu1 %v3676_v26  ;;  %v222_v60 = vld [vmem:[%s5969_s4 + $0x10] sm:$0xff]  ;;  %vm92_vm2 = vcmask 58368   ;;  %vm195_vm3 = vcmask 64512   ;;  %vm2253_vm4 = vcmask 130112  }
   0x2   :  { %v3665_v2 = vld [vmem:[%s5967_s3] ss:$0 sm:$0xff]  ;;  %v54_v7 = vshrl.u32 %v53_v0, 7  ;;  %v80_v8 = vand.u32 127, %v53_v0  ;;  %v221_v40 = vld [vmem:[%s5969_s4 + $0x8] sm:$0xff]  ;;  %vm2260_vm5 = vcmask 195712  }
   0x3   :  { %v41_v4 = vmul.f32 %v3665_v2, %v23_v1  ;;  %v42_v5 = vmul.f32 %v3665_v2, %v24_v3  ;;  %v33_v6 = vld [vmem:[%s5968_s2] sm:$0x3]  ;;  %vm2267_vm6 = vcmask 261312   ;;  %vm167_vm7 = vcmask 1042434  }
   0x4   :  { %v50_v9 = vsub.f32 1.0, %v33_v6  ;;  %v3725_v11 = vsub.s32 0, %v54_v7  ;;  %v3727_v12 = vsub.s32 %v80_v8, %v54_v7  ;;  %v2248_v14 = vadd.s32 4294967288, %v80_v8  ;;  %v220_v24 = vld [vmem:[%s5969_s4] sm:$0xff] }
   0x5   :  { %v44_v10 = vsel %vm43_vm0, %v41_v4, 0.0  ;;  %v2255_v15 = vadd.s32 4294967280, %v80_v8  ;;  %v2262_v16 = vadd.s32 4294967272, %v80_v8  ;;  %v47_v17 = vsel %vm43_vm0, %v42_v5, 0.0 }
   0x6   :  { %6068 = vst [vmem:[#allocation2_spill] sm:$0xff] %v3727_v12  ;;  %45 = vadd.xlane.f32.xlu0 %v44_v10  ;;  %v51_v13 = vmul.f32 -1e+30, %v50_v9  ;;  %v3730_v18 = vsub.s32 1, %v54_v7  ;;  %v3733_v20 = vsub.s32 %v2248_v14, %v54_v7  ;;  %v231_v25 = vrot.slane %v220_v24, %v3725_v11 }
   0x7   :  { %v3735_v21 = vsub.s32 %v2255_v15, %v54_v7  ;;  %v3737_v22 = vsub.s32 %v2262_v16, %v54_v7  ;;  %v3745_v28 = vsub.s32 2, %v54_v7  ;;  %v3748_v30 = vsub.s32 3, %v54_v7 }
   0x8   :  { %v56_v19 = vrot.slane %v51_v13, %v3725_v11  ;;  %6069 = vst [vmem:[#allocation3_spill] sm:$0xff] %v3733_v20  ;;  %v63_v23 = vrot.slane %v51_v13, %v3730_v18  ;;  %v250_v27 = vrot.slane %v220_v24, %v3730_v18  ;;  %v3751_v32 = vsub.s32 4, %v54_v7 }
   0x9   :  { %6070 = vst [vmem:[#allocation4_spill] sm:$0xff] %v3735_v21  ;;  %6071 = vst [vmem:[#allocation5_spill] sm:$0xff] %v3737_v22  ;;  %v269_v29 = vrot.slane %v220_v24, %v3745_v28  ;;  %v288_v31 = vrot.slane %v220_v24, %v3748_v30  ;;  %v3754_v34 = vsub.s32 5, %v54_v7  ;;  %v3757_v36 = vsub.s32 6, %v54_v7 }
   0xa   :  { %48 = vadd.xlane.f32.xlu0 %v47_v17  ;;  %58 = vbcast.lane.b32.xlu1 %v56_v19, 256  ;;  %v307_v33 = vrot.slane %v220_v24, %v3751_v32  ;;  %v3760_v38 = vsub.s32 7, %v54_v7  ;;  %v383_v41 = vrot.slane %v221_v40, %v3725_v11  ;;  %v402_v42 = vrot.slane %v221_v40, %v3730_v18 }
   0xb   :  { %v326_v35 = vrot.slane %v220_v24, %v3754_v34  ;;  %v345_v37 = vrot.slane %v220_v24, %v3757_v36  ;;  %v421_v43 = vrot.slane %v221_v40, %v3745_v28  ;;  %v440_v44 = vrot.slane %v221_v40, %v3748_v30 }
   0xc   :  { %v364_v39 = vrot.slane %v220_v24, %v3760_v38  ;;  %v459_v45 = vrot.slane %v221_v40, %v3751_v32  ;;  %v478_v46 = vrot.slane %v221_v40, %v3754_v34  ;;  %v497_v48 = vrot.slane %v221_v40, %v3757_v36 }
   0xd   :  { %v516_v51 = vrot.slane %v221_v40, %v3760_v38  ;;  %v535_v62 = vrot.slane %v222_v60, %v3725_v11  ;;  %v554_v2 = vrot.slane %v222_v60, %v3730_v18  ;;  %v573_v6 = vrot.slane %v222_v60, %v3745_v28 }
   0xe   :  { %65 = vbcast.lane.b32.xlu1 %v63_v23, 256  ;;  %v592_v13 = vrot.slane %v222_v60, %v3748_v30  ;;  %v611_v17 = vrot.slane %v222_v60, %v3751_v32  ;;  %v668_v40 = vrot.slane %v222_v60, %v3760_v38  ;;  %vm169_vm8 = vcmask 1043459  }
   0xf   :  { %vm171_vm9 = vcmask 1044484   ;;  %vm173_vm10 = vcmask 1045509   ;;  %vm175_vm11 = vcmask 1046534   ;;  %vm177_vm12 = vcmask 1047559  }
  0x10   :  { %vm3659_vm13 = vcmask 254976  }
  0x12   :  { %237 = vbcast.lane.b32.xlu1 %v231_v25, 264 }
  0x16   :  { %241 = vbcast.lane.b32.xlu1 %v231_v25, 272 }
  0x1a   :  { %252 = vbcast.lane.b32.xlu1 %v250_v27, 256 }
  0x1e   :  { %260 = vbcast.lane.b32.xlu1 %v250_v27, 272 }
  0x20   :  { %233 = vbcast.lane.b32.xlu0 %v231_v25, 256 }
  0x22   :  { %271 = vbcast.lane.b32.xlu1 %v269_v29, 256 }
  0x24   :  { %245 = vbcast.lane.b32.xlu0 %v231_v25, 280  ;;  %v630_v25 = vrot.slane %v222_v60, %v3754_v34 }
  0x26   :  { %279 = vbcast.lane.b32.xlu1 %v269_v29, 272 }
  0x28   :  { %256 = vbcast.lane.b32.xlu0 %v250_v27, 264 }
  0x2a   :  { %290 = vbcast.lane.b32.xlu1 %v288_v31, 256 }
  0x2c   :  { %264 = vbcast.lane.b32.xlu0 %v250_v27, 280 }
  0x2e   :  { %298 = vbcast.lane.b32.xlu1 %v288_v31, 272 }
  0x30   :  { %275 = vbcast.lane.b32.xlu0 %v269_v29, 264 }
  0x32   :  { %309 = vbcast.lane.b32.xlu1 %v307_v33, 256 }
  0x34   :  { %283 = vbcast.lane.b32.xlu0 %v269_v29, 280 }
  0x36   :  { %317 = vbcast.lane.b32.xlu1 %v307_v33, 272 }
  0x38   :  { %294 = vbcast.lane.b32.xlu0 %v288_v31, 264 }
  0x3a   :  { %328 = vbcast.lane.b32.xlu1 %v326_v35, 256 }
  0x3c   :  { %302 = vbcast.lane.b32.xlu0 %v288_v31, 280 }
  0x3e   :  { %336 = vbcast.lane.b32.xlu1 %v326_v35, 272 }
  0x40   :  { %313 = vbcast.lane.b32.xlu0 %v307_v33, 264 }
  0x42   :  { %347 = vbcast.lane.b32.xlu1 %v345_v37, 256 }
  0x44   :  { %321 = vbcast.lane.b32.xlu0 %v307_v33, 280  ;;  %v649_v33 = vrot.slane %v222_v60, %v3757_v36 }
  0x46   :  { %355 = vbcast.lane.b32.xlu1 %v345_v37, 272 }
  0x48   :  { %332 = vbcast.lane.b32.xlu0 %v326_v35, 264 }
  0x4a   :  { %366 = vbcast.lane.b32.xlu1 %v364_v39, 256 }
  0x4c   :  { %340 = vbcast.lane.b32.xlu0 %v326_v35, 280 }
  0x4e   :  { %374 = vbcast.lane.b32.xlu1 %v364_v39, 272 }
  0x50   :  { %351 = vbcast.lane.b32.xlu0 %v345_v37, 264 }
  0x52   :  { %385 = vbcast.lane.b32.xlu1 %v383_v41, 256 }
  0x54   :  { %359 = vbcast.lane.b32.xlu0 %v345_v37, 280 }
  0x56   :  { %393 = vbcast.lane.b32.xlu1 %v383_v41, 272 }
  0x58   :  { %370 = vbcast.lane.b32.xlu0 %v364_v39, 264 }
  0x5a   :  { %404 = vbcast.lane.b32.xlu1 %v402_v42, 256 }
  0x5c   :  { %378 = vbcast.lane.b32.xlu0 %v364_v39, 280 }
  0x5e   :  { %412 = vbcast.lane.b32.xlu1 %v402_v42, 272 }
  0x60   :  { %389 = vbcast.lane.b32.xlu0 %v383_v41, 264 }
  0x62   :  { %423 = vbcast.lane.b32.xlu1 %v421_v43, 256 }
  0x64   :  { %397 = vbcast.lane.b32.xlu0 %v383_v41, 280 }
  0x66   :  { %431 = vbcast.lane.b32.xlu1 %v421_v43, 272 }
  0x68   :  { %408 = vbcast.lane.b32.xlu0 %v402_v42, 264 }
  0x6a   :  { %442 = vbcast.lane.b32.xlu1 %v440_v44, 256 }
  0x6e   :  { %450 = vbcast.lane.b32.xlu1 %v440_v44, 272 }
  0x72   :  { %461 = vbcast.lane.b32.xlu1 %v459_v45, 256 }
  0x76   :  { %469 = vbcast.lane.b32.xlu1 %v459_v45, 272 }
  0x7a   :  { %480 = vbcast.lane.b32.xlu1 %v478_v46, 256 }
  0x7c   :  { %v59_v47 = vpop.permute.xlu1 %58 }
  0x7e   :  { %488 = vbcast.lane.b32.xlu1 %v478_v46, 272 }
  0x80   :  { %v66_v49 = vpop.permute.xlu1 %65 }
  0x82   :  { %499 = vbcast.lane.b32.xlu1 %v497_v48, 256 }
  0x84   :  { %v3773_v50 = vpop.permute.xlu1 %237 }
  0x86   :  { %507 = vbcast.lane.b32.xlu1 %v497_v48, 272 }
  0x88   :  { %v3776_v52 = vpop.permute.xlu1 %241 }
  0x8a   :  { %518 = vbcast.lane.b32.xlu1 %v516_v51, 256 }
  0x8c   :  { %v3778_v53 = vpop.permute.xlu1 %252 }
  0x8f   :  { %v46_v54 = vpop.xlane.xlu0 %45 }
  0x90   :  { %v3780_v55 = vadd.f32 %v59_v47, %v46_v54  ;;  %v3782_v56 = vpop.permute.xlu1 %260 }
  0x92   :  { %74 = vperm.xlu0 %3668, %v3780_v55  }
  0x93   :  { %v49_v57 = vpop.xlane.xlu0 %48 }
  0x94   :  { %v3785_v58 = vadd.f32 %v66_v49, %v49_v57  ;;  %v3787_v59 = vpop.permute.xlu1 %271 }
  0x96   :  { %77 = vperm.xlu1 %3669, %v3785_v58   ;;  %416 = vbcast.lane.b32.xlu0 %v402_v42, 280 }
  0x97   :  { %v3798_v0 = vpop.permute.xlu0 %233 }
  0x98   :  { %v3793_v61 = vpop.permute.xlu1 %279 }
  0x9a   :  { %526 = vbcast.lane.b32.xlu1 %v516_v51, 272  ;;  %427 = vbcast.lane.b32.xlu0 %v421_v43, 264 }
  0x9b   :  { %v3805_v4 = vpop.permute.xlu0 %245 }
  0x9c   :  { %v3796_v63 = vpop.permute.xlu1 %290 }
  0x9e   :  { %537 = vbcast.lane.b32.xlu1 %v535_v62, 256  ;;  %435 = vbcast.lane.b32.xlu0 %v421_v43, 280  ;;  %v3856_v43 = vld [vmem:[%s5969_s4 + $0x18] sm:$0xff] }
  0x9f   :  { %v3810_v7 = vpop.permute.xlu0 %256  ;;  %v706_v49 = vrot.slane %v3856_v43, %v3730_v18  ;;  %v725_v60 = vrot.slane %v3856_v43, %v3745_v28 }
  0xa0   :  { %v3800_v1 = vpop.permute.xlu1 %298 }
  0xa2   :  { %545 = vbcast.lane.b32.xlu1 %v535_v62, 272  ;;  %446 = vbcast.lane.b32.xlu0 %v440_v44, 264 }
  0xa3   :  { %v3816_v10 = vpop.permute.xlu0 %264 }
  0xa4   :  { %v3803_v3 = vpop.permute.xlu1 %309 }
  0xa6   :  { %556 = vbcast.lane.b32.xlu1 %v554_v2, 256  ;;  %454 = vbcast.lane.b32.xlu0 %v440_v44, 280 }
  0xa7   :  { %v3821_v15 = vpop.permute.xlu0 %275 }
  0xa8   :  { %v3807_v5 = vpop.permute.xlu1 %317 }
  0xaa   :  { %564 = vbcast.lane.b32.xlu1 %v554_v2, 272  ;;  %465 = vbcast.lane.b32.xlu0 %v459_v45, 264 }
  0xab   :  { %v3828_v23 = vpop.permute.xlu0 %283 }
  0xac   :  { %v3812_v8 = vpop.permute.xlu1 %328 }
  0xae   :  { %575 = vbcast.lane.b32.xlu1 %v573_v6, 256  ;;  %473 = vbcast.lane.b32.xlu0 %v459_v45, 280  ;;  %v687_v45 = vrot.slane %v3856_v43, %v3725_v11 }
  0xaf   :  { %v3833_v26 = vpop.permute.xlu0 %294 }
  0xb0   :  { %v3814_v9 = vpop.permute.xlu1 %336 }
  0xb2   :  { %583 = vbcast.lane.b32.xlu1 %v573_v6, 272  ;;  %484 = vbcast.lane.b32.xlu0 %v478_v46, 264 }
  0xb3   :  { %v3839_v31 = vpop.permute.xlu0 %302 }
  0xb4   :  { %v3819_v14 = vpop.permute.xlu1 %347 }
  0xb6   :  { %594 = vbcast.lane.b32.xlu1 %v592_v13, 256  ;;  %492 = vbcast.lane.b32.xlu0 %v478_v46, 280 }
  0xb7   :  { %v3844_v37 = vpop.permute.xlu0 %313 }
  0xb8   :  { %v3823_v16 = vpop.permute.xlu1 %355 }
  0xba   :  { %602 = vbcast.lane.b32.xlu1 %v592_v13, 272  ;;  %503 = vbcast.lane.b32.xlu0 %v497_v48, 264 }
  0xbb   :  { %v3851_v42 = vpop.permute.xlu0 %321 }
  0xbc   :  { %v3826_v19 = vpop.permute.xlu1 %366 }
  0xbe   :  { %613 = vbcast.lane.b32.xlu1 %v611_v17, 256  ;;  %511 = vbcast.lane.b32.xlu0 %v497_v48, 280 }
  0xbf   :  { %v3862_v46 = vpop.permute.xlu0 %332 }
  0xc0   :  { %v3830_v24 = vpop.permute.xlu1 %374 }
  0xc2   :  { %621 = vbcast.lane.b32.xlu1 %v611_v17, 272  ;;  %522 = vbcast.lane.b32.xlu0 %v516_v51, 264 }
  0xc3   :  { %v3866_v48 = vpop.permute.xlu0 %340 }
  0xc4   :  { %v3835_v27 = vpop.permute.xlu1 %385 }
  0xc6   :  { %632 = vbcast.lane.b32.xlu1 %v630_v25, 256  ;;  %530 = vbcast.lane.b32.xlu0 %v516_v51, 280 }
  0xc7   :  { %v3872_v54 = vpop.permute.xlu0 %351 }
  0xc8   :  { %v3837_v29 = vpop.permute.xlu1 %393 }
  0xca   :  { %640 = vbcast.lane.b32.xlu1 %v630_v25, 272  ;;  %541 = vbcast.lane.b32.xlu0 %v535_v62, 264 }
  0xcc   :  { %v3842_v35 = vpop.permute.xlu1 %404 }
  0xce   :  { %651 = vbcast.lane.b32.xlu1 %v649_v33, 256  ;;  %549 = vbcast.lane.b32.xlu0 %v535_v62, 280  ;;  %v3878_v62 = vpop.permute.xlu0 %359 }
  0xd0   :  { %v3846_v39 = vpop.permute.xlu1 %412 }
  0xd2   :  { %659 = vbcast.lane.b32.xlu1 %v649_v33, 272  ;;  %560 = vbcast.lane.b32.xlu0 %v554_v2, 264 }
  0xd4   :  { %v3849_v41 = vpop.permute.xlu1 %423 }
  0xd6   :  { %670 = vbcast.lane.b32.xlu1 %v668_v40, 256  ;;  %568 = vbcast.lane.b32.xlu0 %v554_v2, 280 }
  0xd8   :  { %v3858_v44 = vpop.permute.xlu1 %431 }
  0xda   :  { %678 = vbcast.lane.b32.xlu1 %v668_v40, 272  ;;  %579 = vbcast.lane.b32.xlu0 %v573_v6, 264 }
  0xdc   :  { %v3864_v47 = vpop.permute.xlu1 %442 }
  0xdd   :  { %6072 = vst [vmem:[#allocation6_spill] sm:$0xff] %v3864_v47 }
  0xde   :  { %689 = vbcast.lane.b32.xlu1 %v687_v45, 256  ;;  %587 = vbcast.lane.b32.xlu0 %v573_v6, 280  ;;  %v3882_v6 = vpop.permute.xlu0 %370 }
  0xe0   :  { %v3870_v51 = vpop.permute.xlu1 %450 }
  0xe1   :  { %6073 = vst [vmem:[#allocation7_spill] sm:$0xff] %v3870_v51 }
  0xe2   :  { %697 = vbcast.lane.b32.xlu1 %v687_v45, 272  ;;  %598 = vbcast.lane.b32.xlu0 %v592_v13, 264  ;;  %v3886_v22 = vpop.permute.xlu0 %378 }
  0xe4   :  { %v3874_v57 = vpop.permute.xlu1 %461 }
  0xe5   :  { %6074 = vst [vmem:[#allocation8_spill] sm:$0xff] %v3874_v57 }
  0xe6   :  { %708 = vbcast.lane.b32.xlu1 %v706_v49, 256  ;;  %606 = vbcast.lane.b32.xlu0 %v592_v13, 280  ;;  %v3890_v28 = vpop.permute.xlu0 %389 }
  0xe8   :  { %v3880_v2 = vpop.permute.xlu1 %469 }
  0xe9   :  { %6075 = vst [vmem:[#allocation9_spill] sm:$0xff] %v3880_v2 }
  0xea   :  { %716 = vbcast.lane.b32.xlu1 %v706_v49, 272  ;;  %617 = vbcast.lane.b32.xlu0 %v611_v17, 264 }
  0xec   :  { %v3884_v13 = vpop.permute.xlu1 %480 }
  0xed   :  { %6076 = vst [vmem:[#allocation10_spill] sm:$0xff] %v3884_v13 }
  0xee   :  { %727 = vbcast.lane.b32.xlu1 %v725_v60, 256  ;;  %625 = vbcast.lane.b32.xlu0 %v611_v17, 280  ;;  %v3894_v17 = vpop.permute.xlu0 %397 }
  0xf0   :  { %v3888_v21 = vpop.permute.xlu1 %488 }
  0xf1   :  { %6077 = vst [vmem:[#allocation11_spill] sm:$0xff] %v3888_v21 }
  0xf2   :  { %735 = vbcast.lane.b32.xlu1 %v725_v60, 272  ;;  %636 = vbcast.lane.b32.xlu0 %v630_v25, 264  ;;  %v3898_v57 = vpop.permute.xlu0 %408 }
  0xf4   :  { %v3892_v20 = vpop.permute.xlu1 %499 }
  0xf5   :  { %6078 = vst [vmem:[#allocation12_spill] sm:$0xff] %v3892_v20 }
  0xf6   :  { %644 = vbcast.lane.b32.xlu0 %v630_v25, 280 }
  0xf8   :  { %v3896_v2 = vpop.permute.xlu1 %507 }
  0xf9   :  { %6079 = vst [vmem:[#allocation13_spill] sm:$0xff] %v3896_v2 }
  0xfa   :  { %655 = vbcast.lane.b32.xlu0 %v649_v33, 264 }
  0xfc   :  { %v3900_v25 = vpop.permute.xlu1 %518 }
  0xfd   :  { %6080 = vst [vmem:[#allocation14_spill] sm:$0xff] %v3900_v25 }
  0xfe   :  { %663 = vbcast.lane.b32.xlu0 %v649_v33, 280 }
 0x102   :  { %674 = vbcast.lane.b32.xlu0 %v668_v40, 264 }
 0x106   :  { %682 = vbcast.lane.b32.xlu0 %v668_v40, 280 }
 0x10a   :  { %693 = vbcast.lane.b32.xlu0 %v687_v45, 264 }
 0x10d   :  { %v75_v13 = vpop.permute.xlu0 %74 }
 0x10e   :  { %701 = vbcast.lane.b32.xlu0 %v687_v45, 280  ;;  %v84_v33 = vrot.slane %v75_v13, %v3727_v12  ;;  %v744_v45 = vrot.slane %v3856_v43, %v3748_v30  ;;  %v782_v30 = vrot.slane %v3856_v43, %v3754_v34 }
 0x111   :  { %v78_v51 = vpop.permute.xlu1 %77 }
 0x112   :  { %v88_v21 = vrot.slane %v78_v51, %v3727_v12  ;;  %712 = vbcast.lane.b32.xlu0 %v706_v49, 264  ;;  %v3914_v51 = vpop.permute.xlu0 %416 }
 0x114   :  { %v90_v20 = vsel %vm89_vm1, %v88_v21, %v84_v33 }
 0x115   :  { %v93_v40 = vsel %vm92_vm2, %v90_v20, -inf  ;;  %v3906_v2 = vpop.permute.xlu1 %526  ;;  %v763_v20 = vrot.slane %v3856_v43, %v3751_v32 }
 0x116   :  { %94 = vmax.xlane.f32.xlu1 %v93_v40  ;;  %720 = vbcast.lane.b32.xlu0 %v706_v49, 280  ;;  %6081 = vst [vmem:[#allocation15_spill] sm:$0xff] %v3906_v2  ;;  %v3920_v49 = vpop.permute.xlu0 %427 }
 0x119   :  { %v3908_v25 = vpop.permute.xlu1 %537 }
 0x11a   :  { %731 = vbcast.lane.b32.xlu0 %v725_v60, 264  ;;  %6082 = vst [vmem:[#allocation16_spill] sm:$0xff] %v3908_v25  ;;  %v3926_v33 = vpop.permute.xlu0 %435 }
 0x11d   :  { %v3912_v13 = vpop.permute.xlu1 %545 }
 0x11e   :  { %739 = vbcast.lane.b32.xlu0 %v725_v60, 280  ;;  %6083 = vst [vmem:[#allocation17_spill] sm:$0xff] %v3912_v13  ;;  %v3930_v32 = vpop.permute.xlu0 %446 }
 0x11f   :  { %6087 = vst [vmem:[#allocation21_spill] sm:$0xff] %v3930_v32 }
 0x121   :  { %v3918_v21 = vpop.permute.xlu1 %556 }
 0x122   :  { %750 = vbcast.lane.b32.xlu0 %v744_v45, 264  ;;  %6084 = vst [vmem:[#allocation18_spill] sm:$0xff] %v3918_v21  ;;  %v801_v21 = vrot.slane %v3856_v43, %v3757_v36  ;;  %v3936_v34 = vpop.permute.xlu0 %454 }
 0x123   :  { %6089 = vst [vmem:[#allocation23_spill] sm:$0xff] %v3936_v34 }
 0x125   :  { %v3924_v60 = vpop.permute.xlu1 %564 }
 0x126   :  { %758 = vbcast.lane.b32.xlu0 %v744_v45, 280  ;;  %6085 = vst [vmem:[#allocation19_spill] sm:$0xff] %v3924_v60  ;;  %v820_v60 = vrot.slane %v3856_v43, %v3760_v38 }
 0x127   :  { %746 = vbcast.lane.b32.xlu1 %v744_v45, 256 }
 0x129   :  { %v3928_v40 = vpop.permute.xlu1 %575 }
 0x12a   :  { %769 = vbcast.lane.b32.xlu0 %v763_v20, 264  ;;  %6086 = vst [vmem:[#allocation20_spill] sm:$0xff] %v3928_v40  ;;  %v3942_v40 = vpop.permute.xlu0 %465 }
 0x12b   :  { %754 = vbcast.lane.b32.xlu1 %v744_v45, 272  ;;  %6091 = vst [vmem:[#allocation25_spill] sm:$0xff] %v3942_v40 }
 0x12d   :  { %v3934_v45 = vpop.permute.xlu1 %583 }
 0x12e   :  { %777 = vbcast.lane.b32.xlu0 %v763_v20, 280  ;;  %6088 = vst [vmem:[#allocation22_spill] sm:$0xff] %v3934_v45  ;;  %v3946_v13 = vpop.permute.xlu0 %473 }
 0x12f   :  { %765 = vbcast.lane.b32.xlu1 %v763_v20, 256  ;;  %6093 = vst [vmem:[#allocation27_spill] sm:$0xff] %v3946_v13 }
 0x132   :  { %788 = vbcast.lane.b32.xlu0 %v782_v30, 264  ;;  %v3950_v45 = vpop.permute.xlu0 %484 }
 0x133   :  { %773 = vbcast.lane.b32.xlu1 %v763_v20, 272  ;;  %v3940_v20 = vpop.permute.xlu1 %594  ;;  %6095 = vst [vmem:[#allocation29_spill] sm:$0xff] %v3950_v45 }
 0x134   :  { %6090 = vst [vmem:[#allocation24_spill] sm:$0xff] %v3940_v20 }
 0x136   :  { %796 = vbcast.lane.b32.xlu0 %v782_v30, 280  ;;  %v3954_v38 = vpop.permute.xlu0 %492 }
 0x137   :  { %784 = vbcast.lane.b32.xlu1 %v782_v30, 256  ;;  %v3944_v36 = vpop.permute.xlu1 %602  ;;  %6097 = vst [vmem:[#allocation31_spill] sm:$0xff] %v3954_v38 }
 0x138   :  { %6092 = vst [vmem:[#allocation26_spill] sm:$0xff] %v3944_v36 }
 0x13a   :  { %807 = vbcast.lane.b32.xlu0 %v801_v21, 264  ;;  %v3958_v20 = vpop.permute.xlu0 %503 }
 0x13b   :  { %792 = vbcast.lane.b32.xlu1 %v782_v30, 272  ;;  %v3948_v30 = vpop.permute.xlu1 %613  ;;  %6099 = vst [vmem:[#allocation33_spill] sm:$0xff] %v3958_v20 }
 0x13c   :  { %6094 = vst [vmem:[#allocation28_spill] sm:$0xff] %v3948_v30 }
 0x13e   :  { %815 = vbcast.lane.b32.xlu0 %v801_v21, 280  ;;  %v3962_v2 = vpop.permute.xlu0 %511 }
 0x13f   :  { %803 = vbcast.lane.b32.xlu1 %v801_v21, 256  ;;  %v3952_v25 = vpop.permute.xlu1 %621  ;;  %6101 = vst [vmem:[#allocation35_spill] sm:$0xff] %v3962_v2 }
 0x140   :  { %6096 = vst [vmem:[#allocation30_spill] sm:$0xff] %v3952_v25 }
 0x142   :  { %826 = vbcast.lane.b32.xlu0 %v820_v60, 264  ;;  %v3966_v13 = vpop.permute.xlu0 %522 }
 0x143   :  { %811 = vbcast.lane.b32.xlu1 %v801_v21, 272  ;;  %v3956_v43 = vpop.permute.xlu1 %632  ;;  %6103 = vst [vmem:[#allocation37_spill] sm:$0xff] %v3966_v13 }
 0x144   :  { %6098 = vst [vmem:[#allocation32_spill] sm:$0xff] %v3956_v43 }
 0x146   :  { %834 = vbcast.lane.b32.xlu0 %v820_v60, 280  ;;  %v3970_v30 = vpop.permute.xlu0 %530 }
 0x147   :  { %822 = vbcast.lane.b32.xlu1 %v820_v60, 256  ;;  %v3960_v21 = vpop.permute.xlu1 %640  ;;  %6105 = vst [vmem:[#allocation39_spill] sm:$0xff] %v3970_v30 }
 0x148   :  { %6100 = vst [vmem:[#allocation34_spill] sm:$0xff] %v3960_v21 }
 0x14a   :  { %v3974_v25 = vpop.permute.xlu0 %541 }
 0x14b   :  { %830 = vbcast.lane.b32.xlu1 %v820_v60, 272  ;;  %v3964_v36 = vpop.permute.xlu1 %651  ;;  %6107 = vst [vmem:[#allocation41_spill] sm:$0xff] %v3974_v25 }
 0x14c   :  { %6102 = vst [vmem:[#allocation36_spill] sm:$0xff] %v3964_v36 }
 0x14e   :  { %v3978_v43 = vpop.permute.xlu0 %549 }
 0x14f   :  { %v3968_v60 = vpop.permute.xlu1 %659  ;;  %6109 = vst [vmem:[#allocation43_spill] sm:$0xff] %v3978_v43 }
 0x150   :  { %6104 = vst [vmem:[#allocation38_spill] sm:$0xff] %v3968_v60 }
 0x152   :  { %v3982_v21 = vpop.permute.xlu0 %560 }
 0x153   :  { %v3972_v45 = vpop.permute.xlu1 %670  ;;  %6111 = vst [vmem:[#allocation45_spill] sm:$0xff] %v3982_v21 }
 0x154   :  { %6106 = vst [vmem:[#allocation40_spill] sm:$0xff] %v3972_v45 }
 0x156   :  { %v3986_v36 = vpop.permute.xlu0 %568 }
 0x157   :  { %v3976_v38 = vpop.permute.xlu1 %678  ;;  %6113 = vst [vmem:[#allocation47_spill] sm:$0xff] %v3986_v36 }
 0x158   :  { %6108 = vst [vmem:[#allocation42_spill] sm:$0xff] %v3976_v38 }
 0x15a   :  { %v3990_v60 = vpop.permute.xlu0 %579 }
 0x15b   :  { %v3980_v20 = vpop.permute.xlu1 %689  ;;  %6115 = vst [vmem:[#allocation49_spill] sm:$0xff] %v3990_v60 }
 0x15c   :  { %6110 = vst [vmem:[#allocation44_spill] sm:$0xff] %v3980_v20 }
 0x15e   :  { %v3994_v45 = vpop.permute.xlu0 %587 }
 0x15f   :  { %v3984_v2 = vpop.permute.xlu1 %697  ;;  %6117 = vst [vmem:[#allocation51_spill] sm:$0xff] %v3994_v45 }
 0x160   :  { %6112 = vst [vmem:[#allocation46_spill] sm:$0xff] %v3984_v2 }
 0x162   :  { %v3998_v38 = vpop.permute.xlu0 %598 }
 0x163   :  { %v3988_v13 = vpop.permute.xlu1 %708  ;;  %6119 = vst [vmem:[#allocation53_spill] sm:$0xff] %v3998_v38 }
 0x164   :  { %6114 = vst [vmem:[#allocation48_spill] sm:$0xff] %v3988_v13 }
 0x166   :  { %v4002_v20 = vpop.permute.xlu0 %606 }
 0x167   :  { %v3992_v30 = vpop.permute.xlu1 %716  ;;  %6121 = vst [vmem:[#allocation55_spill] sm:$0xff] %v4002_v20 }
 0x168   :  { %6116 = vst [vmem:[#allocation50_spill] sm:$0xff] %v3992_v30 }
 0x16a   :  { %v4008_v30 = vpop.permute.xlu0 %617 }
 0x16b   :  { %v3996_v25 = vpop.permute.xlu1 %727  ;;  %6122 = vst [vmem:[#allocation56_spill] sm:$0xff] %v4008_v30 }
 0x16c   :  { %6118 = vst [vmem:[#allocation52_spill] sm:$0xff] %v3996_v25 }
 0x16e   :  { %v4010_v25 = vpop.permute.xlu0 %625 }
 0x16f   :  { %v4000_v43 = vpop.permute.xlu1 %735  ;;  %6123 = vst [vmem:[#allocation57_spill] sm:$0xff] %v4010_v25 }
 0x170   :  { %6120 = vst [vmem:[#allocation54_spill] sm:$0xff] %v4000_v43 }
 0x172   :  { %v4012_v43 = vpop.permute.xlu0 %636 }
 0x173   :  { %6124 = vst [vmem:[#allocation58_spill] sm:$0xff] %v4012_v43 }
 0x176   :  { %v4014_v34 = vpop.permute.xlu0 %644 }
 0x177   :  { %6125 = vst [vmem:[#allocation59_spill] sm:$0xff] %v4014_v34 }
 0x19f   :  { %v95_v21 = vpop.xlane.xlu1 %94 }
 0x1a0   :  { %v100_v2 = vrot.slane %v95_v21, %v3725_v11  ;;  %v104_v36 = vrot.slane %v95_v21, %v3730_v18  ;;  %v4016_v21 = vpop.permute.xlu0 %655 }
 0x1a1   :  { %6126 = vst [vmem:[#allocation60_spill] sm:$0xff] %v4016_v21 }
 0x1a2   :  { %v107_v13 = vsub.f32 %v3780_v55, %v100_v2  ;;  %v108_v60 = vsub.f32 %v3785_v58, %v104_v36 }
 0x1a3   :  { %v4036_v43 = vpop.permute.xlu1 %746 }
 0x1a4   :  { %v109_v45 = vmul.f32 1.442695, %v107_v13  ;;  %v111_v40 = vmul.f32 1.442695, %v108_v60  ;;  %v4018_v55 = vpop.permute.xlu0 %663  ;;  %6136 = vst [vmem:[#allocation70_spill] sm:$0xff] %v4036_v43 }
 0x1a5   :  { %6127 = vst [vmem:[#allocation61_spill] sm:$0xff] %v4018_v55 }
 0x1a6   :  { %3670 = vpow2.f32 %v109_v45 }
 0x1a7   :  { %3672 = vpow2.f32 %v111_v40  ;;  %v4040_v55 = vpop.permute.xlu1 %754 }
 0x1a8   :  { %v4020_v58 = vpop.permute.xlu0 %674  ;;  %6138 = vst [vmem:[#allocation72_spill] sm:$0xff] %v4040_v55 }
 0x1a9   :  { %6128 = vst [vmem:[#allocation62_spill] sm:$0xff] %v4020_v58 }
 0x1ac   :  { %v4022_v2 = vpop.permute.xlu0 %682 }
 0x1ad   :  { %6129 = vst [vmem:[#allocation63_spill] sm:$0xff] %v4022_v2  ;;  %v4044_v2 = vpop.permute.xlu1 %765 }
 0x1ae   :  { %6140 = vst [vmem:[#allocation74_spill] sm:$0xff] %v4044_v2 }
 0x1b0   :  { %v4024_v13 = vpop.permute.xlu0 %693 }
 0x1b1   :  { %6130 = vst [vmem:[#allocation64_spill] sm:$0xff] %v4024_v13 }
 0x1b3   :  { %v3671_v20 = vpop.eup %3670 }
 0x1b4   :  { %v3673_v38 = vpop.eup %3672  ;;  %116 = vperm.xlu1 %3669, %v3671_v20   ;;  %v4026_v40 = vpop.permute.xlu0 %701 }
 0x1b5   :  { %119 = vperm.xlu0 %3668, %v3673_v38   ;;  %6131 = vst [vmem:[#allocation65_spill] sm:$0xff] %v4026_v40  ;;  %v4048_v40 = vpop.permute.xlu1 %773 }
 0x1b6   :  { %6142 = vst [vmem:[#allocation76_spill] sm:$0xff] %v4048_v40 }
 0x1b8   :  { %v4028_v45 = vpop.permute.xlu0 %712 }
 0x1b9   :  { %6132 = vst [vmem:[#allocation66_spill] sm:$0xff] %v4028_v45 }
 0x1bc   :  { %v4030_v36 = vpop.permute.xlu0 %720 }
 0x1bd   :  { %6133 = vst [vmem:[#allocation67_spill] sm:$0xff] %v4030_v36  ;;  %v4052_v36 = vpop.permute.xlu1 %784 }
 0x1be   :  { %6144 = vst [vmem:[#allocation78_spill] sm:$0xff] %v4052_v36 }
 0x1c0   :  { %v4032_v60 = vpop.permute.xlu0 %731 }
 0x1c1   :  { %6134 = vst [vmem:[#allocation68_spill] sm:$0xff] %v4032_v60 }
 0x1c4   :  { %v4034_v34 = vpop.permute.xlu0 %739 }
 0x1c5   :  { %6135 = vst [vmem:[#allocation69_spill] sm:$0xff] %v4034_v34  ;;  %v4056_v34 = vpop.permute.xlu1 %792 }
 0x1c6   :  { %6146 = vst [vmem:[#allocation80_spill] sm:$0xff] %v4056_v34 }
 0x1c8   :  { %v4038_v21 = vpop.permute.xlu0 %750 }
 0x1c9   :  { %6137 = vst [vmem:[#allocation71_spill] sm:$0xff] %v4038_v21  ;;  %v4060_v21 = vpop.permute.xlu1 %803 }
 0x1ca   :  { %6148 = vst [vmem:[#allocation82_spill] sm:$0xff] %v4060_v21 }
 0x1cc   :  { %v4042_v58 = vpop.permute.xlu0 %758 }
 0x1cd   :  { %6139 = vst [vmem:[#allocation73_spill] sm:$0xff] %v4042_v58  ;;  %v4064_v58 = vpop.permute.xlu1 %811 }
 0x1ce   :  { %6150 = vst [vmem:[#allocation84_spill] sm:$0xff] %v4064_v58 }
 0x1d0   :  { %v4046_v13 = vpop.permute.xlu0 %769 }
 0x1d1   :  { %6141 = vst [vmem:[#allocation75_spill] sm:$0xff] %v4046_v13  ;;  %v4068_v13 = vpop.permute.xlu1 %822 }
 0x1d2   :  { %6152 = vst [vmem:[#allocation86_spill] sm:$0xff] %v4068_v13 }
 0x1d4   :  { %v4050_v45 = vpop.permute.xlu0 %777 }
 0x1d5   :  { %6143 = vst [vmem:[#allocation77_spill] sm:$0xff] %v4050_v45  ;;  %v4072_v45 = vpop.permute.xlu1 %830 }
 0x1d6   :  { %6154 = vst [vmem:[#allocation88_spill] sm:$0xff] %v4072_v45 }
 0x1d8   :  { %v4054_v60 = vpop.permute.xlu0 %788 }
 0x1d9   :  { %6145 = vst [vmem:[#allocation79_spill] sm:$0xff] %v4054_v60 }
 0x1dc   :  { %v4058_v43 = vpop.permute.xlu0 %796 }
 0x1dd   :  { %6147 = vst [vmem:[#allocation81_spill] sm:$0xff] %v4058_v43 }
 0x1e0   :  { %v4062_v55 = vpop.permute.xlu0 %807 }
 0x1e1   :  { %6149 = vst [vmem:[#allocation83_spill] sm:$0xff] %v4062_v55 }
 0x1e4   :  { %v4066_v2 = vpop.permute.xlu0 %815 }
 0x1e5   :  { %6151 = vst [vmem:[#allocation85_spill] sm:$0xff] %v4066_v2 }
 0x1e8   :  { %v4070_v40 = vpop.permute.xlu0 %826 }
 0x1e9   :  { %6153 = vst [vmem:[#allocation87_spill] sm:$0xff] %v4070_v40 }
 0x1ec   :  { %v4074_v36 = vpop.permute.xlu0 %834 }
 0x1ed   :  { %6155 = vst [vmem:[#allocation89_spill] sm:$0xff] %v4074_v36 }
 0x22f   :  { %v117_v60 = vpop.permute.xlu1 %116 }
 0x230   :  { %v124_v34 = vrot.slane %v117_v60, %v3727_v12  ;;  %v120_v43 = vpop.permute.xlu0 %119 }
 0x231   :  { %v128_v21 = vrot.slane %v120_v43, %v3727_v12 }
 0x233   :  { %v129_v55 = vsel %vm89_vm1, %v128_v21, %v124_v34  ;;  %v26_v34 = vld [vmem:[%s5970_s1 + $0x8] sm:$0xff]  ;;  %v25_v21 = vld [vmem:[%s5970_s1] sm:$0xff] }
 0x234   :  { %v131_v58 = vsel %vm92_vm2, %v129_v55, 0.0 }
 0x235   :  { %132 = vadd.xlane.f32.xlu0 %v131_v58 }
 0x2be   :  { %v133_v2 = vpop.xlane.xlu0 %132 }
 0x2bf   :  { %3674 = vrcp.f32 %v133_v2 }
 0x2cc   :  { %v3675_v13 = vpop.eup %3674 }
 0x2cd   :  { %v135_v25 = vmul.f32 %v3675_v13, %v133_v2 }
 0x2cf   :  { %v136_v40 = vsub.f32 2.0, %v135_v25 }
 0x2d1   :  { %v137_v30 = vmul.f32 %v3675_v13, %v136_v40  ;;  %v28_v13 = vld [vmem:[%s5970_s1 + $0x18] sm:$0xff] }
 0x2d3   :  { %v142_v45 = vrot.slane %v137_v30, %v3725_v11  ;;  %v146_v36 = vrot.slane %v137_v30, %v3730_v18  ;;  %v27_v11 = vld [vmem:[%s5970_s1 + $0x10] sm:$0xff]  ;;  %v32_v30 = vld [vmem:[%s5970_s1 + $0x38] sm:$0xff] }
 0x2d5   :  { %v149_v32 = vmul.f32 %v3671_v20, %v142_v45  ;;  %v150_v60 = vmul.f32 %v3673_v38, %v146_v36 }
 0x2d7   :  { %154 = vperm.xlu1 %3669, %v149_v32  }
 0x2db   :  { %157 = vperm.xlu1 %3669, %v150_v60  }
 0x352   :  { %v155_v43 = vpop.permute.xlu1 %154 }
 0x353   :  { %v162_v25 = vrot.slane %v155_v43, %v3727_v12  ;;  %v29_v43 = vld [vmem:[%s5970_s1 + $0x20] sm:$0xff] }
 0x355   :  { %v188_v18 = vmul.f32 %v162_v25, %v26_v34  ;;  %v187_v32 = vmul.f32 %v162_v25, %v25_v21  ;;  %v189_v2 = vmul.f32 %v162_v25, %v27_v11  ;;  %v190_v60 = vmul.f32 %v162_v25, %v28_v13  ;;  %v30_v11 = vld [vmem:[%s5970_s1 + $0x28] sm:$0xff]  ;;  %v31_v25 = vld [vmem:[%s5970_s1 + $0x30] sm:$0xff] }
 0x356   :  { %v158_v20 = vpop.permute.xlu1 %157 }
 0x357   :  { %v166_v38 = vrot.slane %v158_v20, %v3727_v12  ;;  %v199_v55 = vsel %vm195_vm3, %v188_v18, 0.0  ;;  %v196_v58 = vsel %vm195_vm3, %v187_v32, 0.0  ;;  %v202_v45 = vsel %vm195_vm3, %v189_v2, 0.0  ;;  %v6164_v12 = vld [vmem:[#allocation29_spill] sm:$0xff] }
 0x358   :  { %200 = vadd.xlane.f32.xlu0 %v199_v55  ;;  %197 = vadd.xlane.f32.xlu1 %v196_v58  ;;  %v205_v34 = vsel %vm195_vm3, %v190_v60, 0.0 }
 0x359   :  { %v194_v40 = vmul.f32 %v166_v38, %v32_v30  ;;  %v191_v21 = vmul.f32 %v166_v38, %v29_v43  ;;  %v192_v32 = vmul.f32 %v166_v38, %v30_v11  ;;  %v193_v30 = vmul.f32 %v166_v38, %v31_v25 }
 0x35b   :  { %v217_v36 = vsel %vm195_vm3, %v194_v40, 0.0  ;;  %v208_v18 = vsel %vm195_vm3, %v191_v21, 0.0  ;;  %v211_v20 = vsel %vm195_vm3, %v192_v32, 0.0  ;;  %v214_v55 = vsel %vm195_vm3, %v193_v30, 0.0 }
 0x35c   :  { %203 = vadd.xlane.f32.xlu0 %v202_v45  ;;  %218 = vadd.xlane.f32.xlu1 %v217_v36 }
 0x360   :  { %206 = vadd.xlane.f32.xlu0 %v205_v34 }
 0x364   :  { %209 = vadd.xlane.f32.xlu0 %v208_v18 }
 0x368   :  { %212 = vadd.xlane.f32.xlu0 %v211_v20 }
 0x36c   :  { %215 = vadd.xlane.f32.xlu0 %v214_v55 }
 0x3e1   :  { %v4116_v58 = vpop.xlane.xlu0 %200  ;;  %v4118_v2 = vpop.xlane.xlu1 %197 }
 0x3e2   :  { %v965_v13 = vmul.f32 %v3773_v50, %v4116_v58  ;;  %v964_v40 = vmul.f32 %v3798_v0, %v4118_v2  ;;  %v968_v43 = vmul.f32 %v3778_v53, %v4118_v2  ;;  %v969_v34 = vmul.f32 %v3810_v7, %v4116_v58 }
 0x3e3   :  { %v972_v18 = vmul.f32 %v3787_v59, %v4118_v2  ;;  %v973_v32 = vmul.f32 %v3821_v15, %v4116_v58  ;;  %v976_v30 = vmul.f32 %v3796_v63, %v4118_v2  ;;  %v977_v55 = vmul.f32 %v3833_v26, %v4116_v58 }
 0x3e4   :  { %1480 = vperm.xlu0 %3668, %v965_v13   ;;  %1477 = vperm.xlu1 %3669, %v964_v40  }
 0x3e5   :  { %v4124_v45 = vpop.xlane.xlu0 %203 }
 0x3e6   :  { %v966_v38 = vmul.f32 %v3776_v52, %v4124_v45  ;;  %v970_v21 = vmul.f32 %v3782_v56, %v4124_v45  ;;  %v974_v25 = vmul.f32 %v3793_v61, %v4124_v45  ;;  %v978_v13 = vmul.f32 %v3800_v1, %v4124_v45 }
 0x3e8   :  { %1483 = vperm.xlu1 %3669, %v966_v38   ;;  %v980_v38 = vmul.f32 %v3803_v3, %v4118_v2 }
 0x3e9   :  { %v4128_v36 = vpop.xlane.xlu0 %206 }
 0x3ea   :  { %v967_v60 = vmul.f32 %v3805_v4, %v4128_v36  ;;  %v971_v11 = vmul.f32 %v3816_v10, %v4128_v36  ;;  %v975_v20 = vmul.f32 %v3828_v23, %v4128_v36  ;;  %v979_v40 = vmul.f32 %v3839_v31, %v4128_v36 }
 0x3ec   :  { %1486 = vperm.xlu0 %3668, %v967_v60   ;;  %1489 = vperm.xlu1 %3669, %v968_v43   ;;  %v981_v60 = vmul.f32 %v3844_v37, %v4116_v58  ;;  %v982_v43 = vmul.f32 %v3807_v5, %v4124_v45 }
 0x3f0   :  { %1492 = vperm.xlu0 %3668, %v969_v34   ;;  %1495 = vperm.xlu1 %3669, %v970_v21   ;;  %v983_v34 = vmul.f32 %v3851_v42, %v4128_v36  ;;  %v984_v21 = vmul.f32 %v3812_v8, %v4118_v2 }
 0x3f4   :  { %1498 = vperm.xlu0 %3668, %v971_v11   ;;  %1501 = vperm.xlu1 %3669, %v972_v18   ;;  %v985_v11 = vmul.f32 %v3862_v46, %v4116_v58  ;;  %v986_v18 = vmul.f32 %v3814_v9, %v4124_v45 }
 0x3f8   :  { %1504 = vperm.xlu0 %3668, %v973_v32   ;;  %1507 = vperm.xlu1 %3669, %v974_v25   ;;  %v987_v32 = vmul.f32 %v3866_v48, %v4128_v36  ;;  %v988_v25 = vmul.f32 %v3819_v14, %v4118_v2 }
 0x3fc   :  { %1510 = vperm.xlu0 %3668, %v975_v20   ;;  %1513 = vperm.xlu1 %3669, %v976_v30   ;;  %v989_v20 = vmul.f32 %v3872_v54, %v4116_v58  ;;  %v990_v30 = vmul.f32 %v3823_v16, %v4124_v45 }
 0x400   :  { %1516 = vperm.xlu0 %3668, %v977_v55   ;;  %1519 = vperm.xlu1 %3669, %v978_v13   ;;  %v991_v55 = vmul.f32 %v3878_v62, %v4128_v36  ;;  %v992_v13 = vmul.f32 %v3826_v19, %v4118_v2 }
 0x404   :  { %1522 = vperm.xlu0 %3668, %v979_v40   ;;  %1525 = vperm.xlu1 %3669, %v980_v38   ;;  %v993_v40 = vmul.f32 %v3882_v6, %v4116_v58  ;;  %v994_v38 = vmul.f32 %v3830_v24, %v4124_v45 }
 0x408   :  { %1528 = vperm.xlu0 %3668, %v981_v60   ;;  %1531 = vperm.xlu1 %3669, %v982_v43   ;;  %v995_v60 = vmul.f32 %v3886_v22, %v4128_v36  ;;  %v996_v43 = vmul.f32 %v3835_v27, %v4118_v2 }
 0x40c   :  { %1534 = vperm.xlu0 %3668, %v983_v34   ;;  %1537 = vperm.xlu1 %3669, %v984_v21   ;;  %v997_v34 = vmul.f32 %v3890_v28, %v4116_v58  ;;  %v998_v21 = vmul.f32 %v3837_v29, %v4124_v45 }
 0x410   :  { %1540 = vperm.xlu0 %3668, %v985_v11   ;;  %1543 = vperm.xlu1 %3669, %v986_v18   ;;  %v999_v11 = vmul.f32 %v3894_v17, %v4128_v36  ;;  %v1000_v18 = vmul.f32 %v3842_v35, %v4118_v2 }
 0x414   :  { %1546 = vperm.xlu0 %3668, %v987_v32   ;;  %1549 = vperm.xlu1 %3669, %v988_v25   ;;  %v1001_v32 = vmul.f32 %v3898_v57, %v4116_v58  ;;  %v1002_v25 = vmul.f32 %v3846_v39, %v4124_v45 }
 0x418   :  { %1552 = vperm.xlu0 %3668, %v989_v20   ;;  %1555 = vperm.xlu1 %3669, %v990_v30   ;;  %v1003_v20 = vmul.f32 %v3914_v51, %v4128_v36  ;;  %v1004_v30 = vmul.f32 %v3849_v41, %v4118_v2 }
 0x41c   :  { %1558 = vperm.xlu0 %3668, %v991_v55   ;;  %1561 = vperm.xlu1 %3669, %v992_v13   ;;  %v1005_v55 = vmul.f32 %v3920_v49, %v4116_v58  ;;  %v1006_v13 = vmul.f32 %v3858_v44, %v4124_v45 }
 0x420   :  { %1564 = vperm.xlu0 %3668, %v993_v40   ;;  %1567 = vperm.xlu1 %3669, %v994_v38   ;;  %v1007_v40 = vmul.f32 %v3926_v33, %v4128_v36  ;;  %v1008_v38 = vmul.f32 %v3864_v47, %v4118_v2  ;;  %v6180_v47 = vld [vmem:[#allocation17_spill] sm:$0xff] }
 0x424   :  { %1570 = vperm.xlu0 %3668, %v995_v60   ;;  %1573 = vperm.xlu1 %3669, %v996_v43   ;;  %v6156_v60 = vld [vmem:[#allocation21_spill] sm:$0xff] }
 0x425   :  { %v1009_v43 = vmul.f32 %v6156_v60, %v4116_v58 }
 0x428   :  { %1576 = vperm.xlu0 %3668, %v997_v34   ;;  %1579 = vperm.xlu1 %3669, %v998_v21   ;;  %v6157_v34 = vld [vmem:[#allocation7_spill] sm:$0xff] }
 0x429   :  { %v1010_v21 = vmul.f32 %v6157_v34, %v4124_v45 }
 0x42c   :  { %1582 = vperm.xlu0 %3668, %v999_v11   ;;  %1585 = vperm.xlu1 %3669, %v1000_v18   ;;  %v6158_v11 = vld [vmem:[#allocation23_spill] sm:$0xff] }
 0x42d   :  { %v1011_v18 = vmul.f32 %v6158_v11, %v4128_v36  ;;  %v4250_v11 = vpop.xlane.xlu1 %218 }
 0x430   :  { %1588 = vperm.xlu0 %3668, %v1001_v32   ;;  %1591 = vperm.xlu1 %3669, %v1002_v25   ;;  %v6159_v32 = vld [vmem:[#allocation8_spill] sm:$0xff] }
 0x431   :  { %v1012_v25 = vmul.f32 %v6159_v32, %v4118_v2 }
 0x434   :  { %1594 = vperm.xlu0 %3668, %v1003_v20   ;;  %1597 = vperm.xlu1 %3669, %v1004_v30   ;;  %v6160_v20 = vld [vmem:[#allocation25_spill] sm:$0xff] }
 0x435   :  { %v1013_v30 = vmul.f32 %v6160_v20, %v4116_v58 }
 0x438   :  { %1600 = vperm.xlu0 %3668, %v1005_v55   ;;  %1603 = vperm.xlu1 %3669, %v1006_v13   ;;  %v6161_v55 = vld [vmem:[#allocation9_spill] sm:$0xff] }
 0x439   :  { %v1014_v13 = vmul.f32 %v6161_v55, %v4124_v45  ;;  %v6166_v55 = vld [vmem:[#allocation31_spill] sm:$0xff] }
 0x43c   :  { %1606 = vperm.xlu0 %3668, %v1007_v40   ;;  %1609 = vperm.xlu1 %3669, %v1008_v38   ;;  %v6162_v40 = vld [vmem:[#allocation27_spill] sm:$0xff] }
 0x43d   :  { %v1015_v38 = vmul.f32 %v6162_v40, %v4128_v36  ;;  %v4238_v40 = vpop.xlane.xlu0 %209 }
 0x440   :  { %1612 = vperm.xlu0 %3668, %v1009_v43   ;;  %1615 = vperm.xlu1 %3669, %v1010_v21   ;;  %v6163_v43 = vld [vmem:[#allocation10_spill] sm:$0xff] }
 0x441   :  { %v1016_v21 = vmul.f32 %v6163_v43, %v4118_v2 }
 0x444   :  { %1618 = vperm.xlu0 %3668, %v1011_v18   ;;  %1621 = vperm.xlu1 %3669, %v1012_v25   ;;  %v1017_v18 = vmul.f32 %v6164_v12, %v4116_v58  ;;  %v6165_v25 = vld [vmem:[#allocation11_spill] sm:$0xff]  ;;  %v6169_v12 = vld [vmem:[#allocation13_spill] sm:$0xff] }
 0x445   :  { %v1018_v32 = vmul.f32 %v6165_v25, %v4124_v45  ;;  %v1022_v43 = vmul.f32 %v6169_v12, %v4124_v45  ;;  %v6171_v25 = vld [vmem:[#allocation14_spill] sm:$0xff] }
 0x448   :  { %1624 = vperm.xlu0 %3668, %v1013_v30   ;;  %1627 = vperm.xlu1 %3669, %v1014_v13   ;;  %v1019_v30 = vmul.f32 %v6166_v55, %v4128_v36  ;;  %v6167_v13 = vld [vmem:[#allocation12_spill] sm:$0xff] }
 0x449   :  { %v1020_v20 = vmul.f32 %v6167_v13, %v4118_v2  ;;  %v1024_v13 = vmul.f32 %v6171_v25, %v4118_v2  ;;  %v6176_v25 = vld [vmem:[#allocation16_spill] sm:$0xff] }
 0x44a   :  { %v1028_v60 = vmul.f32 %v6176_v25, %v4118_v2  ;;  %v6183_v25 = vld [vmem:[#allocation43_spill] sm:$0xff] }
 0x44c   :  { %1630 = vperm.xlu0 %3668, %v1015_v38   ;;  %1633 = vperm.xlu1 %3669, %v1016_v21   ;;  %v6168_v38 = vld [vmem:[#allocation33_spill] sm:$0xff] }
 0x44d   :  { %v1021_v21 = vmul.f32 %v6168_v38, %v4116_v58  ;;  %v6173_v38 = vld [vmem:[#allocation15_spill] sm:$0xff] }
 0x44e   :  { %v1026_v12 = vmul.f32 %v6173_v38, %v4124_v45  ;;  %v6179_v38 = vld [vmem:[#allocation41_spill] sm:$0xff] }
 0x450   :  { %1636 = vperm.xlu0 %3668, %v1017_v18   ;;  %1639 = vperm.xlu1 %3669, %v1018_v32   ;;  %v4244_v18 = vpop.xlane.xlu0 %212  ;;  %v6170_v32 = vld [vmem:[#allocation35_spill] sm:$0xff] }
 0x451   :  { %v1023_v55 = vmul.f32 %v6170_v32, %v4128_v36  ;;  %v6175_v32 = vld [vmem:[#allocation39_spill] sm:$0xff] }
 0x452   :  { %v1027_v34 = vmul.f32 %v6175_v32, %v4128_v36  ;;  %v1031_v32 = vmul.f32 %v6183_v25, %v4128_v36 }
 0x454   :  { %1642 = vperm.xlu0 %3668, %v1019_v30   ;;  %1645 = vperm.xlu1 %3669, %v1020_v20   ;;  %v6172_v20 = vld [vmem:[#allocation37_spill] sm:$0xff] }
 0x455   :  { %v1025_v30 = vmul.f32 %v6172_v20, %v4116_v58  ;;  %v1029_v20 = vmul.f32 %v6179_v38, %v4116_v58 }
 0x458   :  { %1648 = vperm.xlu0 %3668, %v1021_v21   ;;  %1651 = vperm.xlu1 %3669, %v1022_v43   ;;  %v4256_v21 = vpop.xlane.xlu0 %215 }
 0x45c   :  { %1654 = vperm.xlu0 %3668, %v1023_v55   ;;  %1657 = vperm.xlu1 %3669, %v1024_v13  }
 0x45f   :  { %v4258_v43 = vpop.permute.xlu1 %1477  ;;  %v4264_v55 = vpop.permute.xlu0 %1480 }
 0x460   :  { %6174 = vst [vmem:[#allocation90_spill] sm:$0xff] %v4258_v43  ;;  %1660 = vperm.xlu0 %3668, %v1025_v30   ;;  %1663 = vperm.xlu1 %3669, %v1026_v12   ;;  %6177 = vst [vmem:[#allocation91_spill] sm:$0xff] %v4264_v55  ;;  %v1030_v43 = vmul.f32 %v6180_v47, %v4124_v45  ;;  %v6184_v55 = vld [vmem:[#allocation18_spill] sm:$0xff]  ;;  %v6187_v47 = vld [vmem:[#allocation45_spill] sm:$0xff] }
 0x461   :  { %v1033_v38 = vmul.f32 %v6187_v47, %v4116_v58 }
 0x463   :  { %v4266_v13 = vpop.permute.xlu1 %1483 }
 0x464   :  { %6178 = vst [vmem:[#allocation92_spill] sm:$0xff] %v4266_v13  ;;  %1666 = vperm.xlu0 %3668, %v1027_v34   ;;  %1669 = vperm.xlu1 %3669, %v1028_v60   ;;  %v1032_v13 = vmul.f32 %v6184_v55, %v4118_v2  ;;  %v6191_v55 = vld [vmem:[#allocation47_spill] sm:$0xff] }
 0x465   :  { %v1035_v25 = vmul.f32 %v6191_v55, %v4128_v36 }
 0x467   :  { %v4272_v30 = vpop.permute.xlu0 %1486  ;;  %v4274_v12 = vpop.permute.xlu1 %1489 }
 0x468   :  { %6181 = vst [vmem:[#allocation93_spill] sm:$0xff] %v4272_v30  ;;  %6182 = vst [vmem:[#allocation94_spill] sm:$0xff] %v4274_v12  ;;  %1672 = vperm.xlu0 %3668, %v1029_v20   ;;  %1675 = vperm.xlu1 %3669, %v1030_v43   ;;  %v6188_v30 = vld [vmem:[#allocation19_spill] sm:$0xff] }
 0x469   :  { %v1034_v12 = vmul.f32 %v6188_v30, %v4124_v45  ;;  %v6195_v30 = vld [vmem:[#allocation49_spill] sm:$0xff] }
 0x46a   :  { %v1037_v47 = vmul.f32 %v6195_v30, %v4116_v58 }
 0x46b   :  { %v4280_v34 = vpop.permute.xlu0 %1492  ;;  %v4282_v60 = vpop.permute.xlu1 %1495 }
 0x46c   :  { %6185 = vst [vmem:[#allocation95_spill] sm:$0xff] %v4280_v34  ;;  %6186 = vst [vmem:[#allocation96_spill] sm:$0xff] %v4282_v60  ;;  %1678 = vperm.xlu0 %3668, %v1031_v32   ;;  %1681 = vperm.xlu1 %3669, %v1032_v13   ;;  %v6192_v34 = vld [vmem:[#allocation20_spill] sm:$0xff] }
 0x46d   :  { %v1036_v60 = vmul.f32 %v6192_v34, %v4118_v2  ;;  %v6199_v34 = vld [vmem:[#allocation51_spill] sm:$0xff] }
 0x46e   :  { %v1039_v55 = vmul.f32 %v6199_v34, %v4128_v36 }
 0x46f   :  { %v4288_v20 = vpop.permute.xlu0 %1498  ;;  %v4290_v43 = vpop.permute.xlu1 %1501 }
 0x470   :  { %6189 = vst [vmem:[#allocation97_spill] sm:$0xff] %v4288_v20  ;;  %6190 = vst [vmem:[#allocation98_spill] sm:$0xff] %v4290_v43  ;;  %1684 = vperm.xlu0 %3668, %v1033_v38   ;;  %1687 = vperm.xlu1 %3669, %v1034_v12   ;;  %v6196_v20 = vld [vmem:[#allocation22_spill] sm:$0xff] }
 0x471   :  { %v1038_v43 = vmul.f32 %v6196_v20, %v4124_v45  ;;  %v6203_v20 = vld [vmem:[#allocation53_spill] sm:$0xff] }
 0x472   :  { %v1041_v30 = vmul.f32 %v6203_v20, %v4116_v58 }
 0x473   :  { %v4296_v32 = vpop.permute.xlu0 %1504  ;;  %v4298_v13 = vpop.permute.xlu1 %1507 }
 0x474   :  { %6193 = vst [vmem:[#allocation99_spill] sm:$0xff] %v4296_v32  ;;  %6194 = vst [vmem:[#allocation100_spill] sm:$0xff] %v4298_v13  ;;  %1690 = vperm.xlu0 %3668, %v1035_v25   ;;  %1693 = vperm.xlu1 %3669, %v1036_v60   ;;  %v6200_v32 = vld [vmem:[#allocation24_spill] sm:$0xff] }
 0x475   :  { %v1040_v13 = vmul.f32 %v6200_v32, %v4118_v2  ;;  %v6207_v32 = vld [vmem:[#allocation55_spill] sm:$0xff] }
 0x476   :  { %v1043_v34 = vmul.f32 %v6207_v32, %v4128_v36 }
 0x477   :  { %v4304_v38 = vpop.permute.xlu0 %1510  ;;  %v4306_v12 = vpop.permute.xlu1 %1513 }
 0x478   :  { %6197 = vst [vmem:[#allocation101_spill] sm:$0xff] %v4304_v38  ;;  %6198 = vst [vmem:[#allocation102_spill] sm:$0xff] %v4306_v12  ;;  %1696 = vperm.xlu0 %3668, %v1037_v47   ;;  %1699 = vperm.xlu1 %3669, %v1038_v43   ;;  %v6204_v38 = vld [vmem:[#allocation26_spill] sm:$0xff] }
 0x479   :  { %v1042_v12 = vmul.f32 %v6204_v38, %v4124_v45  ;;  %v6211_v38 = vld [vmem:[#allocation56_spill] sm:$0xff] }
 0x47a   :  { %v1045_v20 = vmul.f32 %v6211_v38, %v4116_v58 }
 0x47b   :  { %v4312_v25 = vpop.permute.xlu0 %1516  ;;  %v4314_v60 = vpop.permute.xlu1 %1519 }
 0x47c   :  { %6201 = vst [vmem:[#allocation103_spill] sm:$0xff] %v4312_v25  ;;  %6202 = vst [vmem:[#allocation104_spill] sm:$0xff] %v4314_v60  ;;  %1702 = vperm.xlu0 %3668, %v1039_v55   ;;  %1705 = vperm.xlu1 %3669, %v1040_v13   ;;  %v6208_v25 = vld [vmem:[#allocation28_spill] sm:$0xff] }
 0x47d   :  { %v1044_v60 = vmul.f32 %v6208_v25, %v4118_v2  ;;  %v6215_v25 = vld [vmem:[#allocation57_spill] sm:$0xff] }
 0x47e   :  { %v1047_v32 = vmul.f32 %v6215_v25, %v4128_v36 }
 0x47f   :  { %v4320_v47 = vpop.permute.xlu0 %1522  ;;  %v4322_v43 = vpop.permute.xlu1 %1525 }
 0x480   :  { %6205 = vst [vmem:[#allocation105_spill] sm:$0xff] %v4320_v47  ;;  %6206 = vst [vmem:[#allocation106_spill] sm:$0xff] %v4322_v43  ;;  %1708 = vperm.xlu0 %3668, %v1041_v30   ;;  %1711 = vperm.xlu1 %3669, %v1042_v12   ;;  %v6212_v47 = vld [vmem:[#allocation30_spill] sm:$0xff] }
 0x481   :  { %v1046_v43 = vmul.f32 %v6212_v47, %v4124_v45  ;;  %v6219_v47 = vld [vmem:[#allocation58_spill] sm:$0xff] }
 0x482   :  { %v1049_v38 = vmul.f32 %v6219_v47, %v4116_v58 }
 0x483   :  { %v4328_v55 = vpop.permute.xlu0 %1528  ;;  %v4330_v13 = vpop.permute.xlu1 %1531 }
 0x484   :  { %6209 = vst [vmem:[#allocation107_spill] sm:$0xff] %v4328_v55  ;;  %6210 = vst [vmem:[#allocation108_spill] sm:$0xff] %v4330_v13  ;;  %1714 = vperm.xlu0 %3668, %v1043_v34   ;;  %1717 = vperm.xlu1 %3669, %v1044_v60   ;;  %v6216_v55 = vld [vmem:[#allocation32_spill] sm:$0xff] }
 0x485   :  { %v1048_v13 = vmul.f32 %v6216_v55, %v4118_v2  ;;  %v6223_v55 = vld [vmem:[#allocation59_spill] sm:$0xff] }
 0x486   :  { %v1051_v25 = vmul.f32 %v6223_v55, %v4128_v36 }
 0x487   :  { %v4336_v30 = vpop.permute.xlu0 %1534  ;;  %v4338_v12 = vpop.permute.xlu1 %1537 }
 0x488   :  { %6213 = vst [vmem:[#allocation109_spill] sm:$0xff] %v4336_v30  ;;  %6214 = vst [vmem:[#allocation110_spill] sm:$0xff] %v4338_v12  ;;  %1720 = vperm.xlu0 %3668, %v1045_v20   ;;  %1723 = vperm.xlu1 %3669, %v1046_v43   ;;  %v6220_v30 = vld [vmem:[#allocation34_spill] sm:$0xff] }
 0x489   :  { %v1050_v12 = vmul.f32 %v6220_v30, %v4124_v45  ;;  %v6227_v30 = vld [vmem:[#allocation60_spill] sm:$0xff] }
 0x48a   :  { %v1053_v47 = vmul.f32 %v6227_v30, %v4116_v58 }
 0x48b   :  { %v4344_v34 = vpop.permute.xlu0 %1540  ;;  %v4346_v60 = vpop.permute.xlu1 %1543 }
 0x48c   :  { %6217 = vst [vmem:[#allocation111_spill] sm:$0xff] %v4344_v34  ;;  %6218 = vst [vmem:[#allocation112_spill] sm:$0xff] %v4346_v60  ;;  %1726 = vperm.xlu0 %3668, %v1047_v32   ;;  %1729 = vperm.xlu1 %3669, %v1048_v13   ;;  %v6224_v34 = vld [vmem:[#allocation36_spill] sm:$0xff] }
 0x48d   :  { %v1052_v60 = vmul.f32 %v6224_v34, %v4118_v2  ;;  %v6231_v34 = vld [vmem:[#allocation61_spill] sm:$0xff] }
 0x48e   :  { %v1055_v55 = vmul.f32 %v6231_v34, %v4128_v36 }
 0x48f   :  { %v4352_v20 = vpop.permute.xlu0 %1546  ;;  %v4354_v43 = vpop.permute.xlu1 %1549 }
 0x490   :  { %6221 = vst [vmem:[#allocation113_spill] sm:$0xff] %v4352_v20  ;;  %6222 = vst [vmem:[#allocation114_spill] sm:$0xff] %v4354_v43  ;;  %1732 = vperm.xlu0 %3668, %v1049_v38   ;;  %1735 = vperm.xlu1 %3669, %v1050_v12   ;;  %v6228_v20 = vld [vmem:[#allocation38_spill] sm:$0xff] }
 0x491   :  { %v1054_v43 = vmul.f32 %v6228_v20, %v4124_v45  ;;  %v6235_v20 = vld [vmem:[#allocation62_spill] sm:$0xff] }
 0x492   :  { %v1057_v30 = vmul.f32 %v6235_v20, %v4116_v58 }
 0x493   :  { %v4360_v32 = vpop.permute.xlu0 %1552  ;;  %v4362_v13 = vpop.permute.xlu1 %1555 }
 0x494   :  { %6225 = vst [vmem:[#allocation115_spill] sm:$0xff] %v4360_v32  ;;  %6226 = vst [vmem:[#allocation116_spill] sm:$0xff] %v4362_v13  ;;  %1738 = vperm.xlu0 %3668, %v1051_v25   ;;  %1741 = vperm.xlu1 %3669, %v1052_v60   ;;  %v6232_v32 = vld [vmem:[#allocation40_spill] sm:$0xff] }
 0x495   :  { %v1056_v13 = vmul.f32 %v6232_v32, %v4118_v2  ;;  %v6239_v32 = vld [vmem:[#allocation63_spill] sm:$0xff] }
 0x496   :  { %v1059_v34 = vmul.f32 %v6239_v32, %v4128_v36  ;;  %v6247_v32 = vld [vmem:[#allocation65_spill] sm:$0xff] }
 0x497   :  { %v4368_v38 = vpop.permute.xlu0 %1558  ;;  %v4370_v12 = vpop.permute.xlu1 %1561 }
 0x498   :  { %6229 = vst [vmem:[#allocation117_spill] sm:$0xff] %v4368_v38  ;;  %6230 = vst [vmem:[#allocation118_spill] sm:$0xff] %v4370_v12  ;;  %1744 = vperm.xlu0 %3668, %v1053_v47   ;;  %1747 = vperm.xlu1 %3669, %v1054_v43   ;;  %v6236_v38 = vld [vmem:[#allocation42_spill] sm:$0xff] }
 0x499   :  { %v1058_v12 = vmul.f32 %v6236_v38, %v4124_v45  ;;  %v6243_v38 = vld [vmem:[#allocation64_spill] sm:$0xff] }
 0x49a   :  { %v1061_v20 = vmul.f32 %v6243_v38, %v4116_v58 }
 0x49b   :  { %v4376_v25 = vpop.permute.xlu0 %1564  ;;  %v4378_v60 = vpop.permute.xlu1 %1567 }
 0x49c   :  { %6233 = vst [vmem:[#allocation119_spill] sm:$0xff] %v4376_v25  ;;  %6234 = vst [vmem:[#allocation120_spill] sm:$0xff] %v4378_v60  ;;  %1750 = vperm.xlu0 %3668, %v1055_v55   ;;  %1753 = vperm.xlu1 %3669, %v1056_v13   ;;  %v6240_v25 = vld [vmem:[#allocation44_spill] sm:$0xff] }
 0x49d   :  { %v1060_v60 = vmul.f32 %v6240_v25, %v4118_v2  ;;  %v1063_v25 = vmul.f32 %v6247_v32, %v4128_v36  ;;  %v6255_v32 = vld [vmem:[#allocation67_spill] sm:$0xff] }
 0x49f   :  { %v4384_v47 = vpop.permute.xlu0 %1570  ;;  %v4386_v43 = vpop.permute.xlu1 %1573 }
 0x4a0   :  { %6237 = vst [vmem:[#allocation121_spill] sm:$0xff] %v4384_v47  ;;  %6238 = vst [vmem:[#allocation122_spill] sm:$0xff] %v4386_v43  ;;  %1756 = vperm.xlu0 %3668, %v1057_v30   ;;  %1759 = vperm.xlu1 %3669, %v1058_v12   ;;  %v6244_v47 = vld [vmem:[#allocation46_spill] sm:$0xff] }
 0x4a1   :  { %v1062_v43 = vmul.f32 %v6244_v47, %v4124_v45  ;;  %v6251_v47 = vld [vmem:[#allocation66_spill] sm:$0xff] }
 0x4a2   :  { %v1065_v38 = vmul.f32 %v6251_v47, %v4116_v58 }
 0x4a3   :  { %v4392_v55 = vpop.permute.xlu0 %1576  ;;  %v4394_v13 = vpop.permute.xlu1 %1579 }
 0x4a4   :  { %6241 = vst [vmem:[#allocation123_spill] sm:$0xff] %v4392_v55  ;;  %6242 = vst [vmem:[#allocation124_spill] sm:$0xff] %v4394_v13  ;;  %1762 = vperm.xlu0 %3668, %v1059_v34   ;;  %1765 = vperm.xlu1 %3669, %v1060_v60   ;;  %v6248_v55 = vld [vmem:[#allocation48_spill] sm:$0xff] }
 0x4a5   :  { %v1064_v13 = vmul.f32 %v6248_v55, %v4118_v2  ;;  %v1067_v55 = vmul.f32 %v6255_v32, %v4128_v36  ;;  %v6263_v32 = vld [vmem:[#allocation69_spill] sm:$0xff] }
 0x4a7   :  { %v4400_v30 = vpop.permute.xlu0 %1582  ;;  %v4402_v12 = vpop.permute.xlu1 %1585 }
 0x4a8   :  { %6245 = vst [vmem:[#allocation125_spill] sm:$0xff] %v4400_v30  ;;  %6246 = vst [vmem:[#allocation126_spill] sm:$0xff] %v4402_v12  ;;  %1768 = vperm.xlu0 %3668, %v1061_v20   ;;  %1771 = vperm.xlu1 %3669, %v1062_v43   ;;  %v6252_v30 = vld [vmem:[#allocation50_spill] sm:$0xff] }
 0x4a9   :  { %v1066_v12 = vmul.f32 %v6252_v30, %v4124_v45  ;;  %v6259_v30 = vld [vmem:[#allocation68_spill] sm:$0xff] }
 0x4aa   :  { %v1069_v47 = vmul.f32 %v6259_v30, %v4116_v58 }
 0x4ab   :  { %v4408_v34 = vpop.permute.xlu0 %1588  ;;  %v4410_v60 = vpop.permute.xlu1 %1591 }
 0x4ac   :  { %6249 = vst [vmem:[#allocation127_spill] sm:$0xff] %v4408_v34  ;;  %6250 = vst [vmem:[#allocation128_spill] sm:$0xff] %v4410_v60  ;;  %1774 = vperm.xlu0 %3668, %v1063_v25   ;;  %1777 = vperm.xlu1 %3669, %v1064_v13   ;;  %v6256_v34 = vld [vmem:[#allocation52_spill] sm:$0xff] }
 0x4ad   :  { %v1068_v60 = vmul.f32 %v6256_v34, %v4118_v2  ;;  %v1071_v34 = vmul.f32 %v6263_v32, %v4128_v36  ;;  %v6271_v32 = vld [vmem:[#allocation73_spill] sm:$0xff] }
 0x4af   :  { %v4416_v20 = vpop.permute.xlu0 %1594  ;;  %v4418_v43 = vpop.permute.xlu1 %1597 }
 0x4b0   :  { %6253 = vst [vmem:[#allocation129_spill] sm:$0xff] %v4416_v20  ;;  %6254 = vst [vmem:[#allocation130_spill] sm:$0xff] %v4418_v43  ;;  %1780 = vperm.xlu0 %3668, %v1065_v38   ;;  %1783 = vperm.xlu1 %3669, %v1066_v12   ;;  %v6260_v20 = vld [vmem:[#allocation54_spill] sm:$0xff] }
 0x4b1   :  { %v1070_v43 = vmul.f32 %v6260_v20, %v4124_v45  ;;  %v6267_v20 = vld [vmem:[#allocation71_spill] sm:$0xff] }
 0x4b2   :  { %v1073_v30 = vmul.f32 %v6267_v20, %v4116_v58 }
 0x4b3   :  { %v4424_v25 = vpop.permute.xlu0 %1600  ;;  %v4426_v13 = vpop.permute.xlu1 %1603 }
 0x4b4   :  { %6257 = vst [vmem:[#allocation131_spill] sm:$0xff] %v4424_v25  ;;  %6258 = vst [vmem:[#allocation132_spill] sm:$0xff] %v4426_v13  ;;  %1786 = vperm.xlu0 %3668, %v1067_v55   ;;  %1789 = vperm.xlu1 %3669, %v1068_v60   ;;  %v6264_v25 = vld [vmem:[#allocation70_spill] sm:$0xff] }
 0x4b5   :  { %v1072_v13 = vmul.f32 %v6264_v25, %v4118_v2  ;;  %v1075_v25 = vmul.f32 %v6271_v32, %v4128_v36  ;;  %v6279_v32 = vld [vmem:[#allocation77_spill] sm:$0xff] }
 0x4b7   :  { %v4432_v38 = vpop.permute.xlu0 %1606  ;;  %v4434_v12 = vpop.permute.xlu1 %1609 }
 0x4b8   :  { %6261 = vst [vmem:[#allocation133_spill] sm:$0xff] %v4432_v38  ;;  %6262 = vst [vmem:[#allocation134_spill] sm:$0xff] %v4434_v12  ;;  %1792 = vperm.xlu0 %3668, %v1069_v47   ;;  %1795 = vperm.xlu1 %3669, %v1070_v43   ;;  %v6268_v38 = vld [vmem:[#allocation72_spill] sm:$0xff] }
 0x4b9   :  { %v1074_v12 = vmul.f32 %v6268_v38, %v4124_v45  ;;  %v6275_v38 = vld [vmem:[#allocation75_spill] sm:$0xff] }
 0x4ba   :  { %v1077_v20 = vmul.f32 %v6275_v38, %v4116_v58 }
 0x4bb   :  { %v4440_v55 = vpop.permute.xlu0 %1612  ;;  %v4442_v60 = vpop.permute.xlu1 %1615 }
 0x4bc   :  { %6265 = vst [vmem:[#allocation135_spill] sm:$0xff] %v4440_v55  ;;  %6266 = vst [vmem:[#allocation136_spill] sm:$0xff] %v4442_v60  ;;  %1798 = vperm.xlu0 %3668, %v1071_v34   ;;  %1801 = vperm.xlu1 %3669, %v1072_v13   ;;  %v6272_v55 = vld [vmem:[#allocation74_spill] sm:$0xff] }
 0x4bd   :  { %v1076_v60 = vmul.f32 %v6272_v55, %v4118_v2  ;;  %v1079_v55 = vmul.f32 %v6279_v32, %v4128_v36  ;;  %v6287_v32 = vld [vmem:[#allocation81_spill] sm:$0xff] }
 0x4bf   :  { %v4448_v47 = vpop.permute.xlu0 %1618  ;;  %v4450_v43 = vpop.permute.xlu1 %1621 }
 0x4c0   :  { %6269 = vst [vmem:[#allocation137_spill] sm:$0xff] %v4448_v47  ;;  %6270 = vst [vmem:[#allocation138_spill] sm:$0xff] %v4450_v43  ;;  %1804 = vperm.xlu0 %3668, %v1073_v30   ;;  %1807 = vperm.xlu1 %3669, %v1074_v12   ;;  %v6276_v47 = vld [vmem:[#allocation76_spill] sm:$0xff] }
 0x4c1   :  { %v1078_v43 = vmul.f32 %v6276_v47, %v4124_v45  ;;  %v6283_v47 = vld [vmem:[#allocation79_spill] sm:$0xff] }
 0x4c2   :  { %v1081_v38 = vmul.f32 %v6283_v47, %v4116_v58 }
 0x4c3   :  { %v4456_v34 = vpop.permute.xlu0 %1624  ;;  %v4458_v13 = vpop.permute.xlu1 %1627 }
 0x4c4   :  { %6273 = vst [vmem:[#allocation139_spill] sm:$0xff] %v4456_v34  ;;  %6274 = vst [vmem:[#allocation140_spill] sm:$0xff] %v4458_v13  ;;  %1810 = vperm.xlu0 %3668, %v1075_v25   ;;  %1813 = vperm.xlu1 %3669, %v1076_v60   ;;  %v6280_v34 = vld [vmem:[#allocation78_spill] sm:$0xff] }
 0x4c5   :  { %v1080_v13 = vmul.f32 %v6280_v34, %v4118_v2  ;;  %v1083_v34 = vmul.f32 %v6287_v32, %v4128_v36  ;;  %v6295_v32 = vld [vmem:[#allocation85_spill] sm:$0xff] }
 0x4c7   :  { %v4464_v30 = vpop.permute.xlu0 %1630  ;;  %v4466_v12 = vpop.permute.xlu1 %1633 }
 0x4c8   :  { %6277 = vst [vmem:[#allocation141_spill] sm:$0xff] %v4464_v30  ;;  %6278 = vst [vmem:[#allocation142_spill] sm:$0xff] %v4466_v12  ;;  %1816 = vperm.xlu0 %3668, %v1077_v20   ;;  %1819 = vperm.xlu1 %3669, %v1078_v43   ;;  %v6284_v30 = vld [vmem:[#allocation80_spill] sm:$0xff] }
 0x4c9   :  { %v1082_v12 = vmul.f32 %v6284_v30, %v4124_v45  ;;  %v6291_v30 = vld [vmem:[#allocation83_spill] sm:$0xff] }
 0x4ca   :  { %v1085_v47 = vmul.f32 %v6291_v30, %v4116_v58 }
 0x4cb   :  { %v4472_v25 = vpop.permute.xlu0 %1636  ;;  %v4474_v60 = vpop.permute.xlu1 %1639 }
 0x4cc   :  { %6281 = vst [vmem:[#allocation143_spill] sm:$0xff] %v4472_v25  ;;  %6282 = vst [vmem:[#allocation144_spill] sm:$0xff] %v4474_v60  ;;  %1822 = vperm.xlu0 %3668, %v1079_v55   ;;  %1825 = vperm.xlu1 %3669, %v1080_v13   ;;  %v6288_v25 = vld [vmem:[#allocation82_spill] sm:$0xff] }
 0x4cd   :  { %v1084_v60 = vmul.f32 %v6288_v25, %v4118_v2  ;;  %v1087_v25 = vmul.f32 %v6295_v32, %v4128_v36 }
 0x4cf   :  { %v4480_v20 = vpop.permute.xlu0 %1642  ;;  %v4482_v43 = vpop.permute.xlu1 %1645 }
 0x4d0   :  { %6285 = vst [vmem:[#allocation145_spill] sm:$0xff] %v4480_v20  ;;  %6286 = vst [vmem:[#allocation146_spill] sm:$0xff] %v4482_v43  ;;  %1828 = vperm.xlu0 %3668, %v1081_v38   ;;  %1831 = vperm.xlu1 %3669, %v1082_v12   ;;  %v6292_v20 = vld [vmem:[#allocation84_spill] sm:$0xff] }
 0x4d1   :  { %v1086_v43 = vmul.f32 %v6292_v20, %v4124_v45  ;;  %v6298_v20 = vld [vmem:[#allocation87_spill] sm:$0xff] }
 0x4d2   :  { %v1089_v30 = vmul.f32 %v6298_v20, %v4116_v58  ;;  %v1093_v58 = vmul.f32 %v3773_v50, %v4244_v18  ;;  %v1097_v50 = vmul.f32 %v3810_v7, %v4244_v18  ;;  %v1102_v7 = vmul.f32 %v3793_v61, %v4256_v21 }
 0x4d3   :  { %v4488_v55 = vpop.permute.xlu0 %1648  ;;  %v4490_v13 = vpop.permute.xlu1 %1651  ;;  %v1105_v61 = vmul.f32 %v3833_v26, %v4244_v18  ;;  %v1110_v26 = vmul.f32 %v3807_v5, %v4256_v21  ;;  %v1113_v5 = vmul.f32 %v3862_v46, %v4244_v18  ;;  %v1118_v46 = vmul.f32 %v3823_v16, %v4256_v21 }
 0x4d4   :  { %6289 = vst [vmem:[#allocation147_spill] sm:$0xff] %v4488_v55  ;;  %6290 = vst [vmem:[#allocation148_spill] sm:$0xff] %v4490_v13  ;;  %1834 = vperm.xlu0 %3668, %v1083_v34   ;;  %1837 = vperm.xlu1 %3669, %v1084_v60   ;;  %v6296_v55 = vld [vmem:[#allocation86_spill] sm:$0xff]  ;;  %v1121_v16 = vmul.f32 %v3882_v6, %v4244_v18  ;;  %v1126_v6 = vmul.f32 %v3837_v29, %v4256_v21 }
 0x4d5   :  { %v1088_v13 = vmul.f32 %v6296_v55, %v4118_v2  ;;  %v6300_v2 = vld [vmem:[#allocation89_spill] sm:$0xff]  ;;  %v1129_v29 = vmul.f32 %v3898_v57, %v4244_v18  ;;  %v1134_v57 = vmul.f32 %v3858_v44, %v4256_v21 }
 0x4d6   :  { %v1091_v32 = vmul.f32 %v6300_v2, %v4128_v36  ;;  %v1096_v36 = vmul.f32 %v3778_v53, %v4238_v40  ;;  %v1099_v53 = vmul.f32 %v3816_v10, %v4250_v11  ;;  %v1104_v10 = vmul.f32 %v3796_v63, %v4238_v40  ;;  %v6340_v44 = vld [vmem:[#allocation21_spill] sm:$0xff]  ;;  %v6453_v2 = vld [vmem:[#allocation75_spill] sm:$0xff] }
 0x4d7   :  { %v4496_v38 = vpop.permute.xlu0 %1654  ;;  %v4498_v12 = vpop.permute.xlu1 %1657  ;;  %v1107_v63 = vmul.f32 %v3839_v31, %v4250_v11  ;;  %v1112_v31 = vmul.f32 %v3812_v8, %v4238_v40  ;;  %v1115_v8 = vmul.f32 %v3866_v48, %v4250_v11  ;;  %v1120_v48 = vmul.f32 %v3826_v19, %v4238_v40 }
 0x4d8   :  { %6293 = vst [vmem:[#allocation149_spill] sm:$0xff] %v4496_v38  ;;  %6294 = vst [vmem:[#allocation150_spill] sm:$0xff] %v4498_v12  ;;  %1840 = vperm.xlu0 %3668, %v1085_v47   ;;  %1843 = vperm.xlu1 %3669, %v1086_v43   ;;  %v6299_v38 = vld [vmem:[#allocation88_spill] sm:$0xff]  ;;  %v1123_v19 = vmul.f32 %v3886_v22, %v4250_v11  ;;  %v1127_v22 = vmul.f32 %v3894_v17, %v4250_v11 }
 0x4d9   :  { %v1090_v12 = vmul.f32 %v6299_v38, %v4124_v45  ;;  %v1094_v45 = vmul.f32 %v3776_v52, %v4256_v21  ;;  %v1098_v52 = vmul.f32 %v3782_v56, %v4256_v21  ;;  %v1101_v56 = vmul.f32 %v3821_v15, %v4244_v18 }
 0x4da   :  { %v1106_v15 = vmul.f32 %v3800_v1, %v4256_v21  ;;  %v1109_v1 = vmul.f32 %v3844_v37, %v4244_v18  ;;  %v1114_v37 = vmul.f32 %v3814_v9, %v4256_v21  ;;  %v1117_v9 = vmul.f32 %v3872_v54, %v4244_v18 }
 0x4db   :  { %v4504_v34 = vpop.permute.xlu0 %1660  ;;  %v4506_v60 = vpop.permute.xlu1 %1663  ;;  %v1122_v54 = vmul.f32 %v3830_v24, %v4256_v21  ;;  %v1125_v24 = vmul.f32 %v3890_v28, %v4244_v18  ;;  %v1130_v28 = vmul.f32 %v3846_v39, %v4256_v21  ;;  %v1132_v17 = vmul.f32 %v3849_v41, %v4238_v40 }
 0x4dc   :  { %6297 = vst [vmem:[#allocation86_spill] sm:$0xff] %v4506_v60  ;;  %1846 = vperm.xlu0 %3668, %v1087_v25   ;;  %1849 = vperm.xlu1 %3669, %v1088_v13   ;;  %v1092_v60 = vmul.f32 %v3798_v0, %v4238_v40  ;;  %v1095_v0 = vmul.f32 %v3805_v4, %v4250_v11 }
 0x4dd   :  { %v1100_v4 = vmul.f32 %v3787_v59, %v4238_v40  ;;  %v1103_v59 = vmul.f32 %v3828_v23, %v4250_v11  ;;  %v1108_v23 = vmul.f32 %v3803_v3, %v4238_v40  ;;  %v1111_v3 = vmul.f32 %v3851_v42, %v4250_v11 }
 0x4de   :  { %v1116_v42 = vmul.f32 %v3819_v14, %v4238_v40  ;;  %v1119_v14 = vmul.f32 %v3878_v62, %v4250_v11  ;;  %v1124_v62 = vmul.f32 %v3835_v27, %v4238_v40  ;;  %v1128_v27 = vmul.f32 %v3842_v35, %v4238_v40 }
 0x4df   :  { %v4512_v47 = vpop.permute.xlu0 %1666  ;;  %v4514_v43 = vpop.permute.xlu1 %1669  ;;  %v1131_v35 = vmul.f32 %v3914_v51, %v4250_v11  ;;  %v1133_v39 = vmul.f32 %v3920_v49, %v4244_v18  ;;  %v1135_v41 = vmul.f32 %v3926_v33, %v4250_v11  ;;  %v6337_v51 = vld [vmem:[#allocation6_spill] sm:$0xff]  ;;  %v1137_v49 = vmul.f32 %v6340_v44, %v4244_v18  ;;  %v6344_v33 = vld [vmem:[#allocation23_spill] sm:$0xff] }
 0x4e0   :  { %1852 = vperm.xlu0 %3668, %v1089_v30   ;;  %1855 = vperm.xlu1 %3669, %v1090_v12  }
 0x4e3   :  { %v4520_v25 = vpop.permute.xlu0 %1672  ;;  %v4522_v13 = vpop.permute.xlu1 %1675 }
 0x4e4   :  { %1858 = vperm.xlu0 %3668, %v1091_v32   ;;  %1861 = vperm.xlu1 %3669, %v1092_v60  }
 0x4e7   :  { %v4528_v30 = vpop.permute.xlu0 %1678  ;;  %v4530_v12 = vpop.permute.xlu1 %1681 }
 0x4e8   :  { %6301 = vst [vmem:[#allocation87_spill] sm:$0xff] %v4528_v30  ;;  %1864 = vperm.xlu0 %3668, %v1093_v58   ;;  %1867 = vperm.xlu1 %3669, %v1094_v45  }
 0x4eb   :  { %v4536_v32 = vpop.permute.xlu0 %1684  ;;  %v4538_v60 = vpop.permute.xlu1 %1687 }
 0x4ec   :  { %1870 = vperm.xlu0 %3668, %v1095_v0   ;;  %1873 = vperm.xlu1 %3669, %v1096_v36  }
 0x4ef   :  { %v4544_v58 = vpop.permute.xlu0 %1690  ;;  %v4546_v45 = vpop.permute.xlu1 %1693 }
 0x4f0   :  { %1876 = vperm.xlu0 %3668, %v1097_v50   ;;  %1879 = vperm.xlu1 %3669, %v1098_v52  }
 0x4f3   :  { %v4552_v0 = vpop.permute.xlu0 %1696  ;;  %v4554_v36 = vpop.permute.xlu1 %1699 }
 0x4f4   :  { %6302 = vst [vmem:[#allocation88_spill] sm:$0xff] %v4554_v36  ;;  %1882 = vperm.xlu0 %3668, %v1099_v53   ;;  %1885 = vperm.xlu1 %3669, %v1100_v4  }
 0x4f7   :  { %v4560_v50 = vpop.permute.xlu0 %1702  ;;  %v4562_v52 = vpop.permute.xlu1 %1705 }
 0x4f8   :  { %6303 = vst [vmem:[#allocation151_spill] sm:$0xff] %v4560_v50  ;;  %6304 = vst [vmem:[#allocation152_spill] sm:$0xff] %v4562_v52  ;;  %1888 = vperm.xlu0 %3668, %v1101_v56   ;;  %1891 = vperm.xlu1 %3669, %v1102_v7   ;;  %v6493_v52 = vld [vmem:[#allocation101_spill] sm:$0xff] }
 0x4fb   :  { %v4568_v53 = vpop.permute.xlu0 %1708  ;;  %v4570_v4 = vpop.permute.xlu1 %1711 }
 0x4fc   :  { %6305 = vst [vmem:[#allocation153_spill] sm:$0xff] %v4568_v53  ;;  %6306 = vst [vmem:[#allocation154_spill] sm:$0xff] %v4570_v4  ;;  %1894 = vperm.xlu0 %3668, %v1103_v59   ;;  %1897 = vperm.xlu1 %3669, %v1104_v10  }
 0x4ff   :  { %v4576_v56 = vpop.permute.xlu0 %1714  ;;  %v4578_v7 = vpop.permute.xlu1 %1717 }
 0x500   :  { %6307 = vst [vmem:[#allocation155_spill] sm:$0xff] %v4576_v56  ;;  %6308 = vst [vmem:[#allocation156_spill] sm:$0xff] %v4578_v7  ;;  %1900 = vperm.xlu0 %3668, %v1105_v61   ;;  %1903 = vperm.xlu1 %3669, %v1106_v15  }
 0x503   :  { %v4584_v59 = vpop.permute.xlu0 %1720  ;;  %v4586_v10 = vpop.permute.xlu1 %1723 }
 0x504   :  { %6309 = vst [vmem:[#allocation157_spill] sm:$0xff] %v4584_v59  ;;  %6310 = vst [vmem:[#allocation158_spill] sm:$0xff] %v4586_v10  ;;  %1906 = vperm.xlu0 %3668, %v1107_v63   ;;  %1909 = vperm.xlu1 %3669, %v1108_v23   ;;  %v6470_v10 = vld [vmem:[#allocation77_spill] sm:$0xff] }
 0x505   :  { %v4989_v4 = vmul.f32 %v6470_v10, %v4250_v11 }
 0x507   :  { %v4592_v61 = vpop.permute.xlu0 %1726  ;;  %v4594_v15 = vpop.permute.xlu1 %1729 }
 0x508   :  { %6311 = vst [vmem:[#allocation159_spill] sm:$0xff] %v4592_v61  ;;  %6312 = vst [vmem:[#allocation160_spill] sm:$0xff] %v4594_v15  ;;  %1912 = vperm.xlu0 %3668, %v1109_v1   ;;  %1915 = vperm.xlu1 %3669, %v1110_v26  }
 0x50b   :  { %v4600_v63 = vpop.permute.xlu0 %1732  ;;  %v4602_v23 = vpop.permute.xlu1 %1735 }
 0x50c   :  { %6313 = vst [vmem:[#allocation161_spill] sm:$0xff] %v4600_v63  ;;  %6314 = vst [vmem:[#allocation162_spill] sm:$0xff] %v4602_v23  ;;  %1918 = vperm.xlu0 %3668, %v1111_v3   ;;  %1921 = vperm.xlu1 %3669, %v1112_v31   ;;  %v6463_v63 = vld [vmem:[#allocation96_spill] sm:$0xff] }
 0x50f   :  { %v4608_v1 = vpop.permute.xlu0 %1738  ;;  %v4610_v26 = vpop.permute.xlu1 %1741 }
 0x510   :  { %6315 = vst [vmem:[#allocation163_spill] sm:$0xff] %v4608_v1  ;;  %6316 = vst [vmem:[#allocation164_spill] sm:$0xff] %v4610_v26  ;;  %1924 = vperm.xlu0 %3668, %v1113_v5   ;;  %1927 = vperm.xlu1 %3669, %v1114_v37   ;;  %v6455_v1 = vld [vmem:[#allocation2_spill] sm:$0xff] }
 0x513   :  { %v4616_v3 = vpop.permute.xlu0 %1744  ;;  %v4618_v31 = vpop.permute.xlu1 %1747 }
 0x514   :  { %6317 = vst [vmem:[#allocation165_spill] sm:$0xff] %v4616_v3  ;;  %6318 = vst [vmem:[#allocation166_spill] sm:$0xff] %v4618_v31  ;;  %1930 = vperm.xlu0 %3668, %v1115_v8   ;;  %1933 = vperm.xlu1 %3669, %v1116_v42   ;;  %v6456_v31 = vld [vmem:[#allocation90_spill] sm:$0xff] }
 0x515   :  { %v2247_v23 = vrot.slane %v6456_v31, %v6455_v1 }
 0x517   :  { %v4624_v5 = vpop.permute.xlu0 %1750  ;;  %v4626_v37 = vpop.permute.xlu1 %1753 }
 0x518   :  { %6319 = vst [vmem:[#allocation167_spill] sm:$0xff] %v4624_v5  ;;  %6320 = vst [vmem:[#allocation168_spill] sm:$0xff] %v4626_v37  ;;  %1936 = vperm.xlu0 %3668, %v1117_v9   ;;  %1939 = vperm.xlu1 %3669, %v1118_v46   ;;  %v6454_v5 = vld [vmem:[#allocation91_spill] sm:$0xff] }
 0x51b   :  { %v4632_v8 = vpop.permute.xlu0 %1756  ;;  %v4634_v42 = vpop.permute.xlu1 %1759 }
 0x51c   :  { %6321 = vst [vmem:[#allocation169_spill] sm:$0xff] %v4632_v8  ;;  %6322 = vst [vmem:[#allocation170_spill] sm:$0xff] %v4634_v42  ;;  %1942 = vperm.xlu0 %3668, %v1119_v14   ;;  %1945 = vperm.xlu1 %3669, %v1120_v48  }
 0x51f   :  { %v4640_v9 = vpop.permute.xlu0 %1762  ;;  %v4642_v46 = vpop.permute.xlu1 %1765 }
 0x520   :  { %6323 = vst [vmem:[#allocation171_spill] sm:$0xff] %v4640_v9  ;;  %6324 = vst [vmem:[#allocation172_spill] sm:$0xff] %v4642_v46  ;;  %1948 = vperm.xlu0 %3668, %v1121_v16   ;;  %1951 = vperm.xlu1 %3669, %v1122_v54   ;;  %v1136_v9 = vmul.f32 %v6337_v51, %v4238_v40  ;;  %v1139_v51 = vmul.f32 %v6344_v33, %v4250_v11 }
 0x523   :  { %v4648_v14 = vpop.permute.xlu0 %1768  ;;  %v4650_v48 = vpop.permute.xlu1 %1771 }
 0x524   :  { %6325 = vst [vmem:[#allocation173_spill] sm:$0xff] %v4648_v14  ;;  %6326 = vst [vmem:[#allocation174_spill] sm:$0xff] %v4650_v48  ;;  %1954 = vperm.xlu0 %3668, %v1123_v19   ;;  %1957 = vperm.xlu1 %3669, %v1124_v62  }
 0x527   :  { %v4656_v16 = vpop.permute.xlu0 %1774  ;;  %v4658_v54 = vpop.permute.xlu1 %1777 }
 0x528   :  { %6327 = vst [vmem:[#allocation175_spill] sm:$0xff] %v4656_v16  ;;  %6328 = vst [vmem:[#allocation176_spill] sm:$0xff] %v4658_v54  ;;  %1960 = vperm.xlu0 %3668, %v1125_v24   ;;  %1963 = vperm.xlu1 %3669, %v1126_v6   ;;  %v6341_v16 = vld [vmem:[#allocation7_spill] sm:$0xff] }
 0x529   :  { %v6446_v54 = vld [vmem:[#allocation95_spill] sm:$0xff] }
 0x52b   :  { %v4664_v19 = vpop.permute.xlu0 %1780  ;;  %v4666_v62 = vpop.permute.xlu1 %1783 }
 0x52c   :  { %6329 = vst [vmem:[#allocation177_spill] sm:$0xff] %v4664_v19  ;;  %6330 = vst [vmem:[#allocation178_spill] sm:$0xff] %v4666_v62  ;;  %1966 = vperm.xlu0 %3668, %v1127_v22   ;;  %1969 = vperm.xlu1 %3669, %v1128_v27  }
 0x52f   :  { %v4672_v24 = vpop.permute.xlu0 %1786  ;;  %v4674_v6 = vpop.permute.xlu1 %1789 }
 0x530   :  { %6331 = vst [vmem:[#allocation179_spill] sm:$0xff] %v4672_v24  ;;  %6332 = vst [vmem:[#allocation180_spill] sm:$0xff] %v4674_v6  ;;  %1972 = vperm.xlu0 %3668, %v1129_v29   ;;  %1975 = vperm.xlu1 %3669, %v1130_v28   ;;  %v6441_v6 = vld [vmem:[#allocation52_spill] sm:$0xff] }
 0x533   :  { %v4680_v22 = vpop.permute.xlu0 %1792  ;;  %v4682_v27 = vpop.permute.xlu1 %1795 }
 0x534   :  { %6333 = vst [vmem:[#allocation181_spill] sm:$0xff] %v4680_v22  ;;  %6334 = vst [vmem:[#allocation182_spill] sm:$0xff] %v4682_v27  ;;  %1978 = vperm.xlu0 %3668, %v1131_v35   ;;  %1981 = vperm.xlu1 %3669, %v1132_v17  }
 0x537   :  { %v4688_v29 = vpop.permute.xlu0 %1798  ;;  %v4690_v28 = vpop.permute.xlu1 %1801 }
 0x538   :  { %6335 = vst [vmem:[#allocation183_spill] sm:$0xff] %v4688_v29  ;;  %6336 = vst [vmem:[#allocation184_spill] sm:$0xff] %v4690_v28  ;;  %1984 = vperm.xlu0 %3668, %v1133_v39   ;;  %1987 = vperm.xlu1 %3669, %v1134_v57   ;;  %v1138_v28 = vmul.f32 %v6341_v16, %v4256_v21  ;;  %v6345_v29 = vld [vmem:[#allocation8_spill] sm:$0xff]  ;;  %v6348_v16 = vld [vmem:[#allocation25_spill] sm:$0xff] }
 0x539   :  { %v1141_v44 = vmul.f32 %v6348_v16, %v4244_v18 }
 0x53b   :  { %v4696_v35 = vpop.permute.xlu0 %1804  ;;  %v4698_v17 = vpop.permute.xlu1 %1807 }
 0x53c   :  { %6338 = vst [vmem:[#allocation6_spill] sm:$0xff] %v4696_v35  ;;  %6339 = vst [vmem:[#allocation185_spill] sm:$0xff] %v4698_v17  ;;  %1990 = vperm.xlu0 %3668, %v1135_v41   ;;  %1993 = vperm.xlu1 %3669, %v1136_v9   ;;  %v1140_v17 = vmul.f32 %v6345_v29, %v4238_v40  ;;  %v6352_v29 = vld [vmem:[#allocation27_spill] sm:$0xff] }
 0x53d   :  { %v1143_v33 = vmul.f32 %v6352_v29, %v4250_v11 }
 0x53f   :  { %v4704_v39 = vpop.permute.xlu0 %1810  ;;  %v4706_v57 = vpop.permute.xlu1 %1813 }
 0x540   :  { %6342 = vst [vmem:[#allocation21_spill] sm:$0xff] %v4704_v39  ;;  %6343 = vst [vmem:[#allocation7_spill] sm:$0xff] %v4706_v57  ;;  %1996 = vperm.xlu0 %3668, %v1137_v49   ;;  %1999 = vperm.xlu1 %3669, %v1138_v28   ;;  %v6349_v39 = vld [vmem:[#allocation9_spill] sm:$0xff] }
 0x541   :  { %v1142_v57 = vmul.f32 %v6349_v39, %v4256_v21  ;;  %v6356_v39 = vld [vmem:[#allocation29_spill] sm:$0xff] }
 0x542   :  { %v1145_v16 = vmul.f32 %v6356_v39, %v4244_v18 }
 0x543   :  { %v4712_v41 = vpop.permute.xlu0 %1816  ;;  %v4714_v9 = vpop.permute.xlu1 %1819 }
 0x544   :  { %6346 = vst [vmem:[#allocation23_spill] sm:$0xff] %v4712_v41  ;;  %6347 = vst [vmem:[#allocation8_spill] sm:$0xff] %v4714_v9  ;;  %2002 = vperm.xlu0 %3668, %v1139_v51   ;;  %2005 = vperm.xlu1 %3669, %v1140_v17   ;;  %v6353_v41 = vld [vmem:[#allocation10_spill] sm:$0xff] }
 0x545   :  { %v1144_v9 = vmul.f32 %v6353_v41, %v4238_v40  ;;  %v6360_v41 = vld [vmem:[#allocation31_spill] sm:$0xff] }
 0x546   :  { %v1147_v29 = vmul.f32 %v6360_v41, %v4250_v11 }
 0x547   :  { %v4720_v49 = vpop.permute.xlu0 %1822  ;;  %v4722_v28 = vpop.permute.xlu1 %1825 }
 0x548   :  { %6350 = vst [vmem:[#allocation25_spill] sm:$0xff] %v4720_v49  ;;  %6351 = vst [vmem:[#allocation9_spill] sm:$0xff] %v4722_v28  ;;  %2008 = vperm.xlu0 %3668, %v1141_v44   ;;  %2011 = vperm.xlu1 %3669, %v1142_v57   ;;  %v6357_v49 = vld [vmem:[#allocation11_spill] sm:$0xff] }
 0x549   :  { %v1146_v28 = vmul.f32 %v6357_v49, %v4256_v21  ;;  %v6364_v49 = vld [vmem:[#allocation33_spill] sm:$0xff] }
 0x54a   :  { %v1149_v39 = vmul.f32 %v6364_v49, %v4244_v18 }
 0x54b   :  { %v4728_v51 = vpop.permute.xlu0 %1828  ;;  %v4730_v17 = vpop.permute.xlu1 %1831 }
 0x54c   :  { %6354 = vst [vmem:[#allocation27_spill] sm:$0xff] %v4728_v51  ;;  %6355 = vst [vmem:[#allocation10_spill] sm:$0xff] %v4730_v17  ;;  %2014 = vperm.xlu0 %3668, %v1143_v33   ;;  %2017 = vperm.xlu1 %3669, %v1144_v9   ;;  %v6361_v51 = vld [vmem:[#allocation12_spill] sm:$0xff] }
 0x54d   :  { %v1148_v17 = vmul.f32 %v6361_v51, %v4238_v40  ;;  %v6368_v51 = vld [vmem:[#allocation35_spill] sm:$0xff] }
 0x54e   :  { %v1151_v41 = vmul.f32 %v6368_v51, %v4250_v11 }
 0x54f   :  { %v4736_v44 = vpop.permute.xlu0 %1834  ;;  %v4738_v57 = vpop.permute.xlu1 %1837 }
 0x550   :  { %6358 = vst [vmem:[#allocation29_spill] sm:$0xff] %v4736_v44  ;;  %6359 = vst [vmem:[#allocation11_spill] sm:$0xff] %v4738_v57  ;;  %2020 = vperm.xlu0 %3668, %v1145_v16   ;;  %2023 = vperm.xlu1 %3669, %v1146_v28   ;;  %v6365_v44 = vld [vmem:[#allocation13_spill] sm:$0xff] }
 0x551   :  { %v1150_v57 = vmul.f32 %v6365_v44, %v4256_v21  ;;  %v6372_v44 = vld [vmem:[#allocation37_spill] sm:$0xff] }
 0x552   :  { %v1153_v49 = vmul.f32 %v6372_v44, %v4244_v18 }
 0x553   :  { %v4744_v33 = vpop.permute.xlu0 %1840  ;;  %v4746_v9 = vpop.permute.xlu1 %1843 }
 0x554   :  { %6362 = vst [vmem:[#allocation31_spill] sm:$0xff] %v4744_v33  ;;  %6363 = vst [vmem:[#allocation12_spill] sm:$0xff] %v4746_v9  ;;  %2026 = vperm.xlu0 %3668, %v1147_v29   ;;  %2029 = vperm.xlu1 %3669, %v1148_v17   ;;  %v6369_v33 = vld [vmem:[#allocation14_spill] sm:$0xff] }
 0x555   :  { %v1152_v9 = vmul.f32 %v6369_v33, %v4238_v40  ;;  %v6376_v33 = vld [vmem:[#allocation39_spill] sm:$0xff] }
 0x556   :  { %v1155_v51 = vmul.f32 %v6376_v33, %v4250_v11 }
 0x557   :  { %v4752_v16 = vpop.permute.xlu0 %1846  ;;  %v4754_v28 = vpop.permute.xlu1 %1849 }
 0x558   :  { %6366 = vst [vmem:[#allocation33_spill] sm:$0xff] %v4752_v16  ;;  %6367 = vst [vmem:[#allocation13_spill] sm:$0xff] %v4754_v28  ;;  %2032 = vperm.xlu0 %3668, %v1149_v39   ;;  %2035 = vperm.xlu1 %3669, %v1150_v57   ;;  %v6373_v16 = vld [vmem:[#allocation15_spill] sm:$0xff] }
 0x559   :  { %v1154_v28 = vmul.f32 %v6373_v16, %v4256_v21  ;;  %v6380_v16 = vld [vmem:[#allocation41_spill] sm:$0xff] }
 0x55a   :  { %v1157_v44 = vmul.f32 %v6380_v16, %v4244_v18 }
 0x55b   :  { %v4760_v29 = vpop.permute.xlu0 %1852  ;;  %v4762_v17 = vpop.permute.xlu1 %1855 }
 0x55c   :  { %6370 = vst [vmem:[#allocation35_spill] sm:$0xff] %v4760_v29  ;;  %6371 = vst [vmem:[#allocation14_spill] sm:$0xff] %v4762_v17  ;;  %2038 = vperm.xlu0 %3668, %v1151_v41   ;;  %2041 = vperm.xlu1 %3669, %v1152_v9   ;;  %v6377_v29 = vld [vmem:[#allocation16_spill] sm:$0xff] }
 0x55d   :  { %v1156_v17 = vmul.f32 %v6377_v29, %v4238_v40  ;;  %v6384_v29 = vld [vmem:[#allocation43_spill] sm:$0xff] }
 0x55e   :  { %v1159_v33 = vmul.f32 %v6384_v29, %v4250_v11 }
 0x55f   :  { %v4768_v39 = vpop.permute.xlu0 %1858  ;;  %v4770_v57 = vpop.permute.xlu1 %1861 }
 0x560   :  { %6374 = vst [vmem:[#allocation37_spill] sm:$0xff] %v4768_v39  ;;  %6375 = vst [vmem:[#allocation15_spill] sm:$0xff] %v4770_v57  ;;  %2044 = vperm.xlu0 %3668, %v1153_v49   ;;  %2047 = vperm.xlu1 %3669, %v1154_v28   ;;  %v6381_v39 = vld [vmem:[#allocation17_spill] sm:$0xff] }
 0x561   :  { %v1158_v57 = vmul.f32 %v6381_v39, %v4256_v21  ;;  %v6388_v39 = vld [vmem:[#allocation45_spill] sm:$0xff] }
 0x562   :  { %v1161_v16 = vmul.f32 %v6388_v39, %v4244_v18 }
 0x563   :  { %v4776_v41 = vpop.permute.xlu0 %1864  ;;  %v4778_v9 = vpop.permute.xlu1 %1867 }
 0x564   :  { %6378 = vst [vmem:[#allocation39_spill] sm:$0xff] %v4776_v41  ;;  %6379 = vst [vmem:[#allocation16_spill] sm:$0xff] %v4778_v9  ;;  %2050 = vperm.xlu0 %3668, %v1155_v51   ;;  %2053 = vperm.xlu1 %3669, %v1156_v17   ;;  %v6385_v41 = vld [vmem:[#allocation18_spill] sm:$0xff] }
 0x565   :  { %v1160_v9 = vmul.f32 %v6385_v41, %v4238_v40  ;;  %v6392_v41 = vld [vmem:[#allocation47_spill] sm:$0xff] }
 0x566   :  { %v1163_v29 = vmul.f32 %v6392_v41, %v4250_v11 }
 0x567   :  { %v4784_v49 = vpop.permute.xlu0 %1870  ;;  %v4786_v28 = vpop.permute.xlu1 %1873 }
 0x568   :  { %6382 = vst [vmem:[#allocation41_spill] sm:$0xff] %v4784_v49  ;;  %6383 = vst [vmem:[#allocation17_spill] sm:$0xff] %v4786_v28  ;;  %2056 = vperm.xlu0 %3668, %v1157_v44   ;;  %2059 = vperm.xlu1 %3669, %v1158_v57   ;;  %v6389_v49 = vld [vmem:[#allocation19_spill] sm:$0xff] }
 0x569   :  { %v1162_v28 = vmul.f32 %v6389_v49, %v4256_v21  ;;  %v6396_v49 = vld [vmem:[#allocation49_spill] sm:$0xff] }
 0x56a   :  { %v1165_v39 = vmul.f32 %v6396_v49, %v4244_v18 }
 0x56b   :  { %v4792_v51 = vpop.permute.xlu0 %1876  ;;  %v4794_v17 = vpop.permute.xlu1 %1879 }
 0x56c   :  { %6386 = vst [vmem:[#allocation43_spill] sm:$0xff] %v4792_v51  ;;  %6387 = vst [vmem:[#allocation18_spill] sm:$0xff] %v4794_v17  ;;  %2062 = vperm.xlu0 %3668, %v1159_v33   ;;  %2065 = vperm.xlu1 %3669, %v1160_v9   ;;  %v6393_v51 = vld [vmem:[#allocation20_spill] sm:$0xff] }
 0x56d   :  { %v1164_v17 = vmul.f32 %v6393_v51, %v4238_v40  ;;  %v6400_v51 = vld [vmem:[#allocation51_spill] sm:$0xff] }
 0x56e   :  { %v1167_v41 = vmul.f32 %v6400_v51, %v4250_v11 }
 0x56f   :  { %v4800_v44 = vpop.permute.xlu0 %1882  ;;  %v4802_v57 = vpop.permute.xlu1 %1885 }
 0x570   :  { %6390 = vst [vmem:[#allocation45_spill] sm:$0xff] %v4800_v44  ;;  %6391 = vst [vmem:[#allocation19_spill] sm:$0xff] %v4802_v57  ;;  %2068 = vperm.xlu0 %3668, %v1161_v16   ;;  %2071 = vperm.xlu1 %3669, %v1162_v28   ;;  %v6397_v44 = vld [vmem:[#allocation22_spill] sm:$0xff] }
 0x571   :  { %v1166_v57 = vmul.f32 %v6397_v44, %v4256_v21  ;;  %v6404_v44 = vld [vmem:[#allocation53_spill] sm:$0xff] }
 0x572   :  { %v1169_v49 = vmul.f32 %v6404_v44, %v4244_v18 }
 0x573   :  { %v4808_v33 = vpop.permute.xlu0 %1888  ;;  %v4810_v9 = vpop.permute.xlu1 %1891 }
 0x574   :  { %6394 = vst [vmem:[#allocation47_spill] sm:$0xff] %v4808_v33  ;;  %6395 = vst [vmem:[#allocation20_spill] sm:$0xff] %v4810_v9  ;;  %2074 = vperm.xlu0 %3668, %v1163_v29   ;;  %2077 = vperm.xlu1 %3669, %v1164_v17   ;;  %v6401_v33 = vld [vmem:[#allocation24_spill] sm:$0xff] }
 0x575   :  { %v1168_v9 = vmul.f32 %v6401_v33, %v4238_v40  ;;  %v6408_v33 = vld [vmem:[#allocation55_spill] sm:$0xff] }
 0x576   :  { %v1171_v51 = vmul.f32 %v6408_v33, %v4250_v11 }
 0x577   :  { %v4816_v16 = vpop.permute.xlu0 %1894  ;;  %v4818_v28 = vpop.permute.xlu1 %1897 }
 0x578   :  { %6398 = vst [vmem:[#allocation49_spill] sm:$0xff] %v4816_v16  ;;  %6399 = vst [vmem:[#allocation22_spill] sm:$0xff] %v4818_v28  ;;  %2080 = vperm.xlu0 %3668, %v1165_v39   ;;  %2083 = vperm.xlu1 %3669, %v1166_v57   ;;  %v6405_v16 = vld [vmem:[#allocation26_spill] sm:$0xff] }
 0x579   :  { %v1170_v28 = vmul.f32 %v6405_v16, %v4256_v21  ;;  %v6412_v16 = vld [vmem:[#allocation56_spill] sm:$0xff] }
 0x57a   :  { %v1173_v44 = vmul.f32 %v6412_v16, %v4244_v18 }
 0x57b   :  { %v4824_v29 = vpop.permute.xlu0 %1900  ;;  %v4826_v17 = vpop.permute.xlu1 %1903 }
 0x57c   :  { %6402 = vst [vmem:[#allocation51_spill] sm:$0xff] %v4824_v29  ;;  %6403 = vst [vmem:[#allocation24_spill] sm:$0xff] %v4826_v17  ;;  %2086 = vperm.xlu0 %3668, %v1167_v41   ;;  %2089 = vperm.xlu1 %3669, %v1168_v9   ;;  %v6409_v29 = vld [vmem:[#allocation28_spill] sm:$0xff] }
 0x57d   :  { %v1172_v17 = vmul.f32 %v6409_v29, %v4238_v40  ;;  %v6416_v29 = vld [vmem:[#allocation57_spill] sm:$0xff] }
 0x57e   :  { %v1175_v33 = vmul.f32 %v6416_v29, %v4250_v11 }
 0x57f   :  { %v4832_v39 = vpop.permute.xlu0 %1906  ;;  %v4834_v57 = vpop.permute.xlu1 %1909 }
 0x580   :  { %6406 = vst [vmem:[#allocation53_spill] sm:$0xff] %v4832_v39  ;;  %6407 = vst [vmem:[#allocation26_spill] sm:$0xff] %v4834_v57  ;;  %2092 = vperm.xlu0 %3668, %v1169_v49   ;;  %2095 = vperm.xlu1 %3669, %v1170_v28   ;;  %v6413_v39 = vld [vmem:[#allocation30_spill] sm:$0xff] }
 0x581   :  { %v1174_v57 = vmul.f32 %v6413_v39, %v4256_v21  ;;  %v6420_v39 = vld [vmem:[#allocation58_spill] sm:$0xff] }
 0x582   :  { %v1177_v16 = vmul.f32 %v6420_v39, %v4244_v18 }
 0x583   :  { %v4840_v41 = vpop.permute.xlu0 %1912  ;;  %v4842_v9 = vpop.permute.xlu1 %1915 }
 0x584   :  { %6410 = vst [vmem:[#allocation55_spill] sm:$0xff] %v4840_v41  ;;  %6411 = vst [vmem:[#allocation28_spill] sm:$0xff] %v4842_v9  ;;  %2098 = vperm.xlu0 %3668, %v1171_v51   ;;  %2101 = vperm.xlu1 %3669, %v1172_v17   ;;  %v6417_v41 = vld [vmem:[#allocation32_spill] sm:$0xff] }
 0x585   :  { %v1176_v9 = vmul.f32 %v6417_v41, %v4238_v40  ;;  %v6424_v41 = vld [vmem:[#allocation59_spill] sm:$0xff] }
 0x586   :  { %v1179_v29 = vmul.f32 %v6424_v41, %v4250_v11  ;;  %v6431_v41 = vld [vmem:[#allocation40_spill] sm:$0xff] }
 0x587   :  { %v4848_v49 = vpop.permute.xlu0 %1918  ;;  %v4850_v28 = vpop.permute.xlu1 %1921  ;;  %v1184_v24 = vmul.f32 %v6431_v41, %v4238_v40  ;;  %v6438_v41 = vld [vmem:[#allocation66_spill] sm:$0xff] }
 0x588   :  { %6414 = vst [vmem:[#allocation56_spill] sm:$0xff] %v4848_v49  ;;  %6415 = vst [vmem:[#allocation30_spill] sm:$0xff] %v4850_v28  ;;  %2104 = vperm.xlu0 %3668, %v1173_v44   ;;  %2107 = vperm.xlu1 %3669, %v1174_v57   ;;  %v6421_v49 = vld [vmem:[#allocation34_spill] sm:$0xff]  ;;  %v4902_v48 = vmul.f32 %v6438_v41, %v4244_v18  ;;  %v6443_v41 = vld [vmem:[#allocation65_spill] sm:$0xff] }
 0x589   :  { %v1178_v28 = vmul.f32 %v6421_v49, %v4256_v21  ;;  %v6428_v49 = vld [vmem:[#allocation60_spill] sm:$0xff]  ;;  %v4922_v46 = vmul.f32 %v6443_v41, %v4250_v11  ;;  %v6450_v41 = vld [vmem:[#allocation69_spill] sm:$0xff]  ;;  %6471 = vst [vmem:[#allocation66_spill] sm:$0xff] %v4989_v4 }
 0x58a   :  { %v1181_v39 = vmul.f32 %v6428_v49, %v4244_v18  ;;  %v6435_v49 = vld [vmem:[#allocation48_spill] sm:$0xff]  ;;  %v4944_v37 = vmul.f32 %v6450_v41, %v4250_v11  ;;  %v6457_v41 = vld [vmem:[#allocation94_spill] sm:$0xff]  ;;  %v6482_v4 = vld [vmem:[#allocation5_spill] sm:$0xff] }
 0x58b   :  { %v4856_v51 = vpop.permute.xlu0 %1924  ;;  %v4858_v17 = vpop.permute.xlu1 %1927  ;;  %v4894_v62 = vmul.f32 %v6435_v49, %v4238_v40  ;;  %v4914_v49 = vmul.f32 %v6441_v6, %v4238_v40  ;;  %v6447_v6 = vld [vmem:[#allocation54_spill] sm:$0xff]  ;;  %v2272_v26 = vrot.slane %v6457_v41, %v6455_v1  ;;  %v2305_v50 = vrot.slane %v6493_v52, %v6482_v4 }
 0x58c   :  { %6418 = vst [vmem:[#allocation57_spill] sm:$0xff] %v4856_v51  ;;  %6419 = vst [vmem:[#allocation32_spill] sm:$0xff] %v4858_v17  ;;  %2110 = vperm.xlu0 %3668, %v1175_v33   ;;  %2113 = vperm.xlu1 %3669, %v1176_v9   ;;  %v6425_v51 = vld [vmem:[#allocation36_spill] sm:$0xff]  ;;  %v4932_v8 = vmul.f32 %v6447_v6, %v4256_v21  ;;  %v6466_v41 = vld [vmem:[#allocation78_spill] sm:$0xff] }
 0x58d   :  { %v1180_v17 = vmul.f32 %v6425_v51, %v4238_v40  ;;  %v6432_v51 = vld [vmem:[#allocation62_spill] sm:$0xff]  ;;  %v4980_v56 = vmul.f32 %v6466_v41, %v4238_v40 }
 0x58e   :  { %v6475_v41 = vld [vmem:[#allocation82_spill] sm:$0xff] }
 0x58f   :  { %v4864_v44 = vpop.permute.xlu0 %1930  ;;  %v4866_v57 = vpop.permute.xlu1 %1933 }
 0x590   :  { %6422 = vst [vmem:[#allocation58_spill] sm:$0xff] %v4864_v44  ;;  %6423 = vst [vmem:[#allocation34_spill] sm:$0xff] %v4866_v57  ;;  %2116 = vperm.xlu0 %3668, %v1177_v16   ;;  %2119 = vperm.xlu1 %3669, %v1178_v28   ;;  %v6429_v44 = vld [vmem:[#allocation38_spill] sm:$0xff]  ;;  %v6430_v28 = vld [vmem:[#allocation61_spill] sm:$0xff] }
 0x591   :  { %v1182_v16 = vmul.f32 %v6429_v44, %v4256_v21  ;;  %v1183_v57 = vmul.f32 %v6430_v28, %v4250_v11 }
 0x593   :  { %v4872_v33 = vpop.permute.xlu0 %1936  ;;  %v4874_v9 = vpop.permute.xlu1 %1939 }
 0x594   :  { %6426 = vst [vmem:[#allocation59_spill] sm:$0xff] %v4872_v33  ;;  %6427 = vst [vmem:[#allocation36_spill] sm:$0xff] %v4874_v9  ;;  %2122 = vperm.xlu0 %3668, %v1179_v29   ;;  %2125 = vperm.xlu1 %3669, %v1180_v17   ;;  %v1185_v33 = vmul.f32 %v6432_v51, %v4244_v18  ;;  %v6433_v9 = vld [vmem:[#allocation44_spill] sm:$0xff]  ;;  %v6439_v51 = vld [vmem:[#allocation46_spill] sm:$0xff] }
 0x595   :  { %v1188_v27 = vmul.f32 %v6433_v9, %v4238_v40  ;;  %v6434_v17 = vld [vmem:[#allocation64_spill] sm:$0xff]  ;;  %v4906_v35 = vmul.f32 %v6439_v51, %v4256_v21  ;;  %v6440_v9 = vld [vmem:[#allocation50_spill] sm:$0xff]  ;;  %v6444_v51 = vld [vmem:[#allocation67_spill] sm:$0xff] }
 0x596   :  { %v4890_v29 = vmul.f32 %v6434_v17, %v4244_v18  ;;  %v4910_v17 = vmul.f32 %v6440_v9, %v4256_v21  ;;  %v4926_v42 = vmul.f32 %v6444_v51, %v4250_v11  ;;  %v6445_v9 = vld [vmem:[#allocation3_spill] sm:$0xff]  ;;  %v6451_v51 = vld [vmem:[#allocation72_spill] sm:$0xff]  ;;  %6467 = vst [vmem:[#allocation64_spill] sm:$0xff] %v4980_v56  ;;  %v4999_v56 = vmul.f32 %v6475_v41, %v4238_v40 }
 0x597   :  { %v4896_v44 = vpop.permute.xlu0 %1942  ;;  %v4898_v28 = vpop.permute.xlu1 %1945  ;;  %v2276_v14 = vrot.slane %v6446_v54, %v6445_v9  ;;  %v4948_v19 = vmul.f32 %v6451_v51, %v4256_v21  ;;  %v6452_v54 = vld [vmem:[#allocation74_spill] sm:$0xff] }
 0x598   :  { %6436 = vst [vmem:[#allocation60_spill] sm:$0xff] %v4896_v44  ;;  %6437 = vst [vmem:[#allocation38_spill] sm:$0xff] %v4898_v28  ;;  %2128 = vperm.xlu0 %3668, %v1181_v39   ;;  %2131 = vperm.xlu1 %3669, %v1182_v16   ;;  %v6442_v44 = vld [vmem:[#allocation68_spill] sm:$0xff]  ;;  %v6448_v39 = vld [vmem:[#allocation70_spill] sm:$0xff]  ;;  %v4952_v6 = vmul.f32 %v6452_v54, %v4238_v40 }
 0x599   :  { %v4918_v28 = vmul.f32 %v6442_v44, %v4244_v18  ;;  %v4936_v16 = vmul.f32 %v6448_v39, %v4238_v40  ;;  %v6449_v44 = vld [vmem:[#allocation71_spill] sm:$0xff]  ;;  %v4956_v39 = vmul.f32 %v6453_v2, %v4244_v18  ;;  %v6460_v54 = vld [vmem:[#allocation73_spill] sm:$0xff]  ;;  %v6462_v2 = vld [vmem:[#allocation4_spill] sm:$0xff]  ;;  %6476 = vst [vmem:[#allocation50_spill] sm:$0xff] %v4999_v56 }
 0x59a   :  { %v4940_v22 = vmul.f32 %v6449_v44, %v4244_v18  ;;  %v2252_v44 = vrot.slane %v6454_v5, %v6445_v9  ;;  %v4970_v3 = vmul.f32 %v6460_v54, %v4250_v11  ;;  %v2281_v61 = vrot.slane %v6463_v63, %v6462_v2  ;;  %v6464_v5 = vld [vmem:[#allocation76_spill] sm:$0xff] }
 0x59b   :  { %v4964_v15 = vpop.permute.xlu0 %1948  ;;  %v4966_v51 = vpop.permute.xlu1 %1951  ;;  %v4976_v31 = vmul.f32 %v6464_v5, %v4256_v21  ;;  %v6472_v63 = vld [vmem:[#allocation80_spill] sm:$0xff] }
 0x59c   :  { %6458 = vst [vmem:[#allocation61_spill] sm:$0xff] %v4964_v15  ;;  %6459 = vst [vmem:[#allocation40_spill] sm:$0xff] %v4966_v51  ;;  %2134 = vperm.xlu0 %3668, %v1183_v57   ;;  %2137 = vperm.xlu1 %3669, %v1184_v24   ;;  %v2277_v51 = vsel %vm2253_vm4, %v2276_v14, %v2272_v26  ;;  %v6468_v15 = vld [vmem:[#allocation79_spill] sm:$0xff]  ;;  %v4993_v24 = vmul.f32 %v6472_v63, %v4256_v21  ;;  %v6481_v63 = vld [vmem:[#allocation92_spill] sm:$0xff] }
 0x59d   :  { %6461 = vst [vmem:[#allocation62_spill] sm:$0xff] %v4970_v3  ;;  %6465 = vst [vmem:[#allocation44_spill] sm:$0xff] %v4976_v31  ;;  %v4985_v54 = vmul.f32 %v6468_v15, %v4244_v18  ;;  %v6474_v57 = vld [vmem:[#allocation99_spill] sm:$0xff]  ;;  %v6479_v15 = vld [vmem:[#allocation42_spill] sm:$0xff]  ;;  %v2254_v10 = vsel %vm2253_vm4, %v2252_v44, %v2247_v23 }
 0x59e   :  { %6473 = vst [vmem:[#allocation46_spill] sm:$0xff] %v4993_v24  ;;  %v2295_v5 = vrot.slane %v6474_v57, %v6445_v9  ;;  %v6477_v26 = vld [vmem:[#allocation83_spill] sm:$0xff]  ;;  %v2259_v24 = vrot.slane %v6481_v63, %v6462_v2  ;;  %v6483_v31 = vld [vmem:[#allocation93_spill] sm:$0xff] }
 0x59f   :  { %6469 = vst [vmem:[#allocation48_spill] sm:$0xff] %v4985_v54  ;;  %v5003_v14 = vmul.f32 %v6477_v26, %v4244_v18  ;;  %v5007_v54 = vmul.f32 %v6479_v15, %v4256_v21  ;;  %v2266_v57 = vrot.slane %v6483_v31, %v6482_v4  ;;  %v6484_v3 = vld [vmem:[#allocation103_spill] sm:$0xff]  ;;  %v5016_v56 = vpop.permute.xlu0 %1954  ;;  %v5018_v7 = vpop.permute.xlu1 %1957  ;;  %v2282_v26 = vsel %vm2260_vm5, %v2281_v61, %v2277_v51  ;;  %v6487_v15 = vld [vmem:[#allocation98_spill] sm:$0xff]  ;;  %v6489_v31 = vld [vmem:[#allocation97_spill] sm:$0xff] }
 0x5a0   :  { %v2314_v41 = vrot.slane %v6484_v3, %v6445_v9  ;;  %6485 = vst [vmem:[#allocation65_spill] sm:$0xff] %v5016_v56  ;;  %6486 = vst [vmem:[#allocation67_spill] sm:$0xff] %v5018_v7  ;;  %v6488_v23 = vld [vmem:[#allocation107_spill] sm:$0xff]  ;;  %2140 = vperm.xlu0 %3668, %v1185_v33   ;;  %2149 = vperm.xlu1 %3669, %v1188_v27   ;;  %v2286_v63 = vrot.slane %v6489_v31, %v6482_v4  ;;  %v6490_v3 = vld [vmem:[#allocation100_spill] sm:$0xff] }
 0x5a1   :  { %6478 = vst [vmem:[#allocation52_spill] sm:$0xff] %v5003_v14  ;;  %6480 = vst [vmem:[#allocation68_spill] sm:$0xff] %v5007_v54  ;;  %v2291_v54 = vrot.slane %v6487_v15, %v6455_v1  ;;  %v2333_v44 = vrot.slane %v6488_v23, %v6445_v9  ;;  %v2300_v14 = vrot.slane %v6490_v3, %v6462_v2  ;;  %v6491_v56 = vld [vmem:[#allocation102_spill] sm:$0xff]  ;;  %v6492_v61 = vld [vmem:[#allocation111_spill] sm:$0xff] }
 0x5a2   :  { %v2310_v7 = vrot.slane %v6491_v56, %v6455_v1  ;;  %v2352_v51 = vrot.slane %v6492_v61, %v6445_v9  ;;  %v6494_v33 = vld [vmem:[#allocation104_spill] sm:$0xff]  ;;  %v6495_v23 = vld [vmem:[#allocation106_spill] sm:$0xff]  ;;  %v6496_v3 = vld [vmem:[#allocation105_spill] sm:$0xff] }
 0x5a3   :  { %v2296_v15 = vsel %vm2253_vm4, %v2295_v5, %v2291_v54  ;;  %v2319_v27 = vrot.slane %v6494_v33, %v6462_v2  ;;  %v2329_v31 = vrot.slane %v6495_v23, %v6455_v1  ;;  %v2324_v30 = vrot.slane %v6496_v3, %v6482_v4  ;;  %v6497_v56 = vld [vmem:[#allocation108_spill] sm:$0xff]  ;;  %v6498_v61 = vld [vmem:[#allocation110_spill] sm:$0xff]  ;;  %v5047_v5 = vpop.permute.xlu0 %1960  ;;  %v5049_v52 = vpop.permute.xlu1 %1963  ;;  %v6501_v23 = vld [vmem:[#allocation109_spill] sm:$0xff] }
 0x5a4   :  { %v2315_v36 = vsel %vm2253_vm4, %v2314_v41, %v2310_v7  ;;  %v2338_v59 = vrot.slane %v6497_v56, %v6462_v2  ;;  %v2348_v54 = vrot.slane %v6498_v61, %v6455_v1  ;;  %6499 = vst [vmem:[#allocation3_spill] sm:$0xff] %v5047_v5  ;;  %6500 = vst [vmem:[#allocation95_spill] sm:$0xff] %v5049_v52  ;;  %v6502_v7 = vld [vmem:[#allocation112_spill] sm:$0xff]  ;;  %2152 = vperm.xlu0 %3668, %v4890_v29   ;;  %v6503_v52 = vld [vmem:[#allocation113_spill] sm:$0xff] }
 0x5a5   :  { %v2334_v33 = vsel %vm2253_vm4, %v2333_v44, %v2329_v31  ;;  %v2343_v53 = vrot.slane %v6501_v23, %v6482_v4  ;;  %v2357_v41 = vrot.slane %v6502_v7, %v6462_v2  ;;  %2161 = vperm.xlu1 %3669, %v4894_v62   ;;  %v2287_v3 = vsel %vm2267_vm6, %v2286_v63, %v2282_v26  ;;  %v6504_v7 = vld [vmem:[#allocation81_spill] sm:$0xff] }
 0x5a6   :  { %v2301_v56 = vsel %vm2260_vm5, %v2300_v14, %v2296_v15  ;;  %v2353_v61 = vsel %vm2253_vm4, %v2352_v51, %v2348_v54  ;;  %v2362_v5 = vrot.slane %v6503_v52, %v6482_v4  ;;  %v2261_v44 = vsel %vm2260_vm5, %v2259_v24, %v2254_v10  ;;  %v6505_v24 = vld [vmem:[#allocation84_spill] sm:$0xff] }
 0x5a7   :  { %v2306_v31 = vsel %vm2267_vm6, %v2305_v50, %v2301_v56  ;;  %v2320_v23 = vsel %vm2260_vm5, %v2319_v27, %v2315_v36  ;;  %v5068_v29 = vmul.f32 %v6504_v7, %v4250_v11  ;;  %v2268_v62 = vsel %vm2267_vm6, %v2266_v57, %v2261_v44  ;;  %v5073_v63 = vpop.permute.xlu0 %1966  ;;  %v5075_v51 = vpop.permute.xlu1 %1969  ;;  %v6506_v57 = vld [vmem:[#allocation115_spill] sm:$0xff] }
 0x5a8   :  { %v2325_v26 = vsel %vm2267_vm6, %v2324_v30, %v2320_v23  ;;  %v2339_v14 = vsel %vm2260_vm5, %v2338_v59, %v2334_v33  ;;  %v5079_v10 = vmul.f32 %v6505_v24, %v4256_v21  ;;  %v3466_v36 = vsel %vm89_vm1, %v2287_v3, %v2268_v62  ;;  %2164 = vperm.xlu0 %3668, %v4902_v48   ;;  %v6507_v48 = vld [vmem:[#allocation63_spill] sm:$0xff]  ;;  %v6508_v33 = vld [vmem:[#allocation114_spill] sm:$0xff]  ;;  %v6512_v62 = vld [vmem:[#allocation116_spill] sm:$0xff] }
 0x5a9   :  { %v2344_v50 = vsel %vm2267_vm6, %v2343_v53, %v2339_v14  ;;  %v2358_v15 = vsel %vm2260_vm5, %v2357_v41, %v2353_v61  ;;  %2155 = vperm.xlu1 %3669, %v4906_v35   ;;  %v3467_v30 = vsel %vm167_vm7, %v2306_v31, %v3466_v36  ;;  %v2371_v27 = vrot.slane %v6506_v57, %v6445_v9  ;;  %v6509_v3 = vld [vmem:[#allocation123_spill] sm:$0xff]  ;;  %v6513_v14 = vld [vmem:[#allocation122_spill] sm:$0xff] }
 0x5aa   :  { %v2363_v59 = vsel %vm2267_vm6, %v2362_v5, %v2358_v15  ;;  %v3468_v54 = vsel %vm169_vm8, %v2325_v26, %v3467_v30  ;;  %v5093_v52 = vmul.f32 %v6296_v55, %v4238_v40  ;;  %v5097_v53 = vmul.f32 %v6298_v20, %v4244_v18  ;;  %v6510_v55 = vld [vmem:[#allocation85_spill] sm:$0xff]  ;;  %v6511_v20 = vld [vmem:[#allocation127_spill] sm:$0xff]  ;;  %v6517_v15 = vld [vmem:[#allocation124_spill] sm:$0xff] }
 0x5ab   :  { %v5101_v35 = vmul.f32 %v6507_v48, %v4250_v11  ;;  %v3469_v5 = vsel %vm171_vm9, %v2344_v50, %v3468_v54  ;;  %v2367_v41 = vrot.slane %v6508_v33, %v6455_v1  ;;  %v2409_v56 = vrot.slane %v6509_v3, %v6445_v9  ;;  %v5108_v61 = vpop.permute.xlu0 %1972  ;;  %v5110_v40 = vpop.permute.xlu1 %1975  ;;  %v6514_v36 = vld [vmem:[#allocation131_spill] sm:$0xff]  ;;  %v6519_v54 = vld [vmem:[#allocation125_spill] sm:$0xff] }
 0x5ac   :  { %v5114_v18 = vmul.f32 %v6510_v55, %v4250_v11  ;;  %v2428_v44 = vrot.slane %v6511_v20, %v6445_v9  ;;  %2167 = vperm.xlu0 %3668, %v4910_v17   ;;  %v5122_v31 = vmul.f32 %v6299_v38, %v4256_v21  ;;  %v5125_v23 = vsel %vm173_vm10, %v2363_v59, %v3469_v5  ;;  %v6516_v21 = vld [vmem:[#allocation119_spill] sm:$0xff]  ;;  %v6518_v59 = vld [vmem:[#allocation126_spill] sm:$0xff]  ;;  %v6520_v5 = vld [vmem:[#allocation128_spill] sm:$0xff] }
 0x5ad   :  { %2173 = vperm.xlu1 %3669, %v4914_v49   ;;  %v2372_v7 = vsel %vm2253_vm4, %v2371_v27, %v2367_v41  ;;  %v2376_v26 = vrot.slane %v6512_v62, %v6462_v2  ;;  %v2405_v24 = vrot.slane %v6513_v14, %v6455_v1  ;;  %v2447_v17 = vrot.slane %v6514_v36, %v6445_v9  ;;  %v6515_v49 = vld [vmem:[#allocation118_spill] sm:$0xff]  ;;  %v6523_v14 = vld [vmem:[#allocation129_spill] sm:$0xff] }
 0x5ae   :  { %v2386_v50 = vrot.slane %v6515_v49, %v6455_v1  ;;  %v2390_v38 = vrot.slane %v6516_v21, %v6445_v9  ;;  %v2414_v30 = vrot.slane %v6517_v15, %v6462_v2  ;;  %v2424_v57 = vrot.slane %v6518_v59, %v6455_v1  ;;  %v6521_v41 = vld [vmem:[#allocation130_spill] sm:$0xff]  ;;  %v6525_v15 = vld [vmem:[#allocation133_spill] sm:$0xff] }
 0x5af   :  { %v2410_v27 = vsel %vm2253_vm4, %v2409_v56, %v2405_v24  ;;  %v2419_v48 = vrot.slane %v6519_v54, %v6482_v4  ;;  %v2433_v33 = vrot.slane %v6520_v5, %v6462_v2  ;;  %v2443_v3 = vrot.slane %v6521_v41, %v6455_v1  ;;  %v5149_v55 = vpop.permute.xlu0 %1978  ;;  %v5151_v20 = vpop.permute.xlu1 %1981  ;;  %v6524_v56 = vld [vmem:[#allocation132_spill] sm:$0xff]  ;;  %v6526_v54 = vld [vmem:[#allocation135_spill] sm:$0xff] }
 0x5b0   :  { %6522 = vst [vmem:[#allocation54_spill] sm:$0xff] %v5149_v55  ;;  %v2429_v62 = vsel %vm2253_vm4, %v2428_v44, %v2424_v57  ;;  %v2438_v36 = vrot.slane %v6523_v14, %v6482_v4  ;;  %v2452_v24 = vrot.slane %v6524_v56, %v6462_v2  ;;  %2176 = vperm.xlu0 %3668, %v4918_v28   ;;  %v6527_v5 = vld [vmem:[#allocation120_spill] sm:$0xff]  ;;  %v6528_v28 = vld [vmem:[#allocation139_spill] sm:$0xff] }
 0x5b1   :  { %2158 = vperm.xlu1 %3669, %v4922_v46   ;;  %v2377_v49 = vsel %vm2260_vm5, %v2376_v26, %v2372_v7  ;;  %v2448_v21 = vsel %vm2253_vm4, %v2447_v17, %v2443_v3  ;;  %v2457_v59 = vrot.slane %v6525_v15, %v6482_v4  ;;  %v2466_v44 = vrot.slane %v6526_v54, %v6445_v9  ;;  %v6529_v17 = vld [vmem:[#allocation134_spill] sm:$0xff]  ;;  %v6530_v56 = vld [vmem:[#allocation143_spill] sm:$0xff] }
 0x5b2   :  { %v2391_v57 = vsel %vm2253_vm4, %v2390_v38, %v2386_v50  ;;  %v2395_v41 = vrot.slane %v6527_v5, %v6462_v2  ;;  %v2415_v14 = vsel %vm2260_vm5, %v2414_v30, %v2410_v27  ;;  %v2485_v46 = vrot.slane %v6528_v28, %v6445_v9  ;;  %v6531_v27 = vld [vmem:[#allocation138_spill] sm:$0xff] }
 0x5b3   :  { %v2420_v7 = vsel %vm2267_vm6, %v2419_v48, %v2415_v14  ;;  %v2434_v26 = vsel %vm2260_vm5, %v2433_v33, %v2429_v62  ;;  %v2462_v3 = vrot.slane %v6529_v17, %v6455_v1  ;;  %v2504_v15 = vrot.slane %v6530_v56, %v6445_v9  ;;  %v5178_v54 = vpop.permute.xlu0 %1984  ;;  %v5180_v50 = vpop.permute.xlu1 %1987  ;;  %v6532_v62 = vld [vmem:[#allocation136_spill] sm:$0xff]  ;;  %v6533_v28 = vld [vmem:[#allocation142_spill] sm:$0xff] }
 0x5b4   :  { %v2439_v38 = vsel %vm2267_vm6, %v2438_v36, %v2434_v26  ;;  %v2453_v30 = vsel %vm2260_vm5, %v2452_v24, %v2448_v21  ;;  %v2481_v5 = vrot.slane %v6531_v27, %v6455_v1  ;;  %2170 = vperm.xlu0 %3668, %v4926_v42   ;;  %v2471_v14 = vrot.slane %v6532_v62, %v6462_v2  ;;  %v6534_v36 = vld [vmem:[#allocation137_spill] sm:$0xff]  ;;  %v6535_v26 = vld [vmem:[#allocation140_spill] sm:$0xff]  ;;  %v6539_v62 = vld [vmem:[#allocation147_spill] sm:$0xff] }
 0x5b5   :  { %2179 = vperm.xlu1 %3669, %v4932_v8   ;;  %v2458_v48 = vsel %vm2267_vm6, %v2457_v59, %v2453_v30  ;;  %v2467_v33 = vsel %vm2253_vm4, %v2466_v44, %v2462_v3  ;;  %v2500_v17 = vrot.slane %v6533_v28, %v6455_v1  ;;  %v2476_v24 = vrot.slane %v6534_v36, %v6482_v4  ;;  %v6536_v8 = vld [vmem:[#allocation144_spill] sm:$0xff]  ;;  %v6537_v59 = vld [vmem:[#allocation141_spill] sm:$0xff] }
 0x5b6   :  { %v2486_v21 = vsel %vm2253_vm4, %v2485_v46, %v2481_v5  ;;  %v2490_v42 = vrot.slane %v6535_v26, %v6462_v2  ;;  %v2509_v56 = vrot.slane %v6536_v8, %v6462_v2  ;;  %v2495_v44 = vrot.slane %v6537_v59, %v6482_v4  ;;  %v6538_v30 = vld [vmem:[#allocation145_spill] sm:$0xff] }
 0x5b7   :  { %v2505_v3 = vsel %vm2253_vm4, %v2504_v15, %v2500_v17  ;;  %v2514_v27 = vrot.slane %v6538_v30, %v6482_v4  ;;  %v2523_v28 = vrot.slane %v6539_v62, %v6445_v9  ;;  %v5208_v36 = vpop.permute.xlu0 %1990  ;;  %v5210_v46 = vpop.permute.xlu1 %1993  ;;  %v6541_v5 = vld [vmem:[#allocation117_spill] sm:$0xff]  ;;  %v2396_v8 = vsel %vm2260_vm5, %v2395_v41, %v2391_v57  ;;  %v6543_v62 = vld [vmem:[#allocation146_spill] sm:$0xff] }
 0x5b8   :  { %6540 = vst [vmem:[#allocation70_spill] sm:$0xff] %v5210_v46  ;;  %v2381_v26 = vrot.slane %v6541_v5, %v6482_v4  ;;  %v3473_v55 = vsel %vm89_vm1, %v2439_v38, %v2420_v7  ;;  %2185 = vperm.xlu0 %3668, %v4936_v16   ;;  %v6542_v15 = vld [vmem:[#allocation121_spill] sm:$0xff]  ;;  %v2472_v30 = vsel %vm2260_vm5, %v2471_v14, %v2467_v33  ;;  %v6544_v38 = vld [vmem:[#allocation148_spill] sm:$0xff] }
 0x5b9   :  { %2188 = vperm.xlu1 %3669, %v4940_v22   ;;  %v2400_v17 = vrot.slane %v6542_v15, %v6482_v4  ;;  %v3474_v59 = vsel %vm167_vm7, %v2458_v48, %v3473_v55  ;;  %v2519_v46 = vrot.slane %v6543_v62, %v6455_v1  ;;  %v2477_v5 = vsel %vm2267_vm6, %v2476_v24, %v2472_v30  ;;  %v6545_v24 = vld [vmem:[#allocation149_spill] sm:$0xff] }
 0x5ba   :  { %v2491_v57 = vsel %vm2260_vm5, %v2490_v42, %v2486_v21  ;;  %v2510_v41 = vsel %vm2260_vm5, %v2509_v56, %v2505_v3  ;;  %v2542_v16 = vrot.slane %v4504_v34, %v6445_v9  ;;  %v2528_v48 = vrot.slane %v6544_v38, %v6462_v2  ;;  %v6546_v42 = vld [vmem:[#allocation150_spill] sm:$0xff] }
 0x5bb   :  { %v2496_v22 = vsel %vm2267_vm6, %v2495_v44, %v2491_v57  ;;  %v2515_v7 = vsel %vm2267_vm6, %v2514_v27, %v2510_v41  ;;  %v2524_v55 = vsel %vm2253_vm4, %v2523_v28, %v2519_v46  ;;  %v5234_v33 = vpop.permute.xlu0 %1996  ;;  %v5236_v14 = vpop.permute.xlu1 %1999  ;;  %v2533_v21 = vrot.slane %v6545_v24, %v6482_v4  ;;  %v6547_v27 = vld [vmem:[#allocation86_spill] sm:$0xff]  ;;  %v6552_v24 = vld [vmem:[#allocation151_spill] sm:$0xff] }
 0x5bc   :  { %v2538_v56 = vrot.slane %v6546_v42, %v6455_v1  ;;  %v2580_v34 = vrot.slane %v4536_v32, %v6445_v9  ;;  %2182 = vperm.xlu0 %3668, %v4944_v37   ;;  %v5247_v44 = vsel %vm2267_vm6, %v2381_v26, %v2377_v49  ;;  %v3475_v3 = vsel %vm169_vm8, %v2477_v5, %v3474_v59  ;;  %v6553_v42 = vld [vmem:[#allocation152_spill] sm:$0xff] }
 0x5bd   :  { %2191 = vperm.xlu1 %3669, %v4948_v19   ;;  %v2547_v28 = vrot.slane %v6547_v27, %v6462_v2  ;;  %v5253_v46 = vsel %vm2267_vm6, %v2400_v17, %v2396_v8  ;;  %v3476_v15 = vsel %vm171_vm9, %v2496_v22, %v3475_v3  ;;  %v2561_v32 = vrot.slane %v4520_v25, %v6445_v9  ;;  %v6555_v27 = vld [vmem:[#allocation62_spill] sm:$0xff] }
 0x5be   :  { %v2543_v30 = vsel %vm2253_vm4, %v2542_v16, %v2538_v56  ;;  %v2576_v37 = vrot.slane %v4530_v12, %v6455_v1  ;;  %v2529_v19 = vsel %vm2260_vm5, %v2528_v48, %v2524_v55  ;;  %v2585_v49 = vrot.slane %v4538_v60, %v6462_v2 }
 0x5bf   :  { %v2599_v26 = vrot.slane %v4552_v0, %v6445_v9  ;;  %v5266_v8 = vpop.permute.xlu0 %2002  ;;  %v5268_v17 = vpop.permute.xlu1 %2005  ;;  %v5271_v59 = vsel %vm173_vm10, %v2515_v7, %v3476_v15  ;;  %v5274_v25 = vsel %vm2267_vm6, %v2533_v21, %v2529_v19  ;;  %v2557_v12 = vrot.slane %v4514_v43, %v6455_v1  ;;  %v6550_v7 = vld [vmem:[#allocation87_spill] sm:$0xff]  ;;  %v6558_v19 = vld [vmem:[#allocation158_spill] sm:$0xff] }
 0x5c0   :  { %v2581_v62 = vsel %vm2253_vm4, %v2580_v34, %v2576_v37  ;;  %2197 = vperm.xlu0 %3668, %v4952_v6   ;;  %v2548_v60 = vsel %vm2260_vm5, %v2547_v28, %v2543_v30  ;;  %v2566_v0 = vrot.slane %v4522_v13, %v6462_v2  ;;  %v2590_v5 = vrot.slane %v4544_v58, %v6482_v4  ;;  %v6548_v6 = vld [vmem:[#allocation153_spill] sm:$0xff]  ;;  %v6554_v34 = vld [vmem:[#allocation156_spill] sm:$0xff] }
 0x5c1   :  { %2200 = vperm.xlu1 %3669, %v4956_v39   ;;  %v2595_v57 = vrot.slane %v4546_v45, %v6455_v1  ;;  %v2552_v43 = vrot.slane %v4512_v47, %v6482_v4  ;;  %v2562_v41 = vsel %vm2253_vm4, %v2561_v32, %v2557_v12  ;;  %v2618_v16 = vrot.slane %v6548_v6, %v6445_v9  ;;  %v6549_v39 = vld [vmem:[#allocation157_spill] sm:$0xff]  ;;  %v6551_v45 = vld [vmem:[#allocation88_spill] sm:$0xff]  ;;  %v6557_v32 = vld [vmem:[#allocation154_spill] sm:$0xff] }
 0x5c2   :  { %v2637_v22 = vrot.slane %v6549_v39, %v6445_v9  ;;  %v2571_v13 = vrot.slane %v6550_v7, %v6482_v4  ;;  %v2586_v55 = vsel %vm2260_vm5, %v2585_v49, %v2581_v62  ;;  %v2604_v38 = vrot.slane %v6551_v45, %v6462_v2  ;;  %v6556_v28 = vld [vmem:[#allocation44_spill] sm:$0xff]  ;;  %v6559_v12 = vld [vmem:[#allocation155_spill] sm:$0xff] }
 0x5c3   :  { %v2600_v58 = vsel %vm2253_vm4, %v2599_v26, %v2595_v57  ;;  %v5301_v48 = vpop.permute.xlu0 %2008  ;;  %v5303_v47 = vpop.permute.xlu1 %2011  ;;  %v2609_v21 = vrot.slane %v6552_v24, %v6482_v4  ;;  %v2614_v56 = vrot.slane %v6553_v42, %v6455_v1  ;;  %v2633_v3 = vrot.slane %v6554_v34, %v6455_v1  ;;  %v6560_v6 = vld [vmem:[#allocation159_spill] sm:$0xff]  ;;  %v6564_v34 = vld [vmem:[#allocation48_spill] sm:$0xff] }
 0x5c4   :  { %2194 = vperm.xlu0 %3668, %v6555_v27   ;;  %v2567_v15 = vsel %vm2260_vm5, %v2566_v0, %v2562_v41  ;;  %v2591_v30 = vsel %vm2267_vm6, %v2590_v5, %v2586_v55  ;;  %v2623_v37 = vrot.slane %v6557_v32, %v6462_v2  ;;  %v2642_v49 = vrot.slane %v6558_v19, %v6462_v2  ;;  %v6561_v41 = vld [vmem:[#allocation161_spill] sm:$0xff]  ;;  %v6567_v32 = vld [vmem:[#allocation162_spill] sm:$0xff] }
 0x5c5   :  { %2203 = vperm.xlu1 %3669, %v6556_v28   ;;  %v2619_v26 = vsel %vm2253_vm4, %v2618_v16, %v2614_v56  ;;  %v2628_v62 = vrot.slane %v6559_v12, %v6482_v4  ;;  %v2638_v57 = vsel %vm2253_vm4, %v2637_v22, %v2633_v3  ;;  %v2647_v39 = vrot.slane %v6560_v6, %v6482_v4  ;;  %v6562_v55 = vld [vmem:[#allocation165_spill] sm:$0xff]  ;;  %v6563_v56 = vld [vmem:[#allocation64_spill] sm:$0xff]  ;;  %v6568_v12 = vld [vmem:[#allocation166_spill] sm:$0xff] }
 0x5c6   :  { %v2572_v0 = vsel %vm2267_vm6, %v2571_v13, %v2567_v15  ;;  %v2605_v5 = vsel %vm2260_vm5, %v2604_v38, %v2600_v58  ;;  %v2656_v7 = vrot.slane %v6561_v41, %v6445_v9  ;;  %v2675_v45 = vrot.slane %v6562_v55, %v6445_v9  ;;  %v6565_v3 = vld [vmem:[#allocation160_spill] sm:$0xff]  ;;  %v6572_v41 = vld [vmem:[#allocation46_spill] sm:$0xff] }
 0x5c7   :  { %v5331_v24 = vpop.permute.xlu0 %2014  ;;  %v5333_v16 = vpop.permute.xlu1 %2017  ;;  %v3480_v42 = vsel %vm89_vm1, %v2591_v30, %v2572_v0  ;;  %v2610_v22 = vsel %vm2267_vm6, %v2609_v21, %v2605_v5  ;;  %v2553_v13 = vsel %vm2267_vm6, %v2552_v43, %v2548_v60  ;;  %v2624_v58 = vsel %vm2260_vm5, %v2623_v37, %v2619_v26  ;;  %v6566_v28 = vld [vmem:[#allocation164_spill] sm:$0xff]  ;;  %v6569_v37 = vld [vmem:[#allocation163_spill] sm:$0xff]  ;;  %v6571_v5 = vld [vmem:[#allocation66_spill] sm:$0xff] }
 0x5c8   :  { %2209 = vperm.xlu0 %3668, %v6563_v56   ;;  %v2643_v38 = vsel %vm2260_vm5, %v2642_v49, %v2638_v57  ;;  %v2652_v27 = vrot.slane %v6565_v3, %v6455_v1  ;;  %v2671_v15 = vrot.slane %v6566_v28, %v6455_v1  ;;  %v2629_v30 = vsel %vm2267_vm6, %v2628_v62, %v2624_v58  ;;  %v6570_v57 = vld [vmem:[#allocation167_spill] sm:$0xff]  ;;  %v6573_v56 = vld [vmem:[#allocation89_spill] sm:$0xff] }
 0x5c9   :  { %2212 = vperm.xlu1 %3669, %v6564_v34   ;;  %v2648_v21 = vsel %vm2267_vm6, %v2647_v39, %v2643_v38  ;;  %v2661_v19 = vrot.slane %v6567_v32, %v6462_v2  ;;  %v2680_v60 = vrot.slane %v6568_v12, %v6462_v2  ;;  %v2666_v49 = vrot.slane %v6569_v37, %v6482_v4  ;;  %v6579_v32 = vld [vmem:[#allocation173_spill] sm:$0xff]  ;;  %v6580_v12 = vld [vmem:[#allocation176_spill] sm:$0xff] }
 0x5ca   :  { %v2657_v43 = vsel %vm2253_vm4, %v2656_v7, %v2652_v27  ;;  %v2676_v26 = vsel %vm2253_vm4, %v2675_v45, %v2671_v15  ;;  %v2685_v6 = vrot.slane %v6570_v57, %v6482_v4  ;;  %v3481_v39 = vsel %vm167_vm7, %v2610_v22, %v3480_v42  ;;  %v6576_v27 = vld [vmem:[#allocation181_spill] sm:$0xff]  ;;  %v6582_v37 = vld [vmem:[#allocation52_spill] sm:$0xff] }
 0x5cb   :  { %v5358_v0 = vpop.permute.xlu0 %2020  ;;  %v5360_v62 = vpop.permute.xlu1 %2023  ;;  %v3478_v7 = vsel %vm175_vm11, %v5274_v25, %v5271_v59  ;;  %v3471_v55 = vsel %vm175_vm11, %v5247_v44, %v5125_v23  ;;  %v3482_v45 = vsel %vm169_vm8, %v2629_v30, %v3481_v39  ;;  %v5374_v34 = vmul.f32 %v6573_v56, %v4250_v11  ;;  %v6574_v23 = vld [vmem:[#allocation177_spill] sm:$0xff]  ;;  %v6584_v57 = vld [vmem:[#allocation172_spill] sm:$0xff] }
 0x5cc   :  { %2206 = vperm.xlu0 %3668, %v6571_v5   ;;  %v5377_v42 = vsel %vm177_vm12, %v2553_v13, %v3478_v7  ;;  %v5381_v22 = vsel %vm177_vm12, %v5253_v46, %v3471_v55  ;;  %v3483_v58 = vsel %vm171_vm9, %v2648_v21, %v3482_v45  ;;  %v2662_v59 = vsel %vm2260_vm5, %v2661_v19, %v2657_v43  ;;  %v6575_v13 = vld [vmem:[#allocation168_spill] sm:$0xff]  ;;  %v6578_v30 = vld [vmem:[#allocation169_spill] sm:$0xff]  ;;  %v6581_v43 = vld [vmem:[#allocation50_spill] sm:$0xff] }
 0x5cd   :  { %2215 = vperm.xlu1 %3669, %v6572_v41   ;;  %v2681_v25 = vsel %vm2260_vm5, %v2680_v60, %v2676_v26  ;;  %v2732_v44 = vrot.slane %v6574_v23, %v6445_v9  ;;  %v2667_v38 = vsel %vm2267_vm6, %v2666_v49, %v2662_v59  ;;  %v2690_v3 = vrot.slane %v6575_v13, %v6455_v1  ;;  %v6583_v49 = vld [vmem:[#allocation170_spill] sm:$0xff]  ;;  %v6585_v39 = vld [vmem:[#allocation180_spill] sm:$0xff] }
 0x5ce   :  { %v2686_v11 = vsel %vm2267_vm6, %v2685_v6, %v2681_v25  ;;  %v2751_v46 = vrot.slane %v6576_v27, %v6445_v9  ;;  %v2694_v21 = vrot.slane %v6578_v30, %v6445_v9  ;;  %v2713_v19 = vrot.slane %v6579_v32, %v6445_v9  ;;  %v6586_v41 = vld [vmem:[#allocation6_spill] sm:$0xff]  ;;  %v6590_v27 = vld [vmem:[#allocation179_spill] sm:$0xff] }
 0x5cf   :  { %v5394_v28 = vpop.permute.xlu0 %2026  ;;  %v5396_v15 = vpop.permute.xlu1 %2029  ;;  %v2728_v60 = vrot.slane %v6580_v12, %v6455_v1  ;;  %v2699_v26 = vrot.slane %v6583_v49, %v6462_v2  ;;  %v2709_v6 = vrot.slane %v6584_v57, %v6455_v1  ;;  %v2747_v5 = vrot.slane %v6585_v39, %v6455_v1  ;;  %v6587_v55 = vld [vmem:[#allocation174_spill] sm:$0xff]  ;;  %v6591_v12 = vld [vmem:[#allocation183_spill] sm:$0xff]  ;;  %v6594_v39 = vld [vmem:[#allocation185_spill] sm:$0xff] }
 0x5d0   :  { %6577 = vst [vmem:[#allocation71_spill] sm:$0xff] %v5394_v28  ;;  %2221 = vperm.xlu0 %3668, %v6581_v43   ;;  %v2770_v7 = vrot.slane %v6586_v41, %v6445_v9  ;;  %v2718_v45 = vrot.slane %v6587_v55, %v6462_v2  ;;  %v6588_v59 = vld [vmem:[#allocation178_spill] sm:$0xff]  ;;  %v2742_v30 = vrot.slane %v6590_v27, %v6482_v4  ;;  %v6595_v55 = vld [vmem:[#allocation23_spill] sm:$0xff] }
 0x5d1   :  { %2224 = vperm.xlu1 %3669, %v6582_v37   ;;  %v2733_v56 = vsel %vm2253_vm4, %v2732_v44, %v2728_v60  ;;  %v2737_v25 = vrot.slane %v6588_v59, %v6462_v2  ;;  %v6589_v23 = vld [vmem:[#allocation182_spill] sm:$0xff]  ;;  %v2752_v32 = vsel %vm2253_vm4, %v2751_v46, %v2747_v5  ;;  %v2761_v43 = vrot.slane %v6591_v12, %v6482_v4  ;;  %v6592_v37 = vld [vmem:[#allocation184_spill] sm:$0xff]  ;;  %v6597_v5 = vld [vmem:[#allocation175_spill] sm:$0xff] }
 0x5d2   :  { %v2756_v13 = vrot.slane %v6589_v23, %v6462_v2  ;;  %v2766_v49 = vrot.slane %v6592_v37, %v6455_v1  ;;  %v2714_v60 = vsel %vm2253_vm4, %v2713_v19, %v2709_v6  ;;  %v2775_v41 = vrot.slane %v6594_v39, %v6462_v2  ;;  %v6596_v23 = vld [vmem:[#allocation68_spill] sm:$0xff]  ;;  %v6598_v37 = vld [vmem:[#allocation21_spill] sm:$0xff]  ;;  %v6599_v6 = vld [vmem:[#allocation171_spill] sm:$0xff] }
 0x5d3   :  { %v5428_v57 = vpop.permute.xlu0 %2032  ;;  %v5430_v44 = vpop.permute.xlu1 %2035  ;;  %v2789_v59 = vrot.slane %v6595_v55, %v6445_v9  ;;  %v2695_v46 = vsel %vm2253_vm4, %v2694_v21, %v2690_v3  ;;  %v2723_v27 = vrot.slane %v6597_v5, %v6482_v4  ;;  %v2780_v19 = vrot.slane %v6598_v37, %v6482_v4 }
 0x5d4   :  { %6593 = vst [vmem:[#allocation69_spill] sm:$0xff] %v5430_v44  ;;  %2143 = vperm.xlu0 %3668, %v6596_v23   ;;  %v2771_v12 = vsel %vm2253_vm4, %v2770_v7, %v2766_v49  ;;  %v2704_v39 = vrot.slane %v6599_v6, %v6482_v4  ;;  %v2738_v44 = vsel %vm2260_vm5, %v2737_v25, %v2733_v56  ;;  %v6600_v23 = vld [vmem:[#allocation7_spill] sm:$0xff]  ;;  %v6601_v7 = vld [vmem:[#allocation8_spill] sm:$0xff] }
 0x5d5   :  { %2218 = vperm.xlu1 %3669, %v5068_v29   ;;  %v2757_v55 = vsel %vm2260_vm5, %v2756_v13, %v2752_v32  ;;  %v2785_v29 = vrot.slane %v6600_v23, %v6455_v1  ;;  %v2719_v3 = vsel %vm2260_vm5, %v2718_v45, %v2714_v60  ;;  %v2743_v21 = vsel %vm2267_vm6, %v2742_v30, %v2738_v44  ;;  %v6602_v13 = vld [vmem:[#allocation25_spill] sm:$0xff] }
 0x5d6   :  { %v2762_v5 = vsel %vm2267_vm6, %v2761_v43, %v2757_v55  ;;  %v2794_v49 = vrot.slane %v6601_v7, %v6462_v2  ;;  %v2776_v56 = vsel %vm2260_vm5, %v2775_v41, %v2771_v12  ;;  %v2799_v32 = vrot.slane %v6602_v13, %v6482_v4  ;;  %v6603_v41 = vld [vmem:[#allocation27_spill] sm:$0xff]  ;;  %v6608_v55 = vld [vmem:[#allocation9_spill] sm:$0xff] }
 0x5d7   :  { %v5456_v37 = vpop.permute.xlu0 %2038  ;;  %v5458_v28 = vpop.permute.xlu1 %2041  ;;  %v2790_v25 = vsel %vm2253_vm4, %v2789_v59, %v2785_v29  ;;  %v2700_v45 = vsel %vm2260_vm5, %v2699_v26, %v2695_v46  ;;  %v2724_v30 = vsel %vm2267_vm6, %v2723_v27, %v2719_v3  ;;  %v2781_v43 = vsel %vm2267_vm6, %v2780_v19, %v2776_v56  ;;  %v6606_v46 = vld [vmem:[#allocation43_spill] sm:$0xff]  ;;  %v6611_v7 = vld [vmem:[#allocation17_spill] sm:$0xff]  ;;  %v6626_v3 = vld [vmem:[#allocation24_spill] sm:$0xff] }
 0x5d8   :  { %2227 = vperm.xlu0 %3668, %v5079_v10   ;;  %v3484_v44 = vsel %vm173_vm10, %v2667_v38, %v3483_v58  ;;  %v3487_v60 = vsel %vm89_vm1, %v2743_v21, %v2724_v30  ;;  %v2808_v59 = vrot.slane %v6603_v41, %v6445_v9  ;;  %v5474_v12 = vsel %vm2267_vm6, %v2704_v39, %v2700_v45  ;;  %v6607_v58 = vld [vmem:[#allocation47_spill] sm:$0xff]  ;;  %v6615_v30 = vld [vmem:[#allocation20_spill] sm:$0xff] }
 0x5d9   :  { %2233 = vperm.xlu1 %3669, %v5093_v52   ;;  %6604 = vst [vmem:[#allocation72_spill] sm:$0xff] %v5474_v12  ;;  %v5477_v10 = vsel %vm175_vm11, %v2686_v11, %v3484_v44  ;;  %v3488_v52 = vsel %vm167_vm7, %v2762_v5, %v3487_v60  ;;  %v2795_v26 = vsel %vm2260_vm5, %v2794_v49, %v2790_v25  ;;  %v6610_v21 = vld [vmem:[#allocation39_spill] sm:$0xff] }
 0x5da   :  { %6605 = vst [vmem:[#allocation74_spill] sm:$0xff] %v5477_v10  ;;  %v2884_v27 = vrot.slane %v6606_v46, %v6445_v9  ;;  %v2903_v38 = vrot.slane %v6607_v58, %v6445_v9  ;;  %v5490_v39 = vsel %vm169_vm8, %v2781_v43, %v3488_v52  ;;  %v5493_v11 = vsel %vm2267_vm6, %v2799_v32, %v2795_v26  ;;  %v6612_v56 = vld [vmem:[#allocation19_spill] sm:$0xff]  ;;  %v6628_v32 = vld [vmem:[#allocation26_spill] sm:$0xff] }
 0x5db   :  { %v5485_v19 = vpop.permute.xlu0 %2044  ;;  %v5487_v6 = vpop.permute.xlu1 %2047  ;;  %v2804_v23 = vrot.slane %v6608_v55, %v6455_v1  ;;  %v2865_v5 = vrot.slane %v6610_v21, %v6445_v9  ;;  %v2880_v49 = vrot.slane %v6611_v7, %v6455_v1  ;;  %v2899_v25 = vrot.slane %v6612_v56, %v6455_v1  ;;  %v6616_v44 = vld [vmem:[#allocation15_spill] sm:$0xff]  ;;  %v6620_v56 = vld [vmem:[#allocation16_spill] sm:$0xff]  ;;  %v6627_v7 = vld [vmem:[#allocation53_spill] sm:$0xff] }
 0x5dc   :  { %2236 = vperm.xlu0 %3668, %v5097_v53   ;;  %v2908_v43 = vrot.slane %v6615_v30, %v6462_v2  ;;  %v2861_v60 = vrot.slane %v6616_v44, %v6455_v1  ;;  %v6617_v26 = vld [vmem:[#allocation51_spill] sm:$0xff]  ;;  %v6622_v30 = vld [vmem:[#allocation49_spill] sm:$0xff]  ;;  %v2937_v12 = vrot.slane %v6628_v32, %v6455_v1 }
 0x5dd   :  { %2146 = vperm.xlu1 %3669, %v5101_v35   ;;  %v5508_v13 = vsel %vm2253_vm4, %v2808_v59, %v2804_v23  ;;  %v6614_v35 = vld [vmem:[#allocation18_spill] sm:$0xff]  ;;  %v2885_v41 = vsel %vm2253_vm4, %v2884_v27, %v2880_v49  ;;  %v2904_v52 = vsel %vm2253_vm4, %v2903_v38, %v2899_v25  ;;  %v2922_v59 = vrot.slane %v6617_v26, %v6445_v9  ;;  %v6618_v55 = vld [vmem:[#allocation11_spill] sm:$0xff]  ;;  %v6621_v49 = vld [vmem:[#allocation45_spill] sm:$0xff] }
 0x5de   :  { %v2889_v45 = vrot.slane %v6614_v35, %v6462_v2  ;;  %v6619_v21 = vld [vmem:[#allocation31_spill] sm:$0xff]  ;;  %v2870_v35 = vrot.slane %v6620_v56, %v6462_v2  ;;  %v5534_v27 = vsel %vm43_vm0, %v5381_v22, 0.0  ;;  %v2866_v38 = vsel %vm2253_vm4, %v2865_v5, %v2861_v60  ;;  %v6623_v26 = vld [vmem:[#allocation22_spill] sm:$0xff] }
 0x5df   :  { %v5522_v46 = vpop.permute.xlu0 %2050  ;;  %v2054_v58 = vpop.permute.xlu1 %2053  ;;  %v2894_v25 = vrot.slane %v6621_v49, %v6482_v4  ;;  %v2913_v44 = vrot.slane %v6622_v30, %v6482_v4  ;;  %v2918_v53 = vrot.slane %v6623_v26, %v6455_v1  ;;  %v2909_v5 = vsel %vm2260_vm5, %v2908_v43, %v2904_v52  ;;  %v6625_v60 = vld [vmem:[#allocation55_spill] sm:$0xff] }
 0x5e0   :  { %2230 = vperm.xlu0 %3668, %v5114_v18   ;;  %v5546_v18 = vld [vmem:[%s5971_s5] ss:$0 sm:$0xff]  ;;  %v2890_v56 = vsel %vm2260_vm5, %v2889_v45, %v2885_v41  ;;  %v2941_v49 = vrot.slane %v6625_v60, %v6445_v9  ;;  %v2927_v26 = vrot.slane %v6626_v3, %v6462_v2  ;;  %v2932_v23 = vrot.slane %v6627_v7, %v6482_v4  ;;  %v6630_v7 = vld [vmem:[#allocation56_spill] sm:$0xff]  ;;  %v6631_v60 = vld [vmem:[#allocation57_spill] sm:$0xff] }
 0x5e1   :  { %2239 = vperm.xlu1 %3669, %v5122_v31   ;;  %v6624_v31 = vld [vmem:[#allocation41_spill] sm:$0xff]  ;;  %v2923_v30 = vsel %vm2253_vm4, %v2922_v59, %v2918_v53  ;;  %v3165_v45 = vrot.slane %v2054_v58, %v6455_v1  ;;  %v5568_v3 = vsel %vm43_vm0, %v5377_v42, 0.0  ;;  %v2871_v53 = vsel %vm2260_vm5, %v2870_v35, %v2866_v38  ;;  %v6629_v59 = vld [vmem:[#allocation28_spill] sm:$0xff]  ;;  %v6632_v38 = vld [vmem:[#allocation59_spill] sm:$0xff] }
 0x5e2   :  { %v2875_v22 = vrot.slane %v6624_v31, %v6482_v4  ;;  %v2895_v32 = vsel %vm2267_vm6, %v2894_v25, %v2890_v56  ;;  %v2914_v52 = vsel %vm2267_vm6, %v2913_v44, %v2909_v5  ;;  %v2946_v58 = vrot.slane %v6629_v59, %v6462_v2  ;;  %v6633_v59 = vld [vmem:[#allocation30_spill] sm:$0xff] }
 0x5e3   :  { %v2057_v10 = vpop.permute.xlu0 %2056  ;;  %v2060_v31 = vpop.permute.xlu1 %2059  ;;  %v2928_v35 = vsel %vm2260_vm5, %v2927_v26, %v2923_v30  ;;  %v2979_v25 = vrot.slane %v6632_v38, %v6445_v9  ;;  %v6634_v26 = vld [vmem:[#allocation32_spill] sm:$0xff] }
 0x5e4   :  { %v3169_v43 = vrot.slane %v2057_v10, %v6445_v9  ;;  %v3174_v41 = vrot.slane %v2060_v31, %v6462_v2  ;;  %2242 = vperm.xlu0 %3668, %v5374_v34   ;;  %v2942_v10 = vsel %vm2253_vm4, %v2941_v49, %v2937_v12  ;;  %v2951_v34 = vrot.slane %v6630_v7, %v6482_v4  ;;  %v6638_v38 = vld [vmem:[#allocation36_spill] sm:$0xff] }
 0x5e5   :  { %3565 = vbcast.lane.b32.xlu1 %v5546_v18, 264  ;;  %v2960_v31 = vrot.slane %v6631_v60, %v6445_v9  ;;  %v2876_v29 = vsel %vm2267_vm6, %v2875_v22, %v2871_v53  ;;  %v2933_v49 = vsel %vm2267_vm6, %v2932_v23, %v2928_v35  ;;  %v2956_v7 = vrot.slane %v6633_v59, %v6455_v1  ;;  %v6637_v35 = vld [vmem:[#allocation12_spill] sm:$0xff] }
 0x5e6   :  { %v3170_v42 = vsel %vm2253_vm4, %v3169_v43, %v3165_v45  ;;  %v3494_v12 = vsel %vm89_vm1, %v2895_v32, %v2876_v29  ;;  %v2947_v30 = vsel %vm2260_vm5, %v2946_v58, %v2942_v10  ;;  %v2965_v43 = vrot.slane %v6634_v26, %v6462_v2  ;;  %v6636_v32 = vld [vmem:[#allocation58_spill] sm:$0xff] }
 0x5e7   :  { %v3175_v44 = vsel %vm2260_vm5, %v3174_v41, %v3170_v42  ;;  %v2063_v56 = vpop.permute.xlu0 %2062  ;;  %v2066_v5 = vpop.permute.xlu1 %2065  ;;  %v3495_v22 = vsel %vm167_vm7, %v2914_v52, %v3494_v12  ;;  %v6635_v41 = vld [vmem:[#allocation34_spill] sm:$0xff]  ;;  %v2952_v29 = vsel %vm2267_vm6, %v2951_v34, %v2947_v30  ;;  %v2961_v23 = vsel %vm2253_vm4, %v2960_v31, %v2956_v7  ;;  %v6639_v34 = vld [vmem:[#allocation61_spill] sm:$0xff] }
 0x5e8   :  { %v3179_v45 = vrot.slane %v2063_v56, %v6482_v4  ;;  %3561 = vbcast.lane.b32.xlu0 %v5546_v18, 256  ;;  %v2975_v53 = vrot.slane %v6635_v41, %v6455_v1  ;;  %v2970_v60 = vrot.slane %v6636_v32, %v6482_v4  ;;  %v2832_v52 = vrot.slane %v6637_v35, %v6462_v2  ;;  %v6643_v32 = vld [vmem:[#allocation38_spill] sm:$0xff] }
 0x5e9   :  { %v3496_v58 = vsel %vm169_vm8, %v2933_v49, %v3495_v22  ;;  %v2984_v56 = vrot.slane %v6638_v38, %v6462_v2  ;;  %v2998_v31 = vrot.slane %v6639_v34, %v6445_v9  ;;  %v3184_v7 = vrot.slane %v2066_v5, %v6455_v1  ;;  %v6642_v22 = vld [vmem:[#allocation35_spill] sm:$0xff]  ;;  %v6645_v34 = vld [vmem:[#allocation60_spill] sm:$0xff] }
 0x5ea   :  { %v3180_v42 = vsel %vm2267_vm6, %v3179_v45, %v3175_v44  ;;  %v2980_v10 = vsel %vm2253_vm4, %v2979_v25, %v2975_v53  ;;  %v6640_v45 = vrot.slane %v6618_v55, %v6455_v1  ;;  %v6641_v25 = vrot.slane %v6619_v21, %v6445_v9  ;;  %v6644_v38 = vld [vmem:[#allocation3_spill] sm:$0xff] }
 0x5eb   :  { %v2069_v12 = vpop.permute.xlu0 %2068  ;;  %v2072_v59 = vpop.permute.xlu1 %2071  ;;  %v2846_v26 = vrot.slane %v6642_v22, %v6445_v9  ;;  %v5626_v41 = vsel %vm171_vm9, %v2952_v29, %v3496_v58  ;;  %v2966_v5 = vsel %vm2260_vm5, %v2965_v43, %v2961_v23  ;;  %v2994_v55 = vrot.slane %v6643_v32, %v6455_v1  ;;  %v6647_v32 = vld [vmem:[#allocation67_spill] sm:$0xff] }
 0x5ec   :  { %v3188_v30 = vrot.slane %v2069_v12, %v6445_v9  ;;  %v3193_v44 = vrot.slane %v2072_v59, %v6462_v2  ;;  %v5621_v49 = vsel %vm2253_vm4, %v6641_v25, %v6640_v45  ;;  %v5630_v53 = vsel %vm2267_vm6, %v2970_v60, %v2966_v5  ;;  %v6646_v25 = vld [vmem:[#allocation40_spill] sm:$0xff] }
 0x5ed   :  { %v3017_v21 = vrot.slane %v6644_v38, %v6445_v9  ;;  %v2985_v59 = vsel %vm2260_vm5, %v2984_v56, %v2980_v10  ;;  %v2989_v45 = vrot.slane %v6645_v34, %v6482_v4  ;;  %v3036_v29 = vrot.slane %v5108_v61, %v6445_v9  ;;  %v6648_v56 = vld [vmem:[#allocation65_spill] sm:$0xff]  ;;  %v6649_v38 = vld [vmem:[#allocation95_spill] sm:$0xff] }
 0x5ee   :  { %v3189_v12 = vsel %vm2253_vm4, %v3188_v30, %v3184_v7  ;;  %v2999_v58 = vsel %vm2253_vm4, %v2998_v31, %v2994_v55  ;;  %v3003_v5 = vrot.slane %v6646_v25, %v6462_v2  ;;  %v3013_v7 = vrot.slane %v6647_v32, %v6455_v1 }
 0x5ef   :  { %v3194_v43 = vsel %vm2260_vm5, %v3193_v44, %v3189_v12  ;;  %v2075_v23 = vpop.permute.xlu0 %2074  ;;  %v2078_v60 = vpop.permute.xlu1 %2077  ;;  %v3008_v30 = vrot.slane %v6648_v56, %v6482_v4  ;;  %v3022_v61 = vrot.slane %v6649_v38, %v6462_v2  ;;  %v3032_v44 = vrot.slane %v5075_v51, %v6455_v1 }
 0x5f0   :  { %v3198_v10 = vrot.slane %v2075_v23, %v6482_v4  ;;  %v3055_v31 = vrot.slane %v5178_v54, %v6445_v9  ;;  %v3018_v55 = vsel %vm2253_vm4, %v3017_v21, %v3013_v7  ;;  %v3027_v12 = vrot.slane %v5073_v63, %v6482_v4 }
 0x5f1   :  { %v3041_v34 = vrot.slane %v5110_v40, %v6462_v2  ;;  %v3037_v25 = vsel %vm2253_vm4, %v3036_v29, %v3032_v44  ;;  %v3051_v32 = vrot.slane %v5151_v20, %v6455_v1  ;;  %v3074_v51 = vrot.slane %v5234_v33, %v6445_v9  ;;  %v6650_v29 = vld [vmem:[#allocation54_spill] sm:$0xff] }
 0x5f2   :  { %v3199_v23 = vsel %vm2267_vm6, %v3198_v10, %v3194_v43  ;;  %v3060_v63 = vrot.slane %v5180_v50, %v6462_v2  ;;  %v3203_v7 = vrot.slane %v2078_v60, %v6455_v1  ;;  %v3046_v10 = vrot.slane %v6650_v29, %v6482_v4 }
 0x5f3   :  { %v3508_v54 = vsel %vm89_vm1, %v3199_v23, %v3180_v42  ;;  %v2081_v56 = vpop.permute.xlu0 %2080  ;;  %v2084_v21 = vpop.permute.xlu1 %2083  ;;  %v3056_v20 = vsel %vm2253_vm4, %v3055_v31, %v3051_v32  ;;  %v3065_v33 = vrot.slane %v5208_v36, %v6482_v4  ;;  %v6651_v42 = vld [vmem:[#allocation70_spill] sm:$0xff]  ;;  %v5682_v44 = vsel %vm2267_vm6, %v2989_v45, %v2985_v59 }
 0x5f4   :  { %v3207_v40 = vrot.slane %v2081_v56, %v6445_v9  ;;  %v3212_v43 = vrot.slane %v2084_v21, %v6462_v2  ;;  %v3070_v38 = vrot.slane %v6651_v42, %v6455_v1  ;;  %v3004_v50 = vsel %vm2260_vm5, %v3003_v5, %v2999_v58  ;;  %v6652_v42 = vld [vmem:[#allocation71_spill] sm:$0xff] }
 0x5f5   :  { %v3079_v60 = vrot.slane %v5236_v14, %v6462_v2  ;;  %v3093_v31 = vrot.slane %v5301_v48, %v6445_v9  ;;  %v5693_v29 = vsel %vm2267_vm6, %v3008_v30, %v3004_v50  ;;  %v3023_v59 = vsel %vm2260_vm5, %v3022_v61, %v3018_v55  ;;  %v6653_v50 = vld [vmem:[#allocation69_spill] sm:$0xff] }
 0x5f6   :  { %v3208_v23 = vsel %vm2253_vm4, %v3207_v40, %v3203_v7  ;;  %v3075_v56 = vsel %vm2253_vm4, %v3074_v51, %v3070_v38  ;;  %v3042_v45 = vsel %vm2260_vm5, %v3041_v34, %v3037_v25  ;;  %v3061_v14 = vsel %vm2260_vm5, %v3060_v63, %v3056_v20 }
 0x5f7   :  { %v3213_v36 = vsel %vm2260_vm5, %v3212_v43, %v3208_v23  ;;  %v2087_v32 = vpop.permute.xlu0 %2086  ;;  %v2090_v21 = vpop.permute.xlu1 %2089  ;;  %v3028_v5 = vsel %vm2267_vm6, %v3027_v12, %v3023_v59  ;;  %v3047_v51 = vsel %vm2267_vm6, %v3046_v10, %v3042_v45  ;;  %v3066_v48 = vsel %vm2267_vm6, %v3065_v33, %v3061_v14 }
 0x5f8   :  { %v3217_v58 = vrot.slane %v2087_v32, %v6482_v4  ;;  %v3089_v7 = vrot.slane %v5268_v17, %v6455_v1  ;;  %v3080_v30 = vsel %vm2260_vm5, %v3079_v60, %v3075_v56  ;;  %v3084_v61 = vrot.slane %v5266_v8, %v6482_v4 }
 0x5f9   :  { %v3112_v55 = vrot.slane %v5358_v0, %v6445_v9  ;;  %v3098_v12 = vrot.slane %v5303_v47, %v6462_v2  ;;  %v3131_v63 = vrot.slane %v5428_v57, %v6445_v9  ;;  %v3108_v8 = vrot.slane %v5333_v16, %v6455_v1 }
 0x5fa   :  { %v3218_v34 = vsel %vm2267_vm6, %v3217_v58, %v3213_v36  ;;  %v3094_v25 = vsel %vm2253_vm4, %v3093_v31, %v3089_v7  ;;  %v3222_v10 = vrot.slane %v2090_v21, %v6455_v1  ;;  %v3103_v33 = vrot.slane %v5331_v24, %v6482_v4 }
 0x5fb   :  { %v3509_v17 = vsel %vm167_vm7, %v3218_v34, %v3508_v54  ;;  %v2093_v40 = vpop.permute.xlu0 %2092  ;;  %v2096_v43 = vpop.permute.xlu1 %2095  ;;  %v3117_v47 = vrot.slane %v5360_v62, %v6462_v2  ;;  %v3127_v57 = vrot.slane %v5396_v15, %v6455_v1  ;;  %v3150_v54 = vrot.slane %v5485_v19, %v6445_v9 }
 0x5fc   :  { %v3226_v0 = vrot.slane %v2093_v40, %v6445_v9  ;;  %v3231_v20 = vrot.slane %v2096_v43, %v6462_v2  ;;  %v3113_v16 = vsel %vm2253_vm4, %v3112_v55, %v3108_v8  ;;  %v3122_v38 = vrot.slane %v6652_v42, %v6482_v4  ;;  %v6654_v40 = vld [vmem:[#allocation33_spill] sm:$0xff] }
 0x5fd   :  { %v3136_v60 = vrot.slane %v6653_v50, %v6462_v2  ;;  %v3132_v24 = vsel %vm2253_vm4, %v3131_v63, %v3127_v57  ;;  %v3141_v62 = vrot.slane %v5456_v37, %v6482_v4  ;;  %v3146_v15 = vrot.slane %v5458_v28, %v6455_v1 }
 0x5fe   :  { %v3227_v23 = vsel %vm2253_vm4, %v3226_v0, %v3222_v10  ;;  %v3501_v36 = vsel %vm89_vm1, %v3047_v51, %v3028_v5  ;;  %v3085_v32 = vsel %vm2267_vm6, %v3084_v61, %v3080_v30  ;;  %v3155_v21 = vrot.slane %v5487_v6, %v6462_v2  ;;  %v6655_v0 = vld [vmem:[#allocation13_spill] sm:$0xff] }
 0x5ff   :  { %v3232_v19 = vsel %vm2260_vm5, %v3231_v20, %v3227_v23  ;;  %v2099_v56 = vpop.permute.xlu0 %2098  ;;  %v2102_v31 = vpop.permute.xlu1 %2101  ;;  %v3502_v45 = vsel %vm167_vm7, %v3066_v48, %v3501_v36  ;;  %v3099_v37 = vsel %vm2260_vm5, %v3098_v12, %v3094_v25  ;;  %v3151_v14 = vsel %vm2253_vm4, %v3150_v54, %v3146_v15  ;;  %v6656_v54 = vld [vmem:[#allocation14_spill] sm:$0xff] }
 0x600   :  { %v3236_v59 = vrot.slane %v2099_v56, %v6482_v4  ;;  %v3160_v28 = vrot.slane %v5522_v46, %v6482_v4  ;;  %v3104_v58 = vsel %vm2267_vm6, %v3103_v33, %v3099_v37  ;;  %v3118_v5 = vsel %vm2260_vm5, %v3117_v47, %v3113_v16 }
 0x601   :  { %v3137_v51 = vsel %vm2260_vm5, %v3136_v60, %v3132_v24  ;;  %v3503_v6 = vsel %vm169_vm8, %v3085_v32, %v3502_v45  ;;  %v3123_v30 = vsel %vm2267_vm6, %v3122_v38, %v3118_v5  ;;  %v3156_v46 = vsel %vm2260_vm5, %v3155_v21, %v3151_v14  ;;  %v6657_v60 = vld [vmem:[#allocation37_spill] sm:$0xff] }
 0x602   :  { %v3237_v7 = vsel %vm2267_vm6, %v3236_v59, %v3232_v19  ;;  %v3142_v48 = vsel %vm2267_vm6, %v3141_v62, %v3137_v51  ;;  %v3241_v25 = vrot.slane %v2102_v31, %v6455_v1  ;;  %v2837_v43 = vrot.slane %v6654_v40, %v6482_v4  ;;  %v6658_v62 = vld [vmem:[#allocation10_spill] sm:$0xff]  ;;  %v6661_v19 = vld [vmem:[#allocation72_spill] sm:$0xff]  ;;  %v6662_v31 = vld [vmem:[#allocation29_spill] sm:$0xff] }
 0x603   :  { %v3510_v61 = vsel %vm169_vm8, %v3237_v7, %v3509_v17  ;;  %v2105_v55 = vpop.permute.xlu0 %2104  ;;  %v2108_v34 = vpop.permute.xlu1 %2107  ;;  %v3504_v8 = vsel %vm171_vm9, %v3104_v58, %v3503_v6  ;;  %v3498_v10 = vsel %vm173_vm10, %v5630_v53, %v5626_v41  ;;  %v3161_v17 = vsel %vm2267_vm6, %v3160_v28, %v3156_v46 }
 0x604   :  { %v3245_v12 = vrot.slane %v2105_v55, %v6445_v9  ;;  %v3250_v63 = vrot.slane %v2108_v34, %v6462_v2  ;;  %v2842_v20 = vrot.slane %v6655_v0, %v6455_v1  ;;  %v3499_v47 = vsel %vm175_vm11, %v5682_v44, %v3498_v10 }
 0x605   :  { %v3505_v57 = vsel %vm173_vm10, %v3123_v30, %v3504_v8  ;;  %v2851_v16 = vrot.slane %v6656_v54, %v6462_v2  ;;  %v3500_v53 = vsel %vm177_vm12, %v5693_v29, %v3499_v47  ;;  %v2856_v23 = vrot.slane %v6657_v60, %v6482_v4 }
 0x606   :  { %v3246_v33 = vsel %vm2253_vm4, %v3245_v12, %v3241_v25  ;;  %v3506_v50 = vsel %vm175_vm11, %v3142_v48, %v3505_v57  ;;  %v2847_v44 = vsel %vm2253_vm4, %v2846_v26, %v2842_v20  ;;  %v3490_v29 = vsel %vm171_vm9, %v5493_v11, %v5490_v39  ;;  %v6660_v26 = vld [vmem:[#allocation74_spill] sm:$0xff] }
 0x607   :  { %v3251_v42 = vsel %vm2260_vm5, %v3250_v63, %v3246_v33  ;;  %v2111_v38 = vpop.permute.xlu0 %2110  ;;  %3534 = vadd.xlane.f32.xlu0 %v5568_v3  ;;  %v2114_v41 = vpop.permute.xlu1 %2113  ;;  %v3507_v3 = vsel %vm177_vm12, %v3161_v17, %v3506_v50  ;;  %v6659_v15 = vrot.slane %v6658_v62, %v6462_v2  ;;  %v3486_v56 = vsel %vm177_vm12, %v6661_v19, %v6660_v26 }
 0x608   :  { %v3255_v24 = vrot.slane %v2111_v38, %v6482_v4  ;;  %v6663_v36 = vrot.slane %v6662_v31, %v6482_v4  ;;  %v2833_v39 = vsel %vm2260_vm5, %v2832_v52, %v5621_v49  ;;  %v3542_v32 = vsel %vm43_vm0, %v3500_v53, 0.0 }
 0x609   :  { %3531 = vadd.xlane.f32.xlu1 %v5534_v27  ;;  %v2814_v22 = vsel %vm2260_vm5, %v6659_v15, %v5508_v13  ;;  %v2838_v13 = vsel %vm2267_vm6, %v2837_v43, %v2833_v39  ;;  %v2852_v21 = vsel %vm2260_vm5, %v2851_v16, %v2847_v44  ;;  %v3545_v14 = vsel %vm43_vm0, %v3507_v3, 0.0 }
 0x60a   :  { %v2819_v27 = vsel %vm2267_vm6, %v6663_v36, %v2814_v22  ;;  %v3256_v11 = vsel %vm2267_vm6, %v3255_v24, %v3251_v42  ;;  %v3260_v28 = vrot.slane %v2114_v41, %v6455_v1  ;;  %v2857_v49 = vsel %vm2267_vm6, %v2856_v23, %v2852_v21 }
 0x60b   :  { %v3511_v59 = vsel %vm171_vm9, %v3256_v11, %v3510_v61  ;;  %v2117_v45 = vpop.permute.xlu0 %2116  ;;  %3543 = vadd.xlane.f32.xlu0 %v3542_v32  ;;  %v2120_v37 = vpop.permute.xlu1 %2119  ;;  %v3491_v58 = vsel %vm173_vm10, %v2819_v27, %v3490_v29  ;;  %v3536_v51 = vsel %vm43_vm0, %v3486_v56, 0.0 }
 0x60c   :  { %v3264_v35 = vrot.slane %v2117_v45, %v6445_v9  ;;  %v3269_v52 = vrot.slane %v2120_v37, %v6462_v2  ;;  %v3492_v7 = vsel %vm175_vm11, %v2838_v13, %v3491_v58 }
 0x60d   :  { %3546 = vadd.xlane.f32.xlu1 %v3545_v14  ;;  %v3493_v61 = vsel %vm177_vm12, %v2857_v49, %v3492_v7 }
 0x60e   :  { %v3265_v5 = vsel %vm2253_vm4, %v3264_v35, %v3260_v28  ;;  %v3539_v46 = vsel %vm43_vm0, %v3493_v61, 0.0 }
 0x60f   :  { %v3270_v6 = vsel %vm2260_vm5, %v3269_v52, %v3265_v5  ;;  %v2123_v30 = vpop.permute.xlu0 %2122  ;;  %3537 = vadd.xlane.f32.xlu0 %v3536_v51  ;;  %v2126_v48 = vpop.permute.xlu1 %2125 }
 0x610   :  { %v3274_v55 = vrot.slane %v2123_v30, %v6482_v4  ;;  %v3279_v40 = vrot.slane %v2126_v48, %v6455_v1 }
 0x612   :  { %v3275_v34 = vsel %vm2267_vm6, %v3274_v55, %v3270_v6 }
 0x613   :  { %v2129_v25 = vpop.permute.xlu0 %2128  ;;  %3540 = vadd.xlane.f32.xlu0 %v3539_v46  ;;  %v2132_v12 = vpop.permute.xlu1 %2131  ;;  %v3512_v63 = vsel %vm173_vm10, %v3275_v34, %v3511_v59 }
 0x614   :  { %v3283_v43 = vrot.slane %v2129_v25, %v6445_v9  ;;  %v3288_v8 = vrot.slane %v2132_v12, %v6462_v2 }
 0x616   :  { %v3284_v10 = vsel %vm2253_vm4, %v3283_v43, %v3279_v40 }
 0x617   :  { %v3289_v17 = vsel %vm2260_vm5, %v3288_v8, %v3284_v10  ;;  %v2135_v0 = vpop.permute.xlu0 %2134  ;;  %v2138_v20 = vpop.permute.xlu1 %2137 }
 0x618   :  { %v3293_v33 = vrot.slane %v2135_v0, %v6482_v4  ;;  %v3298_v34 = vrot.slane %v2138_v20, %v6455_v1 }
 0x61a   :  { %v3294_v47 = vsel %vm2267_vm6, %v3293_v33, %v3289_v17 }
 0x61b   :  { %v2141_v57 = vpop.permute.xlu0 %2140  ;;  %v2150_v54 = vpop.permute.xlu1 %2149  ;;  %v5840_v16 = vsel %vm175_vm11, %v3294_v47, %v3512_v63 }
 0x61c   :  { %v3302_v52 = vrot.slane %v2141_v57, %v6445_v9  ;;  %v3317_v5 = vrot.slane %v2150_v54, %v6455_v1 }
 0x61e   :  { %v3303_v10 = vsel %vm2253_vm4, %v3302_v52, %v3298_v34 }
 0x61f   :  { %v2153_v42 = vpop.permute.xlu0 %2152 }
 0x620   :  { %v2162_v38 = vpop.permute.xlu1 %2161  ;;  %v3321_v45 = vrot.slane %v2153_v42, %v6445_v9 }
 0x621   :  { %v3336_v37 = vrot.slane %v2162_v38, %v6455_v1 }
 0x622   :  { %v3322_v46 = vsel %vm2253_vm4, %v3321_v45, %v3317_v5 }
 0x623   :  { %v2165_v41 = vpop.permute.xlu0 %2164 }
 0x624   :  { %v2156_v53 = vpop.permute.xlu1 %2155  ;;  %v3340_v21 = vrot.slane %v2165_v41, %v6445_v9 }
 0x625   :  { %v3326_v49 = vrot.slane %v2156_v53, %v6462_v2 }
 0x626   :  { %v3341_v51 = vsel %vm2253_vm4, %v3340_v21, %v3336_v37 }
 0x627   :  { %v2168_v50 = vpop.permute.xlu0 %2167  ;;  %v3327_v43 = vsel %vm2260_vm5, %v3326_v49, %v3322_v46 }
 0x628   :  { %v2174_v44 = vpop.permute.xlu1 %2173  ;;  %v3345_v59 = vrot.slane %v2168_v50, %v6462_v2 }
 0x629   :  { %3573 = vbcast.lane.b32.xlu0 %v5546_v18, 280  ;;  %v3355_v48 = vrot.slane %v2174_v44, %v6455_v1 }
 0x62a   :  { %v3346_v30 = vsel %vm2260_vm5, %v3345_v59, %v3341_v51 }
 0x62b   :  { %v2177_v60 = vpop.permute.xlu0 %2176 }
 0x62c   :  { %v2159_v23 = vpop.permute.xlu1 %2158  ;;  %v3359_v58 = vrot.slane %v2177_v60, %v6445_v9 }
 0x62d   :  { %v3331_v7 = vrot.slane %v2159_v23, %v6482_v4 }
 0x62e   :  { %v3360_v8 = vsel %vm2253_vm4, %v3359_v58, %v3355_v48 }
 0x62f   :  { %v2171_v24 = vpop.permute.xlu0 %2170  ;;  %v3332_v17 = vsel %vm2267_vm6, %v3331_v7, %v3327_v43 }
 0x630   :  { %v2180_v3 = vpop.permute.xlu1 %2179  ;;  %v3350_v14 = vrot.slane %v2171_v24, %v6482_v4 }
 0x631   :  { %v3364_v6 = vrot.slane %v2180_v3, %v6462_v2 }
 0x632   :  { %v3351_v25 = vsel %vm2267_vm6, %v3350_v14, %v3346_v30 }
 0x633   :  { %v2186_v29 = vpop.permute.xlu0 %2185  ;;  %v3365_v0 = vsel %vm2260_vm5, %v3364_v6, %v3360_v8  ;;  %v3515_v33 = vsel %vm89_vm1, %v3351_v25, %v3332_v17 }
 0x634   :  { %v2189_v62 = vpop.permute.xlu1 %2188  ;;  %v3374_v61 = vrot.slane %v2186_v29, %v6455_v1 }
 0x635   :  { %v3378_v55 = vrot.slane %v2189_v62, %v6445_v9 }
 0x637   :  { %v5843_v15 = vpop.permute.xlu0 %2182  ;;  %v3379_v47 = vsel %vm2253_vm4, %v3378_v55, %v3374_v61 }
 0x638   :  { %v2192_v22 = vpop.permute.xlu1 %2191  ;;  %v3369_v42 = vrot.slane %v5843_v15, %v6482_v4 }
 0x639   :  { %v3383_v12 = vrot.slane %v2192_v22, %v6462_v2 }
 0x63b   :  { %v2198_v26 = vpop.permute.xlu0 %2197  ;;  %v3384_v38 = vsel %vm2260_vm5, %v3383_v12, %v3379_v47 }
 0x63c   :  { %v2201_v19 = vpop.permute.xlu1 %2200  ;;  %v3393_v57 = vrot.slane %v2198_v26, %v6455_v1 }
 0x63d   :  { %v3397_v54 = vrot.slane %v2201_v19, %v6445_v9 }
 0x63f   :  { %v5845_v56 = vpop.permute.xlu0 %2194  ;;  %v3398_v26 = vsel %vm2253_vm4, %v3397_v54, %v3393_v57 }
 0x640   :  { %v5847_v31 = vpop.permute.xlu1 %2203  ;;  %v3388_v41 = vrot.slane %v5845_v56, %v6482_v4 }
 0x641   :  { %v3402_v53 = vrot.slane %v5847_v31, %v6462_v2 }
 0x643   :  { %v5849_v36 = vpop.permute.xlu0 %2209 }
 0x644   :  { %v5851_v27 = vpop.permute.xlu1 %2212  ;;  %v3412_v60 = vrot.slane %v5849_v36, %v6455_v1  ;;  %v3370_v36 = vsel %vm2267_vm6, %v3369_v42, %v3365_v0 }
 0x645   :  { %v3416_v23 = vrot.slane %v5851_v27, %v6445_v9  ;;  %v3389_v27 = vsel %vm2267_vm6, %v3388_v41, %v3384_v38  ;;  %v3516_v49 = vsel %vm167_vm7, %v3370_v36, %v3515_v33 }
 0x646   :  { %v3517_v51 = vsel %vm169_vm8, %v3389_v27, %v3516_v49 }
 0x647   :  { %v5853_v39 = vpop.permute.xlu0 %2206  ;;  %v3417_v21 = vsel %vm2253_vm4, %v3416_v23, %v3412_v60 }
 0x648   :  { %v5855_v11 = vpop.permute.xlu1 %2215  ;;  %v3407_v24 = vrot.slane %v5853_v39, %v6482_v4  ;;  %v3403_v39 = vsel %vm2260_vm5, %v3402_v53, %v3398_v26 }
 0x649   :  { %v3421_v29 = vrot.slane %v5855_v11, %v6462_v2 }
 0x64a   :  { %v3408_v14 = vsel %vm2267_vm6, %v3407_v24, %v3403_v39 }
 0x64b   :  { %v5857_v32 = vpop.permute.xlu0 %2221  ;;  %v3518_v30 = vsel %vm171_vm9, %v3408_v14, %v3517_v51 }
 0x64c   :  { %v5859_v13 = vpop.permute.xlu1 %2224  ;;  %v3431_v62 = vrot.slane %v5857_v32, %v6455_v1 }
 0x64d   :  { %v3435_v15 = vrot.slane %v5859_v13, %v6445_v9 }
 0x64f   :  { %v2144_v28 = vpop.permute.xlu0 %2143 }
 0x650   :  { %v5866_v35 = vpop.permute.xlu1 %2218  ;;  %v3307_v20 = vrot.slane %v2144_v28, %v6462_v2  ;;  %v3422_v28 = vsel %vm2260_vm5, %v3421_v29, %v3417_v21 }
 0x651   :  { %v3426_v19 = vrot.slane %v5866_v35, %v6482_v4  ;;  %v3436_v35 = vsel %vm2253_vm4, %v3435_v15, %v3431_v62 }
 0x652   :  { %v3308_v22 = vsel %vm2260_vm5, %v3307_v20, %v3303_v10 }
 0x653   :  { %v2228_v63 = vpop.permute.xlu0 %2227 }
 0x654   :  { %v2234_v40 = vpop.permute.xlu1 %2233  ;;  %v3440_v56 = vrot.slane %v2228_v63, %v6462_v2 }
 0x655   :  { %v3450_v5 = vrot.slane %v2234_v40, %v6455_v1 }
 0x656   :  { %v3441_v58 = vsel %vm2260_vm5, %v3440_v56, %v3436_v35 }
 0x657   :  { %v2237_v50 = vpop.permute.xlu0 %2236 }
 0x658   :  { %v2147_v44 = vpop.permute.xlu1 %2146  ;;  %v3454_v59 = vrot.slane %v2237_v50, %v6445_v9 }
 0x659   :  { %v3312_v3 = vrot.slane %v2147_v44, %v6482_v4 }
 0x65a   :  { %v3455_v48 = vsel %vm2253_vm4, %v3454_v59, %v3450_v5 }
 0x65b   :  { %v3313_v31 = vsel %vm2267_vm6, %v3312_v3, %v3308_v22  ;;  %v2231_v11 = vpop.permute.xlu0 %2230 }
 0x65c   :  { %v2240_v32 = vpop.permute.xlu1 %2239  ;;  %v3514_v13 = vsel %vm177_vm12, %v3313_v31, %v5840_v16  ;;  %v3445_v45 = vrot.slane %v2231_v11, %v6482_v4  ;;  %v3427_v16 = vsel %vm2267_vm6, %v3426_v19, %v3422_v28 }
 0x65d   :  { %v3548_v37 = vsel %vm43_vm0, %v3514_v13, 0.0  ;;  %v3459_v52 = vrot.slane %v2240_v32, %v6462_v2  ;;  %v3519_v34 = vsel %vm173_vm10, %v3427_v16, %v3518_v30 }
 0x65e   :  { %3549 = vadd.xlane.f32.xlu1 %v3548_v37  ;;  %v3446_v7 = vsel %vm2267_vm6, %v3445_v45, %v3441_v58 }
 0x65f   :  { %v2243_v6 = vpop.permute.xlu0 %2242  ;;  %v3460_v55 = vsel %vm2260_vm5, %v3459_v52, %v3455_v48  ;;  %v3520_v25 = vsel %vm175_vm11, %v3446_v7, %v3519_v34 }
 0x660   :  { %v3464_v61 = vrot.slane %v2243_v6, %v6482_v4  ;;  %v3566_v43 = vpop.permute.xlu1 %3565 }
 0x662   :  { %v3465_v46 = vsel %vm2267_vm6, %v3464_v61, %v3460_v55 }
 0x663   :  { %v3521_v12 = vsel %vm177_vm12, %v3465_v46, %v3520_v25  ;;  %v3562_v40 = vpop.permute.xlu0 %3561 }
 0x664   :  { %v3551_v63 = vsel %vm43_vm0, %v3521_v12, 0.0 }
 0x665   :  { %3552 = vadd.xlane.f32.xlu1 %v3551_v63 }
 0x676   :  { %3569 = vbcast.lane.b32.xlu1 %v5546_v18, 272 }
 0x690   :  { %v3535_v8 = vpop.xlane.xlu0 %3534 }
 0x691   :  { %v3580_v10 = vadd.f32 %v3566_v43, %v3535_v8 }
 0x692   :  { %v3532_v17 = vpop.xlane.xlu1 %3531 }
 0x693   :  { %v3579_v0 = vadd.f32 %v3562_v40, %v3532_v17  ;;  %3599 = vperm.xlu0 %3668, %v3580_v10  }
 0x694   :  { %v3544_v20 = vpop.xlane.xlu0 %3543 }
 0x695   :  { %3596 = vperm.xlu1 %3669, %v3579_v0   ;;  %v3583_v33 = vadd.f32 %v3562_v40, %v3544_v20 }
 0x696   :  { %v3547_v47 = vpop.xlane.xlu1 %3546 }
 0x697   :  { %v3584_v57 = vadd.f32 %v3566_v43, %v3547_v47 }
 0x698   :  { %v3538_v54 = vpop.xlane.xlu0 %3537 }
 0x699   :  { %3608 = vperm.xlu1 %3669, %v3583_v33   ;;  %3611 = vperm.xlu0 %3668, %v3584_v57  }
 0x69c   :  { %v3541_v38 = vpop.xlane.xlu0 %3540 }
 0x6a0   :  { %v3574_v44 = vpop.permute.xlu0 %3573 }
 0x6a1   :  { %v3582_v60 = vadd.f32 %v3574_v44, %v3541_v38 }
 0x6e7   :  { %v3550_v42 = vpop.xlane.xlu1 %3549 }
 0x6ee   :  { %v3553_v41 = vpop.xlane.xlu1 %3552 }
 0x6ef   :  { %v3586_v23 = vadd.f32 %v3574_v44, %v3553_v41 }
 0x6f2   :  { %v3570_v53 = vpop.permute.xlu1 %3569 }
 0x6f3   :  { %v3581_v18 = vadd.f32 %v3570_v53, %v3538_v54  ;;  %v3585_v50 = vadd.f32 %v3570_v53, %v3550_v42 }
 0x6f5   :  { %3614 = vperm.xlu0 %3668, %v3585_v50   ;;  %3602 = vperm.xlu1 %3669, %v3581_v18  }
 0x6f9   :  { %3617 = vperm.xlu0 %3668, %v3586_v23   ;;  %3605 = vperm.xlu1 %3669, %v3582_v60  }
 0x70e   :  { %v3600_v24 = vpop.permute.xlu0 %3599 }
 0x70f   :  { %v3626_v26 = vrot.slane %v3600_v24, %v6445_v9 }
 0x710   :  { %v3597_v3 = vpop.permute.xlu1 %3596 }
 0x711   :  { %v3622_v19 = vrot.slane %v3597_v3, %v6455_v1 }
 0x713   :  { %v3627_v32 = vsel %vm2253_vm4, %v3626_v26, %v3622_v19 }
 0x714   :  { %v3612_v29 = vpop.permute.xlu0 %3611  ;;  %v3609_v62 = vpop.permute.xlu1 %3608 }
 0x715   :  { %v3645_v56 = vrot.slane %v3612_v29, %v6445_v9  ;;  %v3641_v31 = vrot.slane %v3609_v62, %v6455_v1 }
 0x717   :  { %v3646_v13 = vsel %vm2253_vm4, %v3645_v56, %v3641_v31 }
 0x770   :  { %v3615_v15 = vpop.permute.xlu0 %3614  ;;  %v3603_v22 = vpop.permute.xlu1 %3602 }
 0x771   :  { %v3650_v36 = vrot.slane %v3615_v15, %v6462_v2  ;;  %v3631_v27 = vrot.slane %v3603_v22, %v6462_v2 }
 0x773   :  { %v3651_v45 = vsel %vm2260_vm5, %v3650_v36, %v3646_v13  ;;  %v3632_v9 = vsel %vm2260_vm5, %v3631_v27, %v3627_v32 }
 0x774   :  { %v3618_v39 = vpop.permute.xlu0 %3617  ;;  %v3606_v11 = vpop.permute.xlu1 %3605 }
 0x775   :  { %v3655_v21 = vrot.slane %v3618_v39, %v6482_v4  ;;  %v3636_v59 = vrot.slane %v3606_v11, %v6482_v4 }
 0x777   :  { %v3656_v1 = vsel %vm2267_vm6, %v3655_v21, %v3651_v45  ;;  %v3637_v37 = vsel %vm2267_vm6, %v3636_v59, %v3632_v9 }
 0x778   :  { %v3657_v2 = vsel %vm89_vm1, %v3656_v1, %v3637_v37 }
 0x779   :  { %3660 = vst.msk [vmem:[%s5972_s6] sm:$0x3] %vm3659_vm13, %v3657_v2 }

</bundles_post_ra>
